<compile_context>
chip_gen: v7x
topology: tpu7x:2x2x1
jax: 0.10.0
libtpu: 0.0.40
codegen_flags: <defaults>
</compile_context>

<pallas_src>
import functools
import math

import jax
import jax.numpy as jnp
from jax.experimental import pallas as pl
from jax.experimental.pallas import tpu as pltpu


# ------------------------------ static layout ------------------------------ #

IN_FEATURES = 22
HIDDEN = 720
F_PAD = 768                    # 6 * 128, lane-dense hidden width
Z_TILE = 128                   # one lane tile for latent / eps / recon
N_ENC = 8                      # encoder Linears
N_DEC = 9                      # decoder Linears
MU_LAYER = N_ENC               # merged fc_mu / fc_logvar layer index (8)
N_LAYERS = N_ENC + 1 + N_DEC   # 18
ENC_LAST = N_ENC - 1           # last encoder Linear (no ReLU) = 7
LAST_LAYER = N_LAYERS - 1      # last decoder Linear (no ReLU) = 17

LAYERS_PER_STEP = 3            # K: layers fused per grid step
N_STEPS = N_LAYERS // LAYERS_PER_STEP
assert N_LAYERS % LAYERS_PER_STEP == 0
assert IN_FEATURES <= Z_TILE


# ------------------------------ Pallas kernel ------------------------------ #

def _vae_fused_kernel(x_ref, eps_ref, w_ref, s_ref, b_ref,
                      out_ref, mulv_ref, act_ref):
    """One grid step == LAYERS_PER_STEP Linear layers (weights streamed/step).

    x_ref    : (B_PAD, F_PAD)      bf16  padded input               (resident)
    eps_ref  : (B_PAD, Z_TILE)     f32   padded reparam noise       (resident)
    w_ref    : (K, F_PAD, F_PAD)   int8  this step's padded weights (streamed)
    s_ref    : (K, 1, F_PAD)       f32   per-output-column dequant scales
    b_ref    : (K, 1, F_PAD)       f32   padded biases
    out_ref  : (B_PAD, Z_TILE)     f32   reconstruction (valid cols [0, 22))
    mulv_ref : (B_PAD, 2*Z_TILE)   f32   mu in [0,128), logvar in [128,256)
    act_ref  : (B_PAD, F_PAD)      bf16  activation carried across layers
    """
    g = pl.program_id(0)

    # Load the (padded) network input into the carried activation.
    @pl.when(g == 0)
    def _():
        act_ref[...] = x_ref[...]

    for sub in range(LAYERS_PER_STEP):
        # y = act @ dequant(W_l) + b_l
        #   int8 -> bf16 cast on the VPU, f32 accumulation on the MXU, then the
        #   per-output-column scale is applied to the small (B, F) accumulator.
        w_bf = w_ref[sub].astype(jnp.bfloat16)
        y = jnp.dot(act_ref[...], w_bf, preferred_element_type=jnp.float32)
        y = y * s_ref[sub] + b_ref[sub]

        # Which special layers can land on this sub-slot (statically known)?
        is_enc_last = ((g == ENC_LAST // LAYERS_PER_STEP)
                       if sub == ENC_LAST % LAYERS_PER_STEP else None)
        is_mu = ((g == MU_LAYER // LAYERS_PER_STEP)
                 if sub == MU_LAYER % LAYERS_PER_STEP else None)
        is_last = ((g == LAST_LAYER // LAYERS_PER_STEP)
                   if sub == LAST_LAYER % LAYERS_PER_STEP else None)
        specials = [c for c in (is_enc_last, is_mu, is_last) if c is not None]

        # Default hidden layer: fused bias + ReLU feeding the next layer.
        def _relu_store(y=y):
            act_ref[...] = jnp.maximum(y, 0.0).astype(act_ref.dtype)

        if not specials:
            _relu_store()                          # this sub-slot is always plain
        else:
            pl.when(jnp.logical_not(
                functools.reduce(jnp.logical_or, specials)))(_relu_store)

        if is_enc_last is not None:
            @pl.when(is_enc_last)
            def _(y=y):
                # Last encoder Linear: no ReLU.
                act_ref[...] = y.astype(act_ref.dtype)

        if is_mu is not None:
            @pl.when(is_mu)
            def _(y=y):
                # Merged mu|logvar layer: emit (mu, logvar) and fuse the
                # reparameterization  z = eps * exp(0.5*logvar) + mu.
                mulv_ref[...] = y[:, :2 * Z_TILE]
                mu_t = y[:, :Z_TILE]                  # lanes [0, 128)
                lv_t = y[:, Z_TILE:2 * Z_TILE]        # lanes [128, 256)
                z_t = eps_ref[...] * jnp.exp(0.5 * lv_t) + mu_t
                # Rows [Z_TILE, F_PAD) of the first decoder weight are zero, so
                # stale act lanes >= 128 contribute nothing: write only the
                # first lane tile (no full-width zero store needed).
                act_ref[:, :Z_TILE] = z_t.astype(act_ref.dtype)

        if is_last is not None:
            @pl.when(is_last)
            def _(y=y):
                # Final decoder layer writes the reconstruction (valid 22 cols).
                out_ref[...] = y[:, :Z_TILE]


# ------------------------------ forward wrapper ----------------------------- #

def vae_forward(w_q, w_scale, b_stack, x, eps, *, z_dim):
    """Mirrors VAE.forward: returns (recon, mu, logvar)."""
    B, in_f = x.shape
    B_PAD = max(8, -(-B // 8) * 8)

    x_pad = jnp.zeros((B_PAD, F_PAD), jnp.bfloat16).at[:B, :in_f].set(
        x.astype(jnp.bfloat16))
    eps_pad = jnp.zeros((B_PAD, Z_TILE), jnp.float32).at[:B, :z_dim].set(eps)

    w_bytes = int(w_q.size) * w_q.dtype.itemsize                  # int8 weights
    misc_bytes = ((int(w_scale.size) + int(b_stack.size)) * 4
                  + B_PAD * F_PAD * 2                             # x (bf16)
                  + B_PAD * Z_TILE * 4                            # eps
                  + B_PAD * 3 * Z_TILE * 4)                       # recon + mu|lv
    cost = pl.CostEstimate(
        flops=2 * B_PAD * F_PAD * F_PAD * N_LAYERS,
        transcendentals=B_PAD * Z_TILE,
        bytes_accessed=w_bytes + misc_bytes,
    )

    out, mulv = pl.pallas_call(
        _vae_fused_kernel,
        out_shape=(
            jax.ShapeDtypeStruct((B_PAD, Z_TILE), jnp.float32),       # recon
            jax.ShapeDtypeStruct((B_PAD, 2 * Z_TILE), jnp.float32),   # mu|logvar
        ),
        grid_spec=pltpu.PrefetchScalarGridSpec(
            num_scalar_prefetch=0,
            grid=(N_STEPS,),
            in_specs=[
                pl.BlockSpec((B_PAD, F_PAD), lambda g: (0, 0)),       # x (resident)
                pl.BlockSpec((B_PAD, Z_TILE), lambda g: (0, 0)),      # eps (resident)
                pl.BlockSpec((LAYERS_PER_STEP, F_PAD, F_PAD),
                             lambda g: (g, 0, 0)),                    # W   (streamed)
                pl.BlockSpec((LAYERS_PER_STEP, 1, F_PAD),
                             lambda g: (g, 0, 0)),                    # scales
                pl.BlockSpec((LAYERS_PER_STEP, 1, F_PAD),
                             lambda g: (g, 0, 0)),                    # biases
            ],
            out_specs=[
                pl.BlockSpec((B_PAD, Z_TILE), lambda g: (0, 0)),      # recon
                pl.BlockSpec((B_PAD, 2 * Z_TILE), lambda g: (0, 0)),  # mu|logvar
            ],
            scratch_shapes=[pltpu.VMEM((B_PAD, F_PAD), jnp.bfloat16)],  # act carry
        ),
        compiler_params=pltpu.CompilerParams(
            dimension_semantics=("arbitrary",)),   # strictly sequential layer chain
        cost_estimate=cost,
    )(x_pad, eps_pad, w_q, w_scale, b_stack)

    recon = out[:B, :IN_FEATURES]
    mu = mulv[:B, :z_dim]
    logvar = mulv[:B, Z_TILE:Z_TILE + z_dim]
    return recon, mu, logvar


# --------------------------- parameter construction ------------------------- #

def _kaiming_uniform(key, out_f, in_f):
    # torch.nn.init.kaiming_uniform_ default (a=0): bound = sqrt(6 / fan_in)
    # (the module applies weights_init / explicit kaiming_uniform_ to every Linear)
    bound = math.sqrt(6.0 / in_f)
    return jax.random.uniform(key, (out_f, in_f), jnp.float32, -bound, bound)


def _bias_init(key, out_f, in_f):
    # PyTorch Linear default bias init: U(-1/sqrt(fan_in), 1/sqrt(fan_in))
    bound = 1.0 / math.sqrt(in_f)
    return jax.random.uniform(key, (1, out_f), jnp.float32, -bound, bound)


def make_vae_params(key, z_dim):
    """Per-layer params, stored as (W^T (in,out), b (1,out)) in f32."""
    def make_layer(k, in_f, out_f):
        kw, kb = jax.random.split(k)
        w = _kaiming_uniform(kw, out_f, in_f)   # PyTorch layout (out, in)
        b = _bias_init(kb, out_f, in_f)
        return (jnp.transpose(w), b)            # (in, out), (1, out)

    enc_dims = [(IN_FEATURES, HIDDEN)] + [(HIDDEN, HIDDEN)] * 7
    dec_dims = [(z_dim, HIDDEN)] + [(HIDDEN, HIDDEN)] * 7 + [(HIDDEN, IN_FEATURES)]
    n_keys = len(enc_dims) + 2 + len(dec_dims)
    keys = iter(jax.random.split(key, n_keys))

    params = {}
    params["encode"] = [make_layer(next(keys), i, o) for (i, o) in enc_dims]
    params["fc_mu"] = make_layer(next(keys), HIDDEN, z_dim)
    params["fc_logvar"] = make_layer(next(keys), HIDDEN, z_dim)
    params["decode"] = [make_layer(next(keys), i, o) for (i, o) in dec_dims]
    return params


def stack_and_pad_params(params, z_dim):
    """Zero-pad every layer to (F_PAD, F_PAD) and stack for streaming."""
    assert z_dim <= Z_TILE, "z_dim must fit in one 128-lane tile"

    def pad_w(w_t):
        p = jnp.zeros((F_PAD, F_PAD), jnp.float32)
        return p.at[: w_t.shape[0], : w_t.shape[1]].set(w_t)

    def pad_b(b):
        p = jnp.zeros((1, F_PAD), jnp.float32)
        return p.at[:, : b.shape[1]].set(b)

    ws, bs = [], []
    for w_t, b in params["encode"]:
        ws.append(pad_w(w_t))
        bs.append(pad_b(b))

    # Merged fc_mu / fc_logvar: mu -> lanes [0, z), logvar -> lanes [128, 128+z).
    (wmu_t, bmu), (wlv_t, blv) = params["fc_mu"], params["fc_logvar"]
    w_mix = jnp.zeros((F_PAD, F_PAD), jnp.float32)
    w_mix = w_mix.at[:HIDDEN, :z_dim].set(wmu_t)
    w_mix = w_mix.at[:HIDDEN, Z_TILE:Z_TILE + z_dim].set(wlv_t)
    b_mix = jnp.zeros((1, F_PAD), jnp.float32)
    b_mix = b_mix.at[:, :z_dim].set(bmu)
    b_mix = b_mix.at[:, Z_TILE:Z_TILE + z_dim].set(blv)
    ws.append(w_mix)
    bs.append(b_mix)

    for w_t, b in params["decode"]:
        ws.append(pad_w(w_t))
        bs.append(pad_b(b))

    assert len(ws) == N_LAYERS
    w_stack = jnp.stack(ws)                        # (18, 768, 768) f32
    b_stack = jnp.stack(bs)                        # (18, 1, 768)   f32
    return w_stack, b_stack


def quantize_weights(w_stack):
    """Symmetric int8 with per-layer, per-output-column f32 dequant scales."""
    amax = jnp.max(jnp.abs(w_stack), axis=1, keepdims=True)       # (L, 1, F_PAD)
    scale = jnp.where(amax > 0, amax / 127.0, 1.0)
    w_q = jnp.clip(jnp.round(w_stack / scale), -127, 127).astype(jnp.int8)
    return w_q, scale.astype(jnp.float32)                         # int8, f32


# ------------------------------ f32 reference ------------------------------- #

def vae_reference(params, x, eps):
    a = x
    enc = params["encode"]
    for i, (w, b) in enumerate(enc):
        a = a @ w + b
        if i < len(enc) - 1:
            a = jnp.maximum(a, 0.0)
    wm, bm = params["fc_mu"]
    wl, bl = params["fc_logvar"]
    mu = a @ wm + bm
    logvar = a @ wl + bl
    z = eps * jnp.exp(0.5 * logvar) + mu
    h = z
    dec = params["decode"]
    for i, (w, b) in enumerate(dec):
        h = h @ w + b
        if i < len(dec) - 1:
            h = jnp.maximum(h, 0.0)
    return h, mu, logvar


# ----------------------------------- main ----------------------------------- #

if __name__ == "__main__":
    B = 8          # batch
    Z_DIM = 32     # latent dim

    root = jax.random.PRNGKey(0)
    k_params, k_x, k_eps = jax.random.split(root, 3)

    params = make_vae_params(k_params, Z_DIM)
    w_stack, b_stack = stack_and_pad_params(params, Z_DIM)
    w_q, w_scale = quantize_weights(w_stack)       # (18,768,768) int8, (18,1,768) f32

    x = jax.random.normal(k_x, (B, IN_FEATURES), jnp.float32)
    # TODO(synk): torch.randn_like(std) inside sampling() is drawn host-side
    # here and passed in explicitly as eps (same reparameterization math).
    eps = jax.random.normal(k_eps, (B, Z_DIM), jnp.float32)

    fwd = jax.jit(functools.partial(vae_forward, z_dim=Z_DIM))
    recon, mu, logvar = fwd(w_q, w_scale, b_stack, x, eps)
    jax.block_until_ready((recon, mu, logvar))

    assert recon.shape == (B, IN_FEATURES)
    assert mu.shape == (B, Z_DIM)
    assert logvar.shape == (B, Z_DIM)
    assert bool(jnp.all(jnp.isfinite(recon)))
    assert bool(jnp.all(jnp.isfinite(mu))) and bool(jnp.all(jnp.isfinite(logvar)))

    # Loose tolerance check against the f32 reference (int8 weights + bf16
    # activations differ from f32 at the percent level, not bit-exact).
    recon_ref, mu_ref, lv_ref = vae_reference(params, x, eps)

    def rel_l2(a, b):
        return float(jnp.linalg.norm(a - b) / (jnp.linalg.norm(b) + 1e-12))

    assert rel_l2(mu, mu_ref) < 0.15, ("mu rel err", rel_l2(mu, mu_ref))
    assert rel_l2(logvar, lv_ref) < 0.15, ("logvar rel err", rel_l2(logvar, lv_ref))
    assert rel_l2(recon, recon_ref) < 0.30, ("recon rel err", rel_l2(recon, recon_ref))

    print("KERNEL_OK")
</pallas_src>

<mosaic_0001>
module attributes {stable_mosaic.version = 11 : i64} {
  func.func @_vae_fused_kernel(%arg0: i32, %arg1: memref<8x768xbf16, #tpu.memory_space<vmem>>, %arg2: memref<8x128xf32, #tpu.memory_space<vmem>>, %arg3: memref<3x768x768xi8, #tpu.memory_space<vmem>>, %arg4: memref<3x1x768xf32, #tpu.memory_space<vmem>>, %arg5: memref<3x1x768xf32, #tpu.memory_space<vmem>>, %arg6: memref<8x128xf32, #tpu.memory_space<vmem>>, %arg7: memref<8x256xf32, #tpu.memory_space<vmem>>, %arg8: memref<8x768xbf16, #tpu.memory_space<vmem>>) attributes {dimension_semantics = [#tpu.dimension_semantics<arbitrary>], iteration_bounds = array<i64: 6>, scalar_prefetch = 0 : i64, scratch_operands = 1 : i64, tpu.core_type = #tpu.core_type<tc>, window_params = [{pipeline_mode = #tpu.pipeline_mode<synchronous>, transform_indices = @transform_0, window_bounds = array<i64: 8, 768>}, {pipeline_mode = #tpu.pipeline_mode<synchronous>, transform_indices = @transform_1, window_bounds = array<i64: 8, 128>}, {transform_indices = @transform_2, window_bounds = array<i64: 3, 768, 768>}, {transform_indices = @transform_3, window_bounds = array<i64: 3, 1, 768>}, {transform_indices = @transform_4, window_bounds = array<i64: 3, 1, 768>}, {pipeline_mode = #tpu.pipeline_mode<synchronous>, transform_indices = @transform_5, window_bounds = array<i64: 8, 128>}, {pipeline_mode = #tpu.pipeline_mode<synchronous>, transform_indices = @transform_6, window_bounds = array<i64: 8, 256>}]} {
    %c0_i32 = arith.constant 0 : i32
    %0 = arith.cmpi eq, %arg0, %c0_i32 : i32
    %1 = arith.extui %0 : i1 to i32
    %c0_i32_0 = arith.constant 0 : i32
    %2 = arith.cmpi ne, %1, %c0_i32_0 : i32
    scf.if %2 {
      %c0_43 = arith.constant 0 : index
      %c0_44 = arith.constant 0 : index
      %62 = vector.load %arg1[%c0_43, %c0_44] : memref<8x768xbf16, #tpu.memory_space<vmem>>, vector<8x768xbf16>
      %c0_45 = arith.constant 0 : index
      %c0_46 = arith.constant 0 : index
      %63 = vector.load %arg8[%c0_45, %c0_46] : memref<8x768xbf16, #tpu.memory_space<vmem>>, vector<8x768xbf16>
      tpu.vector_store %arg8[%c0_45, %c0_46], %62 {strides = array<i32>} : memref<8x768xbf16, #tpu.memory_space<vmem>>, vector<8x768xbf16>,
    } else {
    }
    %c0 = arith.constant 0 : index
    %c0_1 = arith.constant 0 : index
    %c0_2 = arith.constant 0 : index
    %3 = vector.load %arg3[%c0, %c0_1, %c0_2] : memref<3x768x768xi8, #tpu.memory_space<vmem>>, vector<1x768x768xi8>
    %4 = vector.shape_cast %3 : vector<1x768x768xi8> to vector<768x768xi8>
    %5 = arith.sitofp %4 : vector<768x768xi8> to vector<768x768xbf16>
    %c0_3 = arith.constant 0 : index
    %c0_4 = arith.constant 0 : index
    %6 = vector.load %arg8[%c0_3, %c0_4] : memref<8x768xbf16, #tpu.memory_space<vmem>>, vector<8x768xbf16>
    %cst = arith.constant dense<0.000000e+00> : vector<8x768xf32>
    %7 = tpu.matmul %6, %5, %cst {dimension_numbers = #tpu.dot_dimension_numbers<[1], [0], [0], [1], [0, 0, 1, 1], [], []>} : vector<8x768xbf16>, vector<768x768xbf16>, vector<8x768xf32> -> vector<8x768xf32>
    %c0_5 = arith.constant 0 : index
    %c0_6 = arith.constant 0 : index
    %c0_7 = arith.constant 0 : index
    %8 = vector.load %arg4[%c0_5, %c0_6, %c0_7] : memref<3x1x768xf32, #tpu.memory_space<vmem>>, vector<1x1x768xf32>
    %9 = vector.shape_cast %8 : vector<1x1x768xf32> to vector<1x768xf32>
    %10 = vector.broadcast %9 : vector<1x768xf32> to vector<8x768xf32>
    %11 = arith.mulf %7, %10 : vector<8x768xf32>
    %c0_8 = arith.constant 0 : index
    %c0_9 = arith.constant 0 : index
    %c0_10 = arith.constant 0 : index
    %12 = vector.load %arg5[%c0_8, %c0_9, %c0_10] : memref<3x1x768xf32, #tpu.memory_space<vmem>>, vector<1x1x768xf32>
    %13 = vector.shape_cast %12 : vector<1x1x768xf32> to vector<1x768xf32>
    %14 = vector.broadcast %13 : vector<1x768xf32> to vector<8x768xf32>
    %15 = arith.addf %11, %14 : vector<8x768xf32>
    %cst_11 = arith.constant 0.000000e+00 : f32
    %16 = vector.broadcast %cst_11 : f32 to vector<8x768xf32>
    %17 = arith.maximumf %15, %16 : vector<8x768xf32>
    %18 = arith.truncf %17 : vector<8x768xf32> to vector<8x768xbf16>
    %c0_12 = arith.constant 0 : index
    %c0_13 = arith.constant 0 : index
    %19 = vector.load %arg8[%c0_12, %c0_13] : memref<8x768xbf16, #tpu.memory_space<vmem>>, vector<8x768xbf16>
    tpu.vector_store %arg8[%c0_12, %c0_13], %18 {strides = array<i32>} : memref<8x768xbf16, #tpu.memory_space<vmem>>, vector<8x768xbf16>,
    %c1 = arith.constant 1 : index
    %c0_14 = arith.constant 0 : index
    %c0_15 = arith.constant 0 : index
    %20 = vector.load %arg3[%c1, %c0_14, %c0_15] : memref<3x768x768xi8, #tpu.memory_space<vmem>>, vector<1x768x768xi8>
    %21 = vector.shape_cast %20 : vector<1x768x768xi8> to vector<768x768xi8>
    %22 = arith.sitofp %21 : vector<768x768xi8> to vector<768x768xbf16>
    %c0_16 = arith.constant 0 : index
    %c0_17 = arith.constant 0 : index
    %23 = vector.load %arg8[%c0_16, %c0_17] : memref<8x768xbf16, #tpu.memory_space<vmem>>, vector<8x768xbf16>
    %cst_18 = arith.constant dense<0.000000e+00> : vector<8x768xf32>
    %24 = tpu.matmul %23, %22, %cst_18 {dimension_numbers = #tpu.dot_dimension_numbers<[1], [0], [0], [1], [0, 0, 1, 1], [], []>} : vector<8x768xbf16>, vector<768x768xbf16>, vector<8x768xf32> -> vector<8x768xf32>
    %c1_19 = arith.constant 1 : index
    %c0_20 = arith.constant 0 : index
    %c0_21 = arith.constant 0 : index
    %25 = vector.load %arg4[%c1_19, %c0_20, %c0_21] : memref<3x1x768xf32, #tpu.memory_space<vmem>>, vector<1x1x768xf32>
    %26 = vector.shape_cast %25 : vector<1x1x768xf32> to vector<1x768xf32>
    %27 = vector.broadcast %26 : vector<1x768xf32> to vector<8x768xf32>
    %28 = arith.mulf %24, %27 : vector<8x768xf32>
    %c1_22 = arith.constant 1 : index
    %c0_23 = arith.constant 0 : index
    %c0_24 = arith.constant 0 : index
    %29 = vector.load %arg5[%c1_22, %c0_23, %c0_24] : memref<3x1x768xf32, #tpu.memory_space<vmem>>, vector<1x1x768xf32>
    %30 = vector.shape_cast %29 : vector<1x1x768xf32> to vector<1x768xf32>
    %31 = vector.broadcast %30 : vector<1x768xf32> to vector<8x768xf32>
    %32 = arith.addf %28, %31 : vector<8x768xf32>
    %c2_i32 = arith.constant 2 : i32
    %33 = arith.cmpi eq, %arg0, %c2_i32 : i32
    %true = arith.constant true
    %34 = arith.xori %33, %true : i1
    %35 = arith.extui %34 : i1 to i32
    %c0_i32_25 = arith.constant 0 : i32
    %36 = arith.cmpi ne, %35, %c0_i32_25 : i32
    scf.if %36 {
      %cst_43 = arith.constant 0.000000e+00 : f32
      %62 = vector.broadcast %cst_43 : f32 to vector<8x768xf32>
      %63 = arith.maximumf %32, %62 : vector<8x768xf32>
      %64 = arith.truncf %63 : vector<8x768xf32> to vector<8x768xbf16>
      %c0_44 = arith.constant 0 : index
      %c0_45 = arith.constant 0 : index
      %65 = vector.load %arg8[%c0_44, %c0_45] : memref<8x768xbf16, #tpu.memory_space<vmem>>, vector<8x768xbf16>
      tpu.vector_store %arg8[%c0_44, %c0_45], %64 {strides = array<i32>} : memref<8x768xbf16, #tpu.memory_space<vmem>>, vector<8x768xbf16>,
    } else {
    }
    %37 = arith.extui %33 : i1 to i32
    %c0_i32_26 = arith.constant 0 : i32
    %38 = arith.cmpi ne, %37, %c0_i32_26 : i32
    scf.if %38 {
      %62 = arith.truncf %32 : vector<8x768xf32> to vector<8x768xbf16>
      %c0_43 = arith.constant 0 : index
      %c0_44 = arith.constant 0 : index
      %63 = vector.load %arg8[%c0_43, %c0_44] : memref<8x768xbf16, #tpu.memory_space<vmem>>, vector<8x768xbf16>
      tpu.vector_store %arg8[%c0_43, %c0_44], %62 {strides = array<i32>} : memref<8x768xbf16, #tpu.memory_space<vmem>>, vector<8x768xbf16>,
    } else {
    }
    %c2 = arith.constant 2 : index
    %c0_27 = arith.constant 0 : index
    %c0_28 = arith.constant 0 : index
    %39 = vector.load %arg3[%c2, %c0_27, %c0_28] : memref<3x768x768xi8, #tpu.memory_space<vmem>>, vector<1x768x768xi8>
    %40 = vector.shape_cast %39 : vector<1x768x768xi8> to vector<768x768xi8>
    %41 = arith.sitofp %40 : vector<768x768xi8> to vector<768x768xbf16>
    %c0_29 = arith.constant 0 : index
    %c0_30 = arith.constant 0 : index
    %42 = vector.load %arg8[%c0_29, %c0_30] : memref<8x768xbf16, #tpu.memory_space<vmem>>, vector<8x768xbf16>
    %cst_31 = arith.constant dense<0.000000e+00> : vector<8x768xf32>
    %43 = tpu.matmul %42, %41, %cst_31 {dimension_numbers = #tpu.dot_dimension_numbers<[1], [0], [0], [1], [0, 0, 1, 1], [], []>} : vector<8x768xbf16>, vector<768x768xbf16>, vector<8x768xf32> -> vector<8x768xf32>
    %c2_32 = arith.constant 2 : index
    %c0_33 = arith.constant 0 : index
    %c0_34 = arith.constant 0 : index
    %44 = vector.load %arg4[%c2_32, %c0_33, %c0_34] : memref<3x1x768xf32, #tpu.memory_space<vmem>>, vector<1x1x768xf32>
    %45 = vector.shape_cast %44 : vector<1x1x768xf32> to vector<1x768xf32>
    %46 = vector.broadcast %45 : vector<1x768xf32> to vector<8x768xf32>
    %47 = arith.mulf %43, %46 : vector<8x768xf32>
    %c2_35 = arith.constant 2 : index
    %c0_36 = arith.constant 0 : index
    %c0_37 = arith.constant 0 : index
    %48 = vector.load %arg5[%c2_35, %c0_36, %c0_37] : memref<3x1x768xf32, #tpu.memory_space<vmem>>, vector<1x1x768xf32>
    %49 = vector.shape_cast %48 : vector<1x1x768xf32> to vector<1x768xf32>
    %50 = vector.broadcast %49 : vector<1x768xf32> to vector<8x768xf32>
    %51 = arith.addf %47, %50 : vector<8x768xf32>
    %c2_i32_38 = arith.constant 2 : i32
    %52 = arith.cmpi eq, %arg0, %c2_i32_38 : i32
    %c5_i32 = arith.constant 5 : i32
    %53 = arith.cmpi eq, %arg0, %c5_i32 : i32
    %54 = arith.ori %52, %53 : i1
    %true_39 = arith.constant true
    %55 = arith.xori %54, %true_39 : i1
    %56 = arith.extui %55 : i1 to i32
    %c0_i32_40 = arith.constant 0 : i32
    %57 = arith.cmpi ne, %56, %c0_i32_40 : i32
    scf.if %57 {
      %cst_43 = arith.constant 0.000000e+00 : f32
      %62 = vector.broadcast %cst_43 : f32 to vector<8x768xf32>
      %63 = arith.maximumf %51, %62 : vector<8x768xf32>
      %64 = arith.truncf %63 : vector<8x768xf32> to vector<8x768xbf16>
      %c0_44 = arith.constant 0 : index
      %c0_45 = arith.constant 0 : index
      %65 = vector.load %arg8[%c0_44, %c0_45] : memref<8x768xbf16, #tpu.memory_space<vmem>>, vector<8x768xbf16>
      tpu.vector_store %arg8[%c0_44, %c0_45], %64 {strides = array<i32>} : memref<8x768xbf16, #tpu.memory_space<vmem>>, vector<8x768xbf16>,
    } else {
    }
    %58 = arith.extui %52 : i1 to i32
    %c0_i32_41 = arith.constant 0 : i32
    %59 = arith.cmpi ne, %58, %c0_i32_41 : i32
    scf.if %59 {
      %62 = vector.extract_strided_slice %51 {offsets = [0, 0], sizes = [8, 256], strides = [1, 1]} : vector<8x768xf32> to vector<8x256xf32>
      %c0_43 = arith.constant 0 : index
      %c0_44 = arith.constant 0 : index
      %63 = vector.load %arg7[%c0_43, %c0_44] : memref<8x256xf32, #tpu.memory_space<vmem>>, vector<8x256xf32>
      tpu.vector_store %arg7[%c0_43, %c0_44], %62 {strides = array<i32>} : memref<8x256xf32, #tpu.memory_space<vmem>>, vector<8x256xf32>,
      %64 = vector.extract_strided_slice %51 {offsets = [0, 0], sizes = [8, 128], strides = [1, 1]} : vector<8x768xf32> to vector<8x128xf32>
      %65 = vector.extract_strided_slice %51 {offsets = [0, 128], sizes = [8, 128], strides = [1, 1]} : vector<8x768xf32> to vector<8x128xf32>
      %c0_45 = arith.constant 0 : index
      %c0_46 = arith.constant 0 : index
      %66 = vector.load %arg2[%c0_45, %c0_46] : memref<8x128xf32, #tpu.memory_space<vmem>>, vector<8x128xf32>
      %cst_47 = arith.constant 5.000000e-01 : f32
      %67 = vector.broadcast %cst_47 : f32 to vector<8x128xf32>
      %68 = arith.mulf %67, %65 : vector<8x128xf32>
      %69 = math.exp %68 : vector<8x128xf32>
      %70 = arith.mulf %66, %69 : vector<8x128xf32>
      %71 = arith.addf %70, %64 : vector<8x128xf32>
      %72 = arith.truncf %71 : vector<8x128xf32> to vector<8x128xbf16>
      %c0_48 = arith.constant 0 : index
      %c0_49 = arith.constant 0 : index
      %73 = vector.load %arg8[%c0_48, %c0_49] : memref<8x768xbf16, #tpu.memory_space<vmem>>, vector<8x128xbf16>
      tpu.vector_store %arg8[%c0_48, %c0_49], %72 {strides = array<i32>} : memref<8x768xbf16, #tpu.memory_space<vmem>>, vector<8x128xbf16>,
    } else {
    }
    %60 = arith.extui %53 : i1 to i32
    %c0_i32_42 = arith.constant 0 : i32
    %61 = arith.cmpi ne, %60, %c0_i32_42 : i32
    scf.if %61 {
      %62 = vector.extract_strided_slice %51 {offsets = [0, 0], sizes = [8, 128], strides = [1, 1]} : vector<8x768xf32> to vector<8x128xf32>
      %c0_43 = arith.constant 0 : index
      %c0_44 = arith.constant 0 : index
      %63 = vector.load %arg6[%c0_43, %c0_44] : memref<8x128xf32, #tpu.memory_space<vmem>>, vector<8x128xf32>
      tpu.vector_store %arg6[%c0_43, %c0_44], %62 {strides = array<i32>} : memref<8x128xf32, #tpu.memory_space<vmem>>, vector<8x128xf32>,
    } else {
    }
    return
  }
  func.func @transform_0(%arg0: i32) -> (i32, i32) {
    %c0_i32 = arith.constant 0 : i32
    %c0_i32_0 = arith.constant 0 : i32
    %c0_i32_1 = arith.constant 0 : i32
    return %c0_i32, %c0_i32_0 : i32, i32
  }
  func.func @transform_1(%arg0: i32) -> (i32, i32) {
    %c0_i32 = arith.constant 0 : i32
    %c0_i32_0 = arith.constant 0 : i32
    %c0_i32_1 = arith.constant 0 : i32
    return %c0_i32, %c0_i32_0 : i32, i32
  }
  func.func @transform_2(%arg0: i32) -> (i32, i32, i32) {
    %c0_i32 = arith.constant 0 : i32
    %c0_i32_0 = arith.constant 0 : i32
    %c0_i32_1 = arith.constant 0 : i32
    return %arg0, %c0_i32, %c0_i32_0 : i32, i32, i32
  }
  func.func @transform_3(%arg0: i32) -> (i32, i32, i32) {
    %c0_i32 = arith.constant 0 : i32
    %c0_i32_0 = arith.constant 0 : i32
    %c0_i32_1 = arith.constant 0 : i32
    return %arg0, %c0_i32, %c0_i32_0 : i32, i32, i32
  }
  func.func @transform_4(%arg0: i32) -> (i32, i32, i32) {
    %c0_i32 = arith.constant 0 : i32
    %c0_i32_0 = arith.constant 0 : i32
    %c0_i32_1 = arith.constant 0 : i32
    return %arg0, %c0_i32, %c0_i32_0 : i32, i32, i32
  }
  func.func @transform_5(%arg0: i32) -> (i32, i32) {
    %c0_i32 = arith.constant 0 : i32
    %c0_i32_0 = arith.constant 0 : i32
    %c0_i32_1 = arith.constant 0 : i32
    return %c0_i32, %c0_i32_0 : i32, i32
  }
  func.func @transform_6(%arg0: i32) -> (i32, i32) {
    %c0_i32 = arith.constant 0 : i32
    %c0_i32_0 = arith.constant 0 : i32
    %c0_i32_1 = arith.constant 0 : i32
    return %c0_i32, %c0_i32_0 : i32, i32
  }
}

</mosaic_0001>

<bundles_post_ra>
// kernel: vae_forward.1
= control target key start
LH: loop header
LB: loop body
LE: loop exit
PB: predicated region body
PF: predicated region fallthrough
CT: control target
= control target key end

     0   :  { %s4941_s0 = inlined_call_operand.vmem [shape: bf16[8,768], index: 0, kind: input, shape index: {}]   ;;  %s4942_s1 = inlined_call_operand.vmem [shape: f32[8,128], index: 1, kind: input, shape index: {}]   ;;  %s4943_s2 = inlined_call_operand.hbm [shape: s8[18,768,768], index: 2, kind: input, shape index: {}]   ;;  %s4944_s3 = inlined_call_operand.hbm [shape: f32[18,1,768], index: 3, kind: input, shape index: {}]   ;;  %s4945_s4 = inlined_call_operand.hbm [shape: f32[18,1,768], index: 4, kind: input, shape index: {}]   ;;  %s4946_s5 = inlined_call_operand.hbm [shape: f32[8,128], index: 5, kind: output, shape index: {0}]   ;;  %s4947_s6 = inlined_call_operand.vmem [shape: f32[8,256], index: 6, kind: output, shape index: {1}]  }
   0x1   :  { %4952 = sst [smem:[#allocation13_spill]] %s4943_s2 }
   0x2   :  { %12 = vsyncpa [#allocation4], 0 }
   0x3   :  { %14 = vsyncpa [#allocation4 + $0x1], 0 }
   0x4   :  { %15 = vsyncpa [#allocation7], 0 }
   0x5   :  { %17 = vsyncpa [#allocation7 + $0x1], 0 }
   0x6   :  { %18 = vsyncpa [#allocation5], 0  ;;  %s4034_s21 = smov 0   ;;  %s4036_s22 = smov 0  }
   0x7   :  { %s4038_s23 = smov 0   ;;  %s4040_s24 = smov 0  }
   0x8 LB: > { %s4053_s25 = sadd.s32 4294967295, %s3989_s24   ;;  %s4056_s26 = sadd.s32 1, %s3989_s24   ;;  %s3989_s24 = sphi %s4040_s24, %s4967_s24   ;;  %s3985_s23 = sphi %s4038_s23, %s4966_s23   ;;  %s3981_s22 = sphi %s4036_s22, %s4965_s22   ;;  %s3977_s21 = sphi %s4034_s21, %s4964_s21  }
   0x9   : > { %s70_s27 = ssub.s32 %s3989_s24, %s4056_s26  ;;  %s73_s28 = sadd.s32 1, %s3985_s23 }
   0xa   : > { %p71_p0 = scmp.eq.s32.totalorder %s70_s27, 0  ;;  %p80_p1 = scmp.ne.s32.totalorder %s3985_s23, %s3981_s22 }
   0xb   : > { %p81_p2 = scmp.eq.s32.totalorder %s3989_s24, 0  ;;  %p86_p3 = scmp.ne.s32.totalorder %s3981_s22, %s3977_s21 }
   0xc   : > { %s4066_s29 = scalar_select %p71_p0, %s3985_s23, %s73_s28  }
   0xd   : > { %p82_p4 = por %p81_p2, %p80_p1  ;;  %p87_p5 = scmp.eq.s32.totalorder %s4053_s25, 0 }
   0xe   : > { %p3768_p6 = scmp.lt.s32.totalorder %s3989_s24, 6  ;;  %s4075_s7 = sand.u32 1, %s3985_s23  }
   0xf   : > { %p4070_p7 = por %p87_p5, %p86_p3  ;;  %s232_s9 = sand.u32 1, %s3989_s24  }
  0x10   : > { %p4077_p8 = pnand %p3768_p6, %p82_p4  ;;  %s4949_s10 = smul.u32 18, %s4075_s7 }
  0x11   : > { %s4953_s30 = scalar_select %p4070_p7, 1, 0 }
  0x12   : > { %s3770_s11 = smul.u32 288, %s3989_s24  ;;  %s236_s12 = scalar_lea.vmem [#allocation6], %s4949_s10 }
  0x13   : > { %s244_s13 = sshll.u32 %s236_s12, 4  ;;  %s4096_s17 = scalar_lea.sflag [#allocation7], %s232_s9  ;;  %s4093_s13 = int_to_ptr.vmem [resolvable:$true] %s244_s13 }
  0x14   : > { %s4091_s16 = scalar_lea.hbm %s4944_s3, %s3770_s11  ;;  %p4102_p11 = pneg %p4077_p8 }
  0x15   : > { %s3831_s18 = scalar_lea.hbm %s4091_s16, 288  ;;  %s3836_s27 = scalar_lea.hbm %s4944_s3, 1728 }
  0x16   : > { %p3832_p10 = scmp.ne.s32.totalorder %s4091_s16, %s3831_s18  ;;  %p3837_p0 = scmp.lt.u32.totalorder %s4091_s16, %s4944_s3 }
  0x17   : > { %p3838_p1 = scmp.lt.u32.totalorder %s3836_s27, %s3831_s18  ;;  %p3840_p3 = scmp.lt.u32.totalorder %s3831_s18, %s4091_s16 }
  0x18   : > { %p3834_p12 = pnand %p4102_p11, %p3832_p10 }
  0x19   : > { %p3839_p2 = por %p3838_p1, %p3837_p0 }
  0x1a   : > { %p3835_p13 = pneg %p3834_p12 }
  0x1b   : > { %p3841_p4 = por %p3840_p3, %p3839_p2 }
  0x1d   : > { %p3842_p5 = pnand %p3841_p4, %p3835_p13 }
  0x1f   : > { %3845 = shalt.err (!%p3842_p5)
}
  0x20   : > { %s3846_s9 = scalar_lea.vmem %s4093_s13, 288  ;;  %s3991_s14 = smov [#allocation6]  }
  0x21   : > { %p3847_p6 = scmp.ne.s32.totalorder %s4093_s13, %s3846_s9  ;;  %s3851_s15 = sshll.u32 %s3991_s14, 4  ;;  %s3852_s15 = int_to_ptr.vmem [resolvable:$false] %s3851_s15 }
  0x22   : > { %s3853_s20 = scalar_lea.vmem %s3852_s15, 576  ;;  %p3854_p9 = scmp.lt.s32.totalorder %s4093_s13, %s3852_s15 }
  0x23   : > { %p3849_p10 = pnand %p3847_p6, %p4102_p11  ;;  %p3855_p7 = scmp.lt.s32.totalorder %s3853_s20, %s3846_s9 }
  0x25   : > { %p3850_p12 = pneg %p3849_p10  ;;  %p3856_p0 = por %p3855_p7, %p3854_p9 }
  0x27   : > { %p3857_p1 = pnand %p3856_p0, %p3850_p12 }
  0x29   : > { %3860 = shalt.err (!%p3857_p1)
}
  0x2a   : > { %s4950_s18 = smov 96   ;;  %s4951_s21 = smov 6  }
  0x2b   : > { %3764 = dma.hbm_to_vmem [thread:$0]  (!%p4077_p8), %s4091_s16, 288, %s4093_s13, %s4096_s17, %s4950_s18, %s4950_s18, %s4951_s21  }
  0x2c   : > { %p274_p7 = scmp.lt.s32.totalorder %s3989_s24, 7  ;;  %s3740_s27 = smul.u32 3456, %s4075_s7 }
  0x2d   : > { %p4956_p9 = scmp.ge.s32.totalorder %s3989_s24, 1  ;;  %s3769_s12 = smul.u32 55296, %s3989_s24 }
  0x2e   : > { %s4958_s2 = sld [smem:[#allocation13_spill]]  ;;  %s214_s20 = scalar_lea.vmem [#allocation3], %s3740_s27 }
  0x2f   : > { %p4133_p13 = pnand %p4956_p9, %p274_p7  ;;  %s222_s10 = sshll.u32 %s214_s20, 4  ;;  %s4143_s10 = int_to_ptr.vmem [resolvable:$true] %s222_s10 }
  0x30   : > { %s211_s13 = scalar_lea.sflag [#allocation4], %s4075_s7 }
  0x31   : > { %s4957_s28 = scalar_select %p4133_p13, 1, 0 }
  0x34   : > { %s4141_s15 = scalar_lea.hbm %s4958_s2, %s3769_s12  ;;  %s3866_s9 = scalar_lea.hbm %s4958_s2, 331776 }
  0x35   : > { %s3861_s16 = scalar_lea.hbm %s4141_s15, 55296  ;;  %p3867_p5 = scmp.lt.u32.totalorder %s4141_s15, %s4958_s2 }
  0x36   : > { %p3862_p2 = scmp.ne.s32.totalorder %s4141_s15, %s3861_s16  ;;  %p3868_p6 = scmp.lt.u32.totalorder %s3866_s9, %s3861_s16 }
  0x37   : > { %p3870_p12 = scmp.lt.u32.totalorder %s3861_s16, %s4141_s15 }
  0x38   : > { %p3864_p3 = pnand %p3862_p2, %p4102_p11  ;;  %p3869_p10 = por %p3868_p6, %p3867_p5 }
  0x3a   : > { %p3865_p4 = pneg %p3864_p3  ;;  %p3871_p0 = por %p3870_p12, %p3869_p10 }
  0x3c   : > { %p3872_p1 = pnand %p3871_p0, %p3865_p4 }
  0x3e   : > { %3875 = shalt.err (!%p3872_p1)
}
  0x3f   : > { %s3876_s27 = scalar_lea.vmem %s4143_s10, 55296  ;;  %s3994_s18 = smov [#allocation3]  }
  0x40   : > { %p3877_p7 = scmp.ne.s32.totalorder %s4143_s10, %s3876_s27  ;;  %s3881_s21 = sshll.u32 %s3994_s18, 4  ;;  %s3882_s21 = int_to_ptr.vmem [resolvable:$false] %s3881_s21 }
  0x41   : > { %s3883_s20 = scalar_lea.vmem %s3882_s21, 110592  ;;  %p3884_p3 = scmp.lt.s32.totalorder %s4143_s10, %s3882_s21 }
  0x42   : > { %p3879_p9 = pnand %p3877_p7, %p4102_p11  ;;  %p3885_p13 = scmp.lt.s32.totalorder %s3883_s20, %s3876_s27 }
  0x44   : > { %p3880_p2 = pneg %p3879_p9  ;;  %p3886_p5 = por %p3885_p13, %p3884_p3 }
  0x46   : > { %p3887_p6 = pnand %p3886_p5, %p3880_p2 }
  0x48   : > { %3890 = shalt.err (!%p3887_p6)
}
  0x49   : > { %s3995_s16 = smov 768   ;;  %s3996_s9 = smov 48  }
  0x4a   : > { %3761 = dma.hbm_to_vmem [thread:$0]  (!%p4077_p8), %s4141_s15, 55296, %s4143_s10, %s211_s13, %s3995_s16, %s3995_s16, %s3996_s9  }
  0x4b   : > { %s4174_s27 = scalar_lea.hbm %s4945_s4, %s3770_s11  ;;  %s4959_s18 = smul.u32 18, %s4075_s7 }
  0x4c   : > { %s3891_s2 = scalar_lea.hbm %s4174_s27, 288  ;;  %s3896_s15 = scalar_lea.hbm %s4945_s4, 1728 }
  0x4d   : > { %s258_s21 = scalar_lea.vmem [#allocation8], %s4959_s18  ;;  %p3892_p13 = scmp.ne.s32.totalorder %s4174_s27, %s3891_s2 }
  0x4e   : > { %s266_s20 = sshll.u32 %s258_s21, 4  ;;  %p3897_p12 = scmp.lt.u32.totalorder %s4174_s27, %s4945_s4  ;;  %s4178_s20 = int_to_ptr.vmem [resolvable:$true] %s266_s20 }
  0x4f   : > { %p3894_p4 = pnand %p3892_p13, %p4102_p11  ;;  %p3898_p0 = scmp.lt.u32.totalorder %s3896_s15, %s3891_s2 }
  0x50   : > { %p3900_p7 = scmp.lt.u32.totalorder %s3891_s2, %s4174_s27 }
  0x51   : > { %p3895_p10 = pneg %p3894_p4  ;;  %p3899_p1 = por %p3898_p0, %p3897_p12 }
  0x53   : > { %p3901_p9 = por %p3900_p7, %p3899_p1 }
  0x55   : > { %p3902_p2 = pnand %p3901_p9, %p3895_p10 }
  0x57   : > { %3905 = shalt.err (!%p3902_p2)
}
  0x58   : > { %s3906_s7 = scalar_lea.vmem %s4178_s20, 288  ;;  %s3997_s16 = smov [#allocation8]  }
  0x59   : > { %p3907_p3 = scmp.ne.s32.totalorder %s4178_s20, %s3906_s7  ;;  %s3911_s9 = sshll.u32 %s3997_s16, 4  ;;  %s3912_s9 = int_to_ptr.vmem [resolvable:$false] %s3911_s9 }
  0x5a   : > { %s3913_s12 = scalar_lea.vmem %s3912_s9, 576  ;;  %p3914_p13 = scmp.lt.s32.totalorder %s4178_s20, %s3912_s9 }
  0x5b   : > { %p3909_p5 = pnand %p3907_p3, %p4102_p11  ;;  %p3915_p4 = scmp.lt.s32.totalorder %s3913_s12, %s3906_s7 }
  0x5d   : > { %p3910_p6 = pneg %p3909_p5  ;;  %p3916_p12 = por %p3915_p4, %p3914_p13 }
  0x5f   : > { %p3917_p0 = pnand %p3916_p12, %p3910_p6 }
  0x61   : > { %3920 = shalt.err (!%p3917_p0)
}
  0x62   : > { %s4960_s2 = smov 6   ;;  %s4961_s14 = smov 96  }
  0x63   : > { %3767 = dma.hbm_to_vmem [thread:$0]  (!%p4077_p8), %s4174_s27, 288, %s4178_s20, %s4096_s17, %s4961_s14, %s4961_s14, %s4960_s2  }
  0x64   : > { %p4962_p11 = scmp.ne.s32.totalorder %s4957_s28, 0 }
  0x65   : > { %s280_s19 = sand.u32 (!%p4962_p11), 1, %s3981_s22   ;;  %p4963_p10 = scmp.ne.s32.totalorder (!%p4962_p11), %s4953_s30, 0 }
  0x66   : > { %278 = sbr.rel (%p4962_p11) target bundleno = 1757 (0x6dd), region = 40  ;;  %s281_s21 = scalar_lea.sflag (!%p4962_p11), [#allocation4], %s280_s19 }
  0x67   : > { %s3746_s18 = smul.u32 (!%p4962_p11), 3456, %s280_s19 }
  0x69   : > { %s4208_s24 = scalar_lea.vmem (!%p4962_p11), [#allocation3], %s3746_s18 }
  0x6d   : > { %3964 = dma.done.wait (%p4963_p10), %s281_s21, 55296  }
  0x6e   : > { %3966 = vsyncadd (%p4963_p10), %s281_s21, 4294912000  ;;  %s289_s8 = sand.u32 1, %s4053_s25   ;;  %s3747_s10 = smul.u32 18, %s280_s19 }
  0x6f   : > { %s290_s17 = scalar_lea.sflag [#allocation7], %s289_s8 }
  0x70   : > { %s4215_s27 = scalar_lea.vmem [#allocation6], %s3747_s10 }
  0x71   : > { %3968 = dma.done.wait (%p4963_p10), %s290_s17, 576  }
  0x72   : > { %3970 = vsyncadd (%p4963_p10), %s290_s17, 4294966720  ;;  %s4221_s28 = scalar_lea.vmem [#allocation8], %s3747_s10  ;;  %p3327_p8 = scmp.ne.s32.totalorder %s4053_s25, 0 }
  0x73   : > { %v343_v0 = vld [vmem:[%s4941_s0] sm:$0xff] (!%p3327_p8)  ;;  %v344_v1 = vld [vmem:[%s4941_s0 + $0x8] sm:$0xff] (!%p3327_p8)  ;;  %v345_v2 = vld [vmem:[%s4941_s0 + $0x10] sm:$0xff] (!%p3327_p8) }
  0x74   : > { %342 = sbr.rel (%p3327_p8) target bundleno = 123 (0x7b), region = 56  ;;  %346 = vst [vmem:[#allocation2] sm:$0xff] (!%p3327_p8), %v343_v0  ;;  %347 = vst [vmem:[#allocation2 + $0x8] sm:$0xff] (!%p3327_p8), %v344_v1 }
  0x75   : > { %348 = vst [vmem:[#allocation2 + $0x10] sm:$0xff] (!%p3327_p8), %v345_v2 }
  0x7b PF: > { %v350_v3 = vld [vmem:[%s4208_s24 + $0x8] sm:$0xff]  ;;  %v349_v5 = vld [vmem:[%s4208_s24] sm:$0xff]  ;;  %v356_v13 = vld [vmem:[%s4208_s24 + $0x38] sm:$0xff]  ;;  %p2187_p1 = scmp.eq.s32.totalorder %s4053_s25, 2 }
  0x7c   : > { %v398_v4 = vld [vmem:[%s4208_s24 + $0x188] sm:$0xff]  ;;  %v494_v6 = vunpack.c.l.s8.bf16 %v350_v3  ;;  %v500_v7 = vunpack.c.h.s8.bf16 %v350_v3  ;;  %v397_v10 = vld [vmem:[%s4208_s24 + $0x180] sm:$0xff]  ;;  %v493_v11 = vunpack.c.l.s8.bf16 %v349_v5  ;;  %v404_v14 = vld [vmem:[%s4208_s24 + $0x1b8] sm:$0xff]  ;;  %v499_v15 = vunpack.c.h.s8.bf16 %v349_v5 }
  0x7d   : > { %v590_v8 = vunpack.c.l.s8.bf16 %v398_v4  ;;  %v596_v9 = vunpack.c.h.s8.bf16 %v398_v4  ;;  %v589_v12 = vunpack.c.l.s8.bf16 %v397_v10  ;;  %v595_v16 = vunpack.c.h.s8.bf16 %v397_v10  ;;  %v355_v19 = vld [vmem:[%s4208_s24 + $0x30] sm:$0xff]  ;;  %v362_v25 = vld [vmem:[%s4208_s24 + $0x68] sm:$0xff]  ;;  %v361_v31 = vld [vmem:[%s4208_s24 + $0x60] sm:$0xff] }
  0x7e   : > { %805 = vmatprep.subr.bf16.mxu1 %v494_v6  ;;  %v506_v17 = vunpack.c.l.s8.bf16 %v356_v13  ;;  %v602_v18 = vunpack.c.l.s8.bf16 %v404_v14  ;;  %v403_v20 = vld [vmem:[%s4208_s24 + $0x1b0] sm:$0xff]  ;;  %v505_v21 = vunpack.c.l.s8.bf16 %v355_v19  ;;  %v512_v23 = vunpack.c.h.s8.bf16 %v356_v13  ;;  %v410_v26 = vld [vmem:[%s4208_s24 + $0x1e8] sm:$0xff]  ;;  %v409_v32 = vld [vmem:[%s4208_s24 + $0x1e0] sm:$0xff] }
  0x7f   : > { %846 = vmatprep.subr.bf16.mxu0 %v590_v8  ;;  %806 = vmatpush1.bf16.msra.mxu1 %v493_v11  ;;  %v601_v22 = vunpack.c.l.s8.bf16 %v403_v20  ;;  %v608_v24 = vunpack.c.h.s8.bf16 %v404_v14  ;;  %v511_v27 = vunpack.c.h.s8.bf16 %v355_v19  ;;  %v607_v28 = vunpack.c.h.s8.bf16 %v403_v20  ;;  %v4245_v33 = vld [vmem:[#allocation2] sm:$0xff]  ;;  %v4247_v34 = vld [vmem:[#allocation2 + $0x8] sm:$0xff]  ;;  %v368_v41 = vld [vmem:[%s4208_s24 + $0x98] sm:$0xff] }
  0x80   : > { %847 = vmatpush1.bf16.msra.mxu0 %v589_v12  ;;  %807 = vmatprep.subr.bf16.mxu1 %v500_v7  ;;  %v518_v29 = vunpack.c.l.s8.bf16 %v362_v25  ;;  %v614_v30 = vunpack.c.l.s8.bf16 %v410_v26  ;;  %v517_v35 = vunpack.c.l.s8.bf16 %v361_v31  ;;  %v613_v36 = vunpack.c.l.s8.bf16 %v409_v32  ;;  %v416_v42 = vld [vmem:[%s4208_s24 + $0x218] sm:$0xff]  ;;  %v367_v47 = vld [vmem:[%s4208_s24 + $0x90] sm:$0xff]  ;;  %v374_v53 = vld [vmem:[%s4208_s24 + $0xc8] sm:$0xff] }
  0x81   : > { %848 = vmatprep.subr.bf16.mxu0 %v596_v9  ;;  %v524_v37 = vunpack.c.h.s8.bf16 %v362_v25  ;;  %v620_v38 = vunpack.c.h.s8.bf16 %v410_v26  ;;  %v4251_v39 = vcombine.high %v4245_v33, %v4245_v33  ;;  %v4255_v40 = vcombine.high %v4247_v34, %v4247_v34  ;;  %v415_v48 = vld [vmem:[%s4208_s24 + $0x210] sm:$0xff]  ;;  %v422_v54 = vld [vmem:[%s4208_s24 + $0x248] sm:$0xff]  ;;  %v373_v59 = vld [vmem:[%s4208_s24 + $0xc0] sm:$0xff] }
  0x82   : > { %v523_v43 = vunpack.c.h.s8.bf16 %v361_v31  ;;  %v619_v44 = vunpack.c.h.s8.bf16 %v409_v32  ;;  %v530_v45 = vunpack.c.l.s8.bf16 %v368_v41  ;;  %v626_v46 = vunpack.c.l.s8.bf16 %v416_v42  ;;  %v421_v60 = vld [vmem:[%s4208_s24 + $0x240] sm:$0xff]  ;;  %v380_v1 = vld [vmem:[%s4208_s24 + $0xf8] sm:$0xff]  ;;  %v379_v7 = vld [vmem:[%s4208_s24 + $0xf0] sm:$0xff] }
  0x83   : > { %808 = vmatpush1.bf16.msra.mxu1 %v499_v15  ;;  %837 = vmatprep.mubr.bf16.mxu1 %v4251_v39  ;;  %v529_v49 = vunpack.c.l.s8.bf16 %v367_v47  ;;  %v625_v50 = vunpack.c.l.s8.bf16 %v415_v48  ;;  %v536_v51 = vunpack.c.h.s8.bf16 %v368_v41  ;;  %v632_v52 = vunpack.c.h.s8.bf16 %v416_v42  ;;  %v428_v2 = vld [vmem:[%s4208_s24 + $0x278] sm:$0xff]  ;;  %v427_v8 = vld [vmem:[%s4208_s24 + $0x270] sm:$0xff]  ;;  %v386_v13 = vld [vmem:[%s4208_s24 + $0x128] sm:$0xff] }
  0x84   : > { %849 = vmatpush1.bf16.msra.mxu0 %v595_v16  ;;  %809 = vmatprep.subr.bf16.mxu1 %v506_v17  ;;  %v535_v55 = vunpack.c.h.s8.bf16 %v367_v47  ;;  %v631_v56 = vunpack.c.h.s8.bf16 %v415_v48  ;;  %v542_v57 = vunpack.c.l.s8.bf16 %v374_v53  ;;  %v638_v58 = vunpack.c.l.s8.bf16 %v422_v54  ;;  %v434_v14 = vld [vmem:[%s4208_s24 + $0x2a8] sm:$0xff]  ;;  %v385_v19 = vld [vmem:[%s4208_s24 + $0x120] sm:$0xff]  ;;  %v392_v25 = vld [vmem:[%s4208_s24 + $0x158] sm:$0xff] }
  0x85   : > { %850 = vmatprep.subr.bf16.mxu0 %v602_v18  ;;  %878 = vmatprep.mubr.bf16.mxu0 %v4255_v40  ;;  %v541_v61 = vunpack.c.l.s8.bf16 %v373_v59  ;;  %v637_v62 = vunpack.c.l.s8.bf16 %v421_v60  ;;  %v548_v63 = vunpack.c.h.s8.bf16 %v374_v53  ;;  %v644_v0 = vunpack.c.h.s8.bf16 %v422_v54  ;;  %v433_v20 = vld [vmem:[%s4208_s24 + $0x2a0] sm:$0xff]  ;;  %v440_v26 = vld [vmem:[%s4208_s24 + $0x2d8] sm:$0xff]  ;;  %v391_v31 = vld [vmem:[%s4208_s24 + $0x150] sm:$0xff] }
  0x86   : > { %v547_v3 = vunpack.c.h.s8.bf16 %v373_v59  ;;  %v643_v4 = vunpack.c.h.s8.bf16 %v421_v60  ;;  %v554_v5 = vunpack.c.l.s8.bf16 %v380_v1  ;;  %v650_v6 = vunpack.c.l.s8.bf16 %v428_v2  ;;  %v439_v32 = vld [vmem:[%s4208_s24 + $0x2d0] sm:$0xff]  ;;  %v446_v41 = vld [vmem:[%s4208_s24 + $0x308] sm:$0xff]  ;;  %v352_v42 = vld [vmem:[%s4208_s24 + $0x18] sm:$0xff] }
  0x87   : > { %810 = vmatpush1.bf16.msra.mxu1 %v505_v21  ;;  %v553_v9 = vunpack.c.l.s8.bf16 %v379_v7  ;;  %v649_v10 = vunpack.c.l.s8.bf16 %v427_v8  ;;  %v560_v11 = vunpack.c.h.s8.bf16 %v380_v1  ;;  %v656_v12 = vunpack.c.h.s8.bf16 %v428_v2  ;;  %v445_v47 = vld [vmem:[%s4208_s24 + $0x300] sm:$0xff]  ;;  %v351_v48 = vld [vmem:[%s4208_s24 + $0x10] sm:$0xff] }
  0x88   : > { %851 = vmatpush1.bf16.msra.mxu0 %v601_v22  ;;  %811 = vmatprep.subr.bf16.mxu1 %v512_v23  ;;  %v559_v15 = vunpack.c.h.s8.bf16 %v379_v7  ;;  %v655_v16 = vunpack.c.h.s8.bf16 %v427_v8  ;;  %v566_v17 = vunpack.c.l.s8.bf16 %v386_v13  ;;  %v662_v18 = vunpack.c.l.s8.bf16 %v434_v14 }
  0x89   : > { %852 = vmatprep.subr.bf16.mxu0 %v608_v24  ;;  %v565_v21 = vunpack.c.l.s8.bf16 %v385_v19  ;;  %v661_v22 = vunpack.c.l.s8.bf16 %v433_v20  ;;  %v572_v23 = vunpack.c.h.s8.bf16 %v386_v13  ;;  %v668_v24 = vunpack.c.h.s8.bf16 %v434_v14 }
  0x8a   : > { %v495_v53 = vunpack.c.l.s8.bf16 %v351_v48  ;;  %v692_v54 = vunpack.c.h.s8.bf16 %v446_v41 }
  0x8b   : > { %812 = vmatpush1.bf16.msra.mxu1 %v511_v27  ;;  %v571_v27 = vunpack.c.h.s8.bf16 %v385_v19 }
  0x8c   : > { %853 = vmatpush1.bf16.msra.mxu0 %v607_v28  ;;  %813 = vmatprep.subr.bf16.mxu1 %v518_v29  ;;  %v667_v28 = vunpack.c.h.s8.bf16 %v433_v20  ;;  %v578_v29 = vunpack.c.l.s8.bf16 %v392_v25 }
  0x8d   : > { %854 = vmatprep.subr.bf16.mxu0 %v614_v30  ;;  %v674_v30 = vunpack.c.l.s8.bf16 %v440_v26 }
  0x8f   : > { %814 = vmatpush1.bf16.msra.mxu1 %v517_v35  ;;  %v577_v35 = vunpack.c.l.s8.bf16 %v391_v31 }
  0x90   : > { %855 = vmatpush1.bf16.msra.mxu0 %v613_v36  ;;  %815 = vmatprep.subr.bf16.mxu1 %v524_v37  ;;  %v673_v36 = vunpack.c.l.s8.bf16 %v439_v32  ;;  %v584_v37 = vunpack.c.h.s8.bf16 %v392_v25 }
  0x91   : > { %856 = vmatprep.subr.bf16.mxu0 %v620_v38  ;;  %v680_v38 = vunpack.c.h.s8.bf16 %v440_v26 }
  0x93   : > { %816 = vmatpush1.bf16.msra.mxu1 %v523_v43  ;;  %v583_v43 = vunpack.c.h.s8.bf16 %v391_v31 }
  0x94   : > { %857 = vmatpush1.bf16.msra.mxu0 %v619_v44  ;;  %817 = vmatprep.subr.bf16.mxu1 %v530_v45  ;;  %v679_v44 = vunpack.c.h.s8.bf16 %v439_v32  ;;  %v686_v45 = vunpack.c.l.s8.bf16 %v446_v41 }
  0x95   : > { %858 = vmatprep.subr.bf16.mxu0 %v626_v46  ;;  %v496_v46 = vunpack.c.l.s8.bf16 %v352_v42 }
  0x97   : > { %818 = vmatpush1.bf16.msra.mxu1 %v529_v49  ;;  %v4285_v49 = vcombine.low %v4245_v33, %v4245_v33 }
  0x98   : > { %859 = vmatpush1.bf16.msra.mxu0 %v625_v50  ;;  %819 = vmatprep.subr.bf16.mxu1 %v536_v51  ;;  %v4289_v50 = vcombine.low %v4247_v34, %v4247_v34  ;;  %v4291_v51 = vld [vmem:[#allocation2 + $0x10] sm:$0xff]  ;;  %v691_v34 = vunpack.c.h.s8.bf16 %v445_v47 }
  0x99   : > { %860 = vmatprep.subr.bf16.mxu0 %v632_v52  ;;  %v685_v52 = vunpack.c.l.s8.bf16 %v445_v47  ;;  %v4297_v33 = vcombine.high %v4291_v51, %v4291_v51 }
  0x9b   : > { %820 = vmatpush1.bf16.msra.mxu1 %v535_v55  ;;  %v502_v55 = vunpack.c.h.s8.bf16 %v352_v42 }
  0x9c   : > { %861 = vmatpush1.bf16.msra.mxu0 %v631_v56  ;;  %821 = vmatprep.subr.bf16.mxu1 %v542_v57  ;;  %v452_v56 = vld [vmem:[%s4208_s24 + $0x338] sm:$0xff]  ;;  %v358_v57 = vld [vmem:[%s4208_s24 + $0x48] sm:$0xff] }
  0x9d   : > { %862 = vmatprep.subr.bf16.mxu0 %v638_v58  ;;  %v501_v58 = vunpack.c.h.s8.bf16 %v351_v48  ;;  %v698_v59 = vunpack.c.l.s8.bf16 %v452_v56  ;;  %v508_v60 = vunpack.c.l.s8.bf16 %v358_v57  ;;  %v704_v1 = vunpack.c.h.s8.bf16 %v452_v56 }
  0x9e   : > { %v514_v2 = vunpack.c.h.s8.bf16 %v358_v57 }
  0x9f   : > { %822 = vmatpush1.bf16.msra.mxu1 %v541_v61  ;;  %v451_v61 = vld [vmem:[%s4208_s24 + $0x330] sm:$0xff] }
  0xa0   : > { %863 = vmatpush1.bf16.msra.mxu0 %v637_v62  ;;  %823 = vmatprep.subr.bf16.mxu1 %v548_v63  ;;  %v357_v62 = vld [vmem:[%s4208_s24 + $0x40] sm:$0xff]  ;;  %v697_v63 = vunpack.c.l.s8.bf16 %v451_v61 }
  0xa1   : > { %864 = vmatprep.subr.bf16.mxu0 %v644_v0  ;;  %v507_v0 = vunpack.c.l.s8.bf16 %v357_v62 }
  0xa3   : > { %824 = vmatpush1.bf16.msra.mxu1 %v547_v3  ;;  %v458_v3 = vld [vmem:[%s4208_s24 + $0x368] sm:$0xff] }
  0xa4   : > { %865 = vmatpush1.bf16.msra.mxu0 %v643_v4  ;;  %825 = vmatprep.subr.bf16.mxu1 %v554_v5  ;;  %v364_v4 = vld [vmem:[%s4208_s24 + $0x78] sm:$0xff]  ;;  %v703_v5 = vunpack.c.h.s8.bf16 %v451_v61  ;;  %v710_v7 = vunpack.c.l.s8.bf16 %v458_v3  ;;  %v716_v13 = vunpack.c.h.s8.bf16 %v458_v3 }
  0xa5   : > { %866 = vmatprep.subr.bf16.mxu0 %v650_v6  ;;  %v513_v6 = vunpack.c.h.s8.bf16 %v357_v62  ;;  %v520_v8 = vunpack.c.l.s8.bf16 %v364_v4  ;;  %v526_v14 = vunpack.c.h.s8.bf16 %v364_v4 }
  0xa7   : > { %826 = vmatpush1.bf16.msra.mxu1 %v553_v9  ;;  %v457_v9 = vld [vmem:[%s4208_s24 + $0x360] sm:$0xff] }
  0xa8   : > { %867 = vmatpush1.bf16.msra.mxu0 %v649_v10  ;;  %827 = vmatprep.subr.bf16.mxu1 %v560_v11  ;;  %v363_v10 = vld [vmem:[%s4208_s24 + $0x70] sm:$0xff]  ;;  %v709_v11 = vunpack.c.l.s8.bf16 %v457_v9 }
  0xa9   : > { %868 = vmatprep.subr.bf16.mxu0 %v656_v12  ;;  %v519_v12 = vunpack.c.l.s8.bf16 %v363_v10 }
  0xab   : > { %828 = vmatpush1.bf16.msra.mxu1 %v559_v15  ;;  %v464_v15 = vld [vmem:[%s4208_s24 + $0x398] sm:$0xff] }
  0xac   : > { %869 = vmatpush1.bf16.msra.mxu0 %v655_v16  ;;  %829 = vmatprep.subr.bf16.mxu1 %v566_v17  ;;  %v370_v16 = vld [vmem:[%s4208_s24 + $0xa8] sm:$0xff]  ;;  %v715_v17 = vunpack.c.h.s8.bf16 %v457_v9  ;;  %v722_v19 = vunpack.c.l.s8.bf16 %v464_v15  ;;  %v728_v25 = vunpack.c.h.s8.bf16 %v464_v15 }
  0xad   : > { %870 = vmatprep.subr.bf16.mxu0 %v662_v18  ;;  %v525_v18 = vunpack.c.h.s8.bf16 %v363_v10  ;;  %v532_v20 = vunpack.c.l.s8.bf16 %v370_v16  ;;  %v538_v26 = vunpack.c.h.s8.bf16 %v370_v16 }
  0xaf   : > { %830 = vmatpush1.bf16.msra.mxu1 %v565_v21  ;;  %v463_v21 = vld [vmem:[%s4208_s24 + $0x390] sm:$0xff] }
  0xb0   : > { %871 = vmatpush1.bf16.msra.mxu0 %v661_v22  ;;  %831 = vmatprep.subr.bf16.mxu1 %v572_v23  ;;  %v369_v22 = vld [vmem:[%s4208_s24 + $0xa0] sm:$0xff]  ;;  %v721_v23 = vunpack.c.l.s8.bf16 %v463_v21 }
  0xb1   : > { %872 = vmatprep.subr.bf16.mxu0 %v668_v24  ;;  %v531_v24 = vunpack.c.l.s8.bf16 %v369_v22 }
  0xb3   : > { %832 = vmatpush1.bf16.msra.mxu1 %v571_v27  ;;  %v470_v27 = vld [vmem:[%s4208_s24 + $0x3c8] sm:$0xff] }
  0xb4   : > { %873 = vmatpush1.bf16.msra.mxu0 %v667_v28  ;;  %833 = vmatprep.subr.bf16.mxu1 %v578_v29  ;;  %v376_v28 = vld [vmem:[%s4208_s24 + $0xd8] sm:$0xff]  ;;  %v727_v29 = vunpack.c.h.s8.bf16 %v463_v21  ;;  %v734_v31 = vunpack.c.l.s8.bf16 %v470_v27  ;;  %v740_v41 = vunpack.c.h.s8.bf16 %v470_v27 }
  0xb5   : > { %874 = vmatprep.subr.bf16.mxu0 %v674_v30  ;;  %v537_v30 = vunpack.c.h.s8.bf16 %v369_v22  ;;  %v544_v32 = vunpack.c.l.s8.bf16 %v376_v28  ;;  %v550_v42 = vunpack.c.h.s8.bf16 %v376_v28 }
  0xb7   : > { %834 = vmatpush1.bf16.msra.mxu1 %v577_v35  ;;  %v469_v35 = vld [vmem:[%s4208_s24 + $0x3c0] sm:$0xff] }
  0xb8   : > { %875 = vmatpush1.bf16.msra.mxu0 %v673_v36  ;;  %835 = vmatprep.subr.bf16.mxu1 %v584_v37  ;;  %v375_v36 = vld [vmem:[%s4208_s24 + $0xd0] sm:$0xff]  ;;  %v733_v37 = vunpack.c.l.s8.bf16 %v469_v35 }
  0xb9   : > { %876 = vmatprep.subr.bf16.mxu0 %v680_v38  ;;  %v543_v38 = vunpack.c.l.s8.bf16 %v375_v36 }
  0xbb   : > { %836 = vmatpush1.bf16.msra.mxu1 %v583_v43  ;;  %v476_v43 = vld [vmem:[%s4208_s24 + $0x3f8] sm:$0xff] }
  0xbc   : > { %877 = vmatpush1.bf16.msra.mxu0 %v679_v44  ;;  %928 = vmatprep.subr.bf16.mxu1 %v496_v46  ;;  %v382_v44 = vld [vmem:[%s4208_s24 + $0x108] sm:$0xff]  ;;  %v549_v46 = vunpack.c.h.s8.bf16 %v375_v36  ;;  %v746_v47 = vunpack.c.l.s8.bf16 %v476_v43  ;;  %v752_v56 = vunpack.c.h.s8.bf16 %v476_v43 }
  0xbd   : > { %887 = vmatprep.subr.bf16.mxu0 %v686_v45  ;;  %v739_v45 = vunpack.c.h.s8.bf16 %v469_v35  ;;  %v556_v48 = vunpack.c.l.s8.bf16 %v382_v44  ;;  %v562_v57 = vunpack.c.h.s8.bf16 %v382_v44 }
  0xbe   : > { %838 = vmatmul.mubr.bf16.vlgmr.msra.gmra.mrb[0].mxu1 %v4285_v49 }
  0xbf   : > { %879 = vmatmul.mubr.bf16.vlgmr.msra.gmra.mrb[0].mxu0 %v4289_v50  ;;  %929 = vmatpush1.bf16.msra.mxu1 %v495_v53  ;;  %v381_v53 = vld [vmem:[%s4208_s24 + $0x100] sm:$0xff] }
  0xc0   : > { %888 = vmatpush1.bf16.msra.mxu0 %v685_v52  ;;  %930 = vmatprep.subr.bf16.mxu1 %v502_v55  ;;  %v475_v52 = vld [vmem:[%s4208_s24 + $0x3f0] sm:$0xff]  ;;  %v555_v55 = vunpack.c.l.s8.bf16 %v381_v53 }
  0xc1   : > { %889 = vmatprep.subr.bf16.mxu0 %v692_v54  ;;  %919 = vmatprep.mubr.bf16.mxu0 %v4297_v33  ;;  %v745_v54 = vunpack.c.l.s8.bf16 %v475_v52 }
  0xc2   : > { %960 = vmatprep.mubr.bf16.mxu1 %v4251_v39 }
  0xc3   : > { %931 = vmatpush1.bf16.msra.mxu1 %v501_v58  ;;  %v388_v58 = vld [vmem:[%s4208_s24 + $0x138] sm:$0xff] }
  0xc4   : > { %890 = vmatpush1.bf16.msra.mxu0 %v691_v34  ;;  %932 = vmatprep.subr.bf16.mxu1 %v508_v60  ;;  %v482_v34 = vld [vmem:[%s4208_s24 + $0x428] sm:$0xff]  ;;  %v561_v60 = vunpack.c.h.s8.bf16 %v381_v53  ;;  %v568_v62 = vunpack.c.l.s8.bf16 %v388_v58  ;;  %v574_v4 = vunpack.c.h.s8.bf16 %v388_v58  ;;  %v411_v53 = vld [vmem:[%s4208_s24 + $0x1f0] sm:$0xff] }
  0xc5   : > { %891 = vmatprep.subr.bf16.mxu0 %v698_v59  ;;  %v751_v59 = vunpack.c.h.s8.bf16 %v475_v52  ;;  %v758_v61 = vunpack.c.l.s8.bf16 %v482_v34  ;;  %v764_v3 = vunpack.c.h.s8.bf16 %v482_v34  ;;  %v418_v58 = vld [vmem:[%s4208_s24 + $0x228] sm:$0xff] }
  0xc7   : > { %933 = vmatpush1.bf16.msra.mxu1 %v507_v0  ;;  %v387_v0 = vld [vmem:[%s4208_s24 + $0x130] sm:$0xff] }
  0xc8   : > { %892 = vmatpush1.bf16.msra.mxu0 %v697_v63  ;;  %934 = vmatprep.subr.bf16.mxu1 %v514_v2  ;;  %v481_v63 = vld [vmem:[%s4208_s24 + $0x420] sm:$0xff]  ;;  %v567_v2 = vunpack.c.l.s8.bf16 %v387_v0 }
  0xc9   : > { %893 = vmatprep.subr.bf16.mxu0 %v704_v1  ;;  %v757_v1 = vunpack.c.l.s8.bf16 %v481_v63 }
  0xcb   : > { %935 = vmatpush1.bf16.msra.mxu1 %v513_v6  ;;  %v394_v6 = vld [vmem:[%s4208_s24 + $0x168] sm:$0xff] }
  0xcc   : > { %894 = vmatpush1.bf16.msra.mxu0 %v703_v5  ;;  %936 = vmatprep.subr.bf16.mxu1 %v520_v8  ;;  %v488_v5 = vld [vmem:[%s4208_s24 + $0x458] sm:$0xff]  ;;  %v573_v8 = vunpack.c.h.s8.bf16 %v387_v0  ;;  %v580_v10 = vunpack.c.l.s8.bf16 %v394_v6  ;;  %v586_v16 = vunpack.c.h.s8.bf16 %v394_v6  ;;  %v417_v0 = vld [vmem:[%s4208_s24 + $0x220] sm:$0xff] }
  0xcd   : > { %895 = vmatprep.subr.bf16.mxu0 %v710_v7  ;;  %v763_v7 = vunpack.c.h.s8.bf16 %v481_v63  ;;  %v770_v9 = vunpack.c.l.s8.bf16 %v488_v5  ;;  %v776_v15 = vunpack.c.h.s8.bf16 %v488_v5  ;;  %v424_v6 = vld [vmem:[%s4208_s24 + $0x258] sm:$0xff] }
  0xcf   : > { %937 = vmatpush1.bf16.msra.mxu1 %v519_v12  ;;  %v393_v12 = vld [vmem:[%s4208_s24 + $0x160] sm:$0xff] }
  0xd0   : > { %896 = vmatpush1.bf16.msra.mxu0 %v709_v11  ;;  %938 = vmatprep.subr.bf16.mxu1 %v526_v14  ;;  %v487_v11 = vld [vmem:[%s4208_s24 + $0x450] sm:$0xff]  ;;  %v579_v14 = vunpack.c.l.s8.bf16 %v393_v12 }
  0xd1   : > { %897 = vmatprep.subr.bf16.mxu0 %v716_v13  ;;  %v769_v13 = vunpack.c.l.s8.bf16 %v487_v11 }
  0xd3   : > { %939 = vmatpush1.bf16.msra.mxu1 %v525_v18  ;;  %v354_v18 = vld [vmem:[%s4208_s24 + $0x28] sm:$0xff] }
  0xd4   : > { %898 = vmatpush1.bf16.msra.mxu0 %v715_v17  ;;  %940 = vmatprep.subr.bf16.mxu1 %v532_v20  ;;  %v400_v17 = vld [vmem:[%s4208_s24 + $0x198] sm:$0xff]  ;;  %v585_v20 = vunpack.c.h.s8.bf16 %v393_v12  ;;  %v498_v22 = vunpack.c.l.s8.bf16 %v354_v18  ;;  %v423_v12 = vld [vmem:[%s4208_s24 + $0x250] sm:$0xff] }
  0xd5   : > { %899 = vmatprep.subr.bf16.mxu0 %v722_v19  ;;  %v775_v19 = vunpack.c.h.s8.bf16 %v487_v11  ;;  %v592_v21 = vunpack.c.l.s8.bf16 %v400_v17  ;;  %v598_v28 = vunpack.c.h.s8.bf16 %v400_v17 }
  0xd7   : > { %941 = vmatpush1.bf16.msra.mxu1 %v531_v24  ;;  %v353_v24 = vld [vmem:[%s4208_s24 + $0x20] sm:$0xff] }
  0xd8   : > { %900 = vmatpush1.bf16.msra.mxu0 %v721_v23  ;;  %942 = vmatprep.subr.bf16.mxu1 %v538_v26  ;;  %v399_v23 = vld [vmem:[%s4208_s24 + $0x190] sm:$0xff]  ;;  %v497_v27 = vunpack.c.l.s8.bf16 %v353_v24 }
  0xd9   : > { %901 = vmatprep.subr.bf16.mxu0 %v728_v25  ;;  %v4335_v25 = vcombine.low %v4291_v51, %v4291_v51  ;;  %v591_v26 = vunpack.c.l.s8.bf16 %v399_v23  ;;  %v597_v51 = vunpack.c.h.s8.bf16 %v399_v23 }
  0xdb   : > { %943 = vmatpush1.bf16.msra.mxu1 %v537_v30  ;;  %v406_v30 = vld [vmem:[%s4208_s24 + $0x1c8] sm:$0xff] }
  0xdc   : > { %902 = vmatpush1.bf16.msra.mxu0 %v727_v29  ;;  %944 = vmatprep.subr.bf16.mxu1 %v544_v32  ;;  %v504_v29 = vunpack.c.h.s8.bf16 %v354_v18  ;;  %v503_v32 = vunpack.c.h.s8.bf16 %v353_v24  ;;  %v604_v35 = vunpack.c.l.s8.bf16 %v406_v30  ;;  %v610_v43 = vunpack.c.h.s8.bf16 %v406_v30  ;;  %v430_v18 = vld [vmem:[%s4208_s24 + $0x288] sm:$0xff]  ;;  %v429_v24 = vld [vmem:[%s4208_s24 + $0x280] sm:$0xff] }
  0xdd   : > { %903 = vmatprep.subr.bf16.mxu0 %v734_v31  ;;  %v360_v31 = vld [vmem:[%s4208_s24 + $0x58] sm:$0xff] }
  0xde   : > { %v510_v36 = vunpack.c.l.s8.bf16 %v360_v31  ;;  %v516_v44 = vunpack.c.h.s8.bf16 %v360_v31  ;;  %v436_v31 = vld [vmem:[%s4208_s24 + $0x2b8] sm:$0xff] }
  0xdf   : > { %945 = vmatpush1.bf16.msra.mxu1 %v543_v38  ;;  %v359_v38 = vld [vmem:[%s4208_s24 + $0x50] sm:$0xff] }
  0xe0   : > { %904 = vmatpush1.bf16.msra.mxu0 %v733_v37  ;;  %946 = vmatprep.subr.bf16.mxu1 %v550_v42  ;;  %v405_v37 = vld [vmem:[%s4208_s24 + $0x1c0] sm:$0xff]  ;;  %v509_v42 = vunpack.c.l.s8.bf16 %v359_v38 }
  0xe1   : > { %905 = vmatprep.subr.bf16.mxu0 %v740_v41  ;;  %v603_v41 = vunpack.c.l.s8.bf16 %v405_v37 }
  0xe3   : > { %947 = vmatpush1.bf16.msra.mxu1 %v549_v46  ;;  %v366_v46 = vld [vmem:[%s4208_s24 + $0x88] sm:$0xff] }
  0xe4   : > { %906 = vmatpush1.bf16.msra.mxu0 %v739_v45  ;;  %948 = vmatprep.subr.bf16.mxu1 %v556_v48  ;;  %v412_v45 = vld [vmem:[%s4208_s24 + $0x1f8] sm:$0xff]  ;;  %v515_v48 = vunpack.c.h.s8.bf16 %v359_v38  ;;  %v522_v52 = vunpack.c.l.s8.bf16 %v366_v46  ;;  %v528_v34 = vunpack.c.h.s8.bf16 %v366_v46  ;;  %v435_v38 = vld [vmem:[%s4208_s24 + $0x2b0] sm:$0xff]  ;;  %v442_v46 = vld [vmem:[%s4208_s24 + $0x2e8] sm:$0xff] }
  0xe5   : > { %907 = vmatprep.subr.bf16.mxu0 %v746_v47  ;;  %v609_v47 = vunpack.c.h.s8.bf16 %v405_v37 }
  0xe7   : > { %949 = vmatpush1.bf16.msra.mxu1 %v555_v55  ;;  %v615_v55 = vunpack.c.l.s8.bf16 %v411_v53 }
  0xe8   : > { %908 = vmatpush1.bf16.msra.mxu0 %v745_v54  ;;  %950 = vmatprep.subr.bf16.mxu1 %v562_v57  ;;  %v365_v54 = vld [vmem:[%s4208_s24 + $0x80] sm:$0xff]  ;;  %v622_v57 = vunpack.c.h.s8.bf16 %v412_v45 }
  0xe9   : > { %909 = vmatprep.subr.bf16.mxu0 %v752_v56  ;;  %v521_v56 = vunpack.c.l.s8.bf16 %v365_v54 }
  0xeb   : > { %951 = vmatpush1.bf16.msra.mxu1 %v561_v60  ;;  %v621_v60 = vunpack.c.h.s8.bf16 %v411_v53 }
  0xec   : > { %910 = vmatpush1.bf16.msra.mxu0 %v751_v59  ;;  %952 = vmatprep.subr.bf16.mxu1 %v568_v62  ;;  %v372_v59 = vld [vmem:[%s4208_s24 + $0xb8] sm:$0xff]  ;;  %v628_v62 = vunpack.c.l.s8.bf16 %v418_v58 }
  0xed   : > { %911 = vmatprep.subr.bf16.mxu0 %v758_v61  ;;  %v527_v61 = vunpack.c.h.s8.bf16 %v365_v54  ;;  %v534_v63 = vunpack.c.l.s8.bf16 %v372_v59  ;;  %v540_v5 = vunpack.c.h.s8.bf16 %v372_v59  ;;  %v441_v54 = vld [vmem:[%s4208_s24 + $0x2e0] sm:$0xff]  ;;  %v448_v59 = vld [vmem:[%s4208_s24 + $0x318] sm:$0xff] }
  0xef   : > { %953 = vmatpush1.bf16.msra.mxu1 %v567_v2  ;;  %v627_v2 = vunpack.c.l.s8.bf16 %v417_v0 }
  0xf0   : > { %912 = vmatpush1.bf16.msra.mxu0 %v757_v1  ;;  %954 = vmatprep.subr.bf16.mxu1 %v574_v4  ;;  %v371_v1 = vld [vmem:[%s4208_s24 + $0xb0] sm:$0xff]  ;;  %v634_v4 = vunpack.c.h.s8.bf16 %v418_v58 }
  0xf1   : > { %913 = vmatprep.subr.bf16.mxu0 %v764_v3  ;;  %v533_v3 = vunpack.c.l.s8.bf16 %v371_v1 }
  0xf3   : > { %955 = vmatpush1.bf16.msra.mxu1 %v573_v8  ;;  %v633_v8 = vunpack.c.h.s8.bf16 %v417_v0 }
  0xf4   : > { %914 = vmatpush1.bf16.msra.mxu0 %v763_v7  ;;  %956 = vmatprep.subr.bf16.mxu1 %v580_v10  ;;  %v378_v7 = vld [vmem:[%s4208_s24 + $0xe8] sm:$0xff]  ;;  %v640_v10 = vunpack.c.l.s8.bf16 %v424_v6 }
  0xf5   : > { %915 = vmatprep.subr.bf16.mxu0 %v770_v9  ;;  %v539_v9 = vunpack.c.h.s8.bf16 %v371_v1  ;;  %v546_v11 = vunpack.c.l.s8.bf16 %v378_v7  ;;  %v552_v17 = vunpack.c.h.s8.bf16 %v378_v7  ;;  %v447_v1 = vld [vmem:[%s4208_s24 + $0x310] sm:$0xff]  ;;  %v454_v7 = vld [vmem:[%s4208_s24 + $0x348] sm:$0xff] }
  0xf7   : > { %957 = vmatpush1.bf16.msra.mxu1 %v579_v14  ;;  %v639_v14 = vunpack.c.l.s8.bf16 %v423_v12 }
  0xf8   : > { %916 = vmatpush1.bf16.msra.mxu0 %v769_v13  ;;  %958 = vmatprep.subr.bf16.mxu1 %v586_v16  ;;  %v377_v13 = vld [vmem:[%s4208_s24 + $0xe0] sm:$0xff]  ;;  %v646_v16 = vunpack.c.h.s8.bf16 %v424_v6 }
  0xf9   : > { %917 = vmatprep.subr.bf16.mxu0 %v776_v15  ;;  %v545_v15 = vunpack.c.l.s8.bf16 %v377_v13 }
  0xfb   : > { %959 = vmatpush1.bf16.msra.mxu1 %v585_v20  ;;  %v645_v20 = vunpack.c.h.s8.bf16 %v423_v12 }
  0xfc   : > { %918 = vmatpush1.bf16.msra.mxu0 %v775_v19  ;;  %969 = vmatprep.subr.bf16.mxu1 %v592_v21  ;;  %v384_v19 = vld [vmem:[%s4208_s24 + $0x118] sm:$0xff]  ;;  %v551_v21 = vunpack.c.h.s8.bf16 %v377_v13  ;;  %v453_v13 = vld [vmem:[%s4208_s24 + $0x340] sm:$0xff] }
  0xfd   : > { %1051 = vmatprep.subr.bf16.mxu0 %v498_v22  ;;  %v652_v22 = vunpack.c.l.s8.bf16 %v430_v18  ;;  %v558_v23 = vunpack.c.l.s8.bf16 %v384_v19  ;;  %v564_v30 = vunpack.c.h.s8.bf16 %v384_v19  ;;  %v414_v19 = vld [vmem:[%s4208_s24 + $0x208] sm:$0xff] }
  0xfe   : > { %961 = vmatmul.mubr.bf16.vlgmr.msra.gmra.mrb[4].mxu1 %v4285_v49 }
  0xff   : > { %920 = vmatmul.mubr.bf16.vlgmr.msra.gmra.mrb[0].mxu0 %v4335_v25  ;;  %970 = vmatpush1.bf16.msra.mxu1 %v591_v26  ;;  %v383_v26 = vld [vmem:[%s4208_s24 + $0x110] sm:$0xff] }
 0x100   : > { %1052 = vmatpush1.bf16.msra.mxu0 %v497_v27  ;;  %971 = vmatprep.subr.bf16.mxu1 %v598_v28  ;;  %v651_v27 = vunpack.c.l.s8.bf16 %v429_v24  ;;  %v557_v28 = vunpack.c.l.s8.bf16 %v383_v26 }
 0x101   : > { %1053 = vmatprep.subr.bf16.mxu0 %v504_v29  ;;  %1001 = vmatprep.mubr.bf16.mxu1 %v4255_v40  ;;  %v658_v29 = vunpack.c.h.s8.bf16 %v430_v18  ;;  %v460_v18 = vld [vmem:[%s4208_s24 + $0x378] sm:$0xff] }
 0x102   : > { %1083 = vmatprep.mubr.bf16.mxu0 %v4251_v39  ;;  %v616_v39 = vunpack.c.l.s8.bf16 %v412_v45 }
 0x103   : > { %972 = vmatpush1.bf16.msra.mxu1 %v597_v51  ;;  %v390_v51 = vld [vmem:[%s4208_s24 + $0x148] sm:$0xff] }
 0x104   : > { %1054 = vmatpush1.bf16.msra.mxu0 %v503_v32  ;;  %973 = vmatprep.subr.bf16.mxu1 %v604_v35  ;;  %v657_v32 = vunpack.c.h.s8.bf16 %v429_v24  ;;  %v563_v35 = vunpack.c.h.s8.bf16 %v383_v26  ;;  %v570_v37 = vunpack.c.l.s8.bf16 %v390_v51  ;;  %v576_v45 = vunpack.c.h.s8.bf16 %v390_v51  ;;  %v413_v24 = vld [vmem:[%s4208_s24 + $0x200] sm:$0xff] }
 0x105   : > { %1055 = vmatprep.subr.bf16.mxu0 %v510_v36  ;;  %v664_v36 = vunpack.c.l.s8.bf16 %v436_v31 }
 0x107   : > { %974 = vmatpush1.bf16.msra.mxu1 %v603_v41  ;;  %v389_v41 = vld [vmem:[%s4208_s24 + $0x140] sm:$0xff] }
 0x108   : > { %1056 = vmatpush1.bf16.msra.mxu0 %v509_v42  ;;  %975 = vmatprep.subr.bf16.mxu1 %v610_v43  ;;  %v663_v42 = vunpack.c.l.s8.bf16 %v435_v38  ;;  %v569_v43 = vunpack.c.l.s8.bf16 %v389_v41 }
 0x109   : > { %1057 = vmatprep.subr.bf16.mxu0 %v516_v44  ;;  %v670_v44 = vunpack.c.h.s8.bf16 %v436_v31  ;;  %v420_v31 = vld [vmem:[%s4208_s24 + $0x238] sm:$0xff] }
 0x10b   : > { %976 = vmatpush1.bf16.msra.mxu1 %v609_v47  ;;  %v396_v47 = vld [vmem:[%s4208_s24 + $0x178] sm:$0xff] }
 0x10c   : > { %1058 = vmatpush1.bf16.msra.mxu0 %v515_v48  ;;  %977 = vmatprep.subr.bf16.mxu1 %v616_v39  ;;  %v669_v48 = vunpack.c.h.s8.bf16 %v435_v38  ;;  %v575_v39 = vunpack.c.h.s8.bf16 %v389_v41  ;;  %v582_v53 = vunpack.c.l.s8.bf16 %v396_v47  ;;  %v588_v58 = vunpack.c.h.s8.bf16 %v396_v47  ;;  %v419_v38 = vld [vmem:[%s4208_s24 + $0x230] sm:$0xff] }
 0x10d   : > { %1059 = vmatprep.subr.bf16.mxu0 %v522_v52  ;;  %v676_v52 = vunpack.c.l.s8.bf16 %v442_v46 }
 0x10f   : > { %978 = vmatpush1.bf16.msra.mxu1 %v615_v55  ;;  %v395_v55 = vld [vmem:[%s4208_s24 + $0x170] sm:$0xff] }
 0x110   : > { %1060 = vmatpush1.bf16.msra.mxu0 %v521_v56  ;;  %979 = vmatprep.subr.bf16.mxu1 %v622_v57  ;;  %v675_v56 = vunpack.c.l.s8.bf16 %v441_v54  ;;  %v581_v57 = vunpack.c.l.s8.bf16 %v395_v55 }
 0x111   : > { %1061 = vmatprep.subr.bf16.mxu0 %v528_v34  ;;  %v682_v34 = vunpack.c.h.s8.bf16 %v442_v46  ;;  %v426_v46 = vld [vmem:[%s4208_s24 + $0x268] sm:$0xff] }
 0x113   : > { %980 = vmatpush1.bf16.msra.mxu1 %v621_v60  ;;  %v402_v60 = vld [vmem:[%s4208_s24 + $0x1a8] sm:$0xff] }
 0x114   : > { %1062 = vmatpush1.bf16.msra.mxu0 %v527_v61  ;;  %981 = vmatprep.subr.bf16.mxu1 %v628_v62  ;;  %v681_v61 = vunpack.c.h.s8.bf16 %v441_v54  ;;  %v587_v62 = vunpack.c.h.s8.bf16 %v395_v55  ;;  %v594_v0 = vunpack.c.l.s8.bf16 %v402_v60  ;;  %v600_v6 = vunpack.c.h.s8.bf16 %v402_v60  ;;  %v425_v54 = vld [vmem:[%s4208_s24 + $0x260] sm:$0xff] }
 0x115   : > { %1063 = vmatprep.subr.bf16.mxu0 %v534_v63  ;;  %v688_v63 = vunpack.c.l.s8.bf16 %v448_v59 }
 0x117   : > { %982 = vmatpush1.bf16.msra.mxu1 %v627_v2  ;;  %v401_v2 = vld [vmem:[%s4208_s24 + $0x1a0] sm:$0xff] }
 0x118   : > { %1064 = vmatpush1.bf16.msra.mxu0 %v533_v3  ;;  %983 = vmatprep.subr.bf16.mxu1 %v634_v4  ;;  %v687_v3 = vunpack.c.l.s8.bf16 %v447_v1  ;;  %v593_v4 = vunpack.c.l.s8.bf16 %v401_v2 }
 0x119   : > { %1065 = vmatprep.subr.bf16.mxu0 %v540_v5  ;;  %v694_v5 = vunpack.c.h.s8.bf16 %v448_v59  ;;  %v432_v59 = vld [vmem:[%s4208_s24 + $0x298] sm:$0xff] }
 0x11b   : > { %984 = vmatpush1.bf16.msra.mxu1 %v633_v8  ;;  %v408_v8 = vld [vmem:[%s4208_s24 + $0x1d8] sm:$0xff] }
 0x11c   : > { %1066 = vmatpush1.bf16.msra.mxu0 %v539_v9  ;;  %985 = vmatprep.subr.bf16.mxu1 %v640_v10  ;;  %v693_v9 = vunpack.c.h.s8.bf16 %v447_v1  ;;  %v599_v10 = vunpack.c.h.s8.bf16 %v401_v2  ;;  %v606_v12 = vunpack.c.l.s8.bf16 %v408_v8  ;;  %v431_v1 = vld [vmem:[%s4208_s24 + $0x290] sm:$0xff] }
 0x11d   : > { %1067 = vmatprep.subr.bf16.mxu0 %v546_v11  ;;  %v700_v11 = vunpack.c.l.s8.bf16 %v454_v7 }
 0x11f   : > { %986 = vmatpush1.bf16.msra.mxu1 %v639_v14  ;;  %v407_v14 = vld [vmem:[%s4208_s24 + $0x1d0] sm:$0xff] }
 0x120   : > { %1068 = vmatpush1.bf16.msra.mxu0 %v545_v15  ;;  %987 = vmatprep.subr.bf16.mxu1 %v646_v16  ;;  %v699_v15 = vunpack.c.l.s8.bf16 %v453_v13  ;;  %v706_v16 = vunpack.c.h.s8.bf16 %v454_v7  ;;  %v438_v7 = vld [vmem:[%s4208_s24 + $0x2c8] sm:$0xff] }
 0x121   : > { %1069 = vmatprep.subr.bf16.mxu0 %v552_v17  ;;  %v612_v17 = vunpack.c.h.s8.bf16 %v408_v8 }
 0x123   : > { %988 = vmatpush1.bf16.msra.mxu1 %v645_v20  ;;  %v705_v20 = vunpack.c.h.s8.bf16 %v453_v13  ;;  %v437_v13 = vld [vmem:[%s4208_s24 + $0x2c0] sm:$0xff] }
 0x124   : > { %1070 = vmatpush1.bf16.msra.mxu0 %v551_v21  ;;  %989 = vmatprep.subr.bf16.mxu1 %v652_v22  ;;  %v611_v21 = vunpack.c.h.s8.bf16 %v407_v14  ;;  %v618_v22 = vunpack.c.l.s8.bf16 %v414_v19 }
 0x125   : > { %1071 = vmatprep.subr.bf16.mxu0 %v558_v23  ;;  %v459_v23 = vld [vmem:[%s4208_s24 + $0x370] sm:$0xff] }
 0x126   : > { %v711_v26 = vunpack.c.l.s8.bf16 %v459_v23  ;;  %v717_v51 = vunpack.c.h.s8.bf16 %v459_v23  ;;  %v443_v23 = vld [vmem:[%s4208_s24 + $0x2f0] sm:$0xff] }
 0x127   : > { %990 = vmatpush1.bf16.msra.mxu1 %v651_v27  ;;  %v617_v27 = vunpack.c.l.s8.bf16 %v413_v24 }
 0x128   : > { %1072 = vmatpush1.bf16.msra.mxu0 %v557_v28  ;;  %991 = vmatprep.subr.bf16.mxu1 %v658_v29  ;;  %v718_v28 = vunpack.c.h.s8.bf16 %v460_v18  ;;  %v624_v29 = vunpack.c.h.s8.bf16 %v414_v19 }
 0x129   : > { %1073 = vmatprep.subr.bf16.mxu0 %v564_v30  ;;  %v466_v30 = vld [vmem:[%s4208_s24 + $0x3a8] sm:$0xff] }
 0x12b   : > { %992 = vmatpush1.bf16.msra.mxu1 %v657_v32  ;;  %v623_v32 = vunpack.c.h.s8.bf16 %v413_v24 }
 0x12c   : > { %1074 = vmatpush1.bf16.msra.mxu0 %v563_v35  ;;  %993 = vmatprep.subr.bf16.mxu1 %v664_v36  ;;  %v724_v35 = vunpack.c.l.s8.bf16 %v466_v30  ;;  %v630_v36 = vunpack.c.l.s8.bf16 %v420_v31 }
 0x12d   : > { %1075 = vmatprep.subr.bf16.mxu0 %v570_v37  ;;  %v465_v37 = vld [vmem:[%s4208_s24 + $0x3a0] sm:$0xff] }
 0x12e   : > { %v723_v41 = vunpack.c.l.s8.bf16 %v465_v37  ;;  %v729_v47 = vunpack.c.h.s8.bf16 %v465_v37  ;;  %v3337_v37 = vld [vmem:[%s4208_s24 + $0x480] sm:$0xff] }
 0x12f   : > { %994 = vmatpush1.bf16.msra.mxu1 %v663_v42  ;;  %v629_v42 = vunpack.c.l.s8.bf16 %v419_v38 }
 0x130   : > { %1076 = vmatpush1.bf16.msra.mxu0 %v569_v43  ;;  %995 = vmatprep.subr.bf16.mxu1 %v670_v44  ;;  %v730_v43 = vunpack.c.h.s8.bf16 %v466_v30  ;;  %v636_v44 = vunpack.c.h.s8.bf16 %v420_v31  ;;  %v3338_v30 = vld [vmem:[%s4208_s24 + $0x488] sm:$0xff] }
 0x131   : > { %1077 = vmatprep.subr.bf16.mxu0 %v576_v45  ;;  %v472_v45 = vld [vmem:[%s4208_s24 + $0x3d8] sm:$0xff] }
 0x133   : > { %996 = vmatpush1.bf16.msra.mxu1 %v669_v48  ;;  %v635_v48 = vunpack.c.h.s8.bf16 %v419_v38 }
 0x134   : > { %1078 = vmatpush1.bf16.msra.mxu0 %v575_v39  ;;  %997 = vmatprep.subr.bf16.mxu1 %v676_v52  ;;  %v736_v39 = vunpack.c.l.s8.bf16 %v472_v45  ;;  %v642_v52 = vunpack.c.l.s8.bf16 %v426_v46 }
 0x135   : > { %1079 = vmatprep.subr.bf16.mxu0 %v582_v53  ;;  %v471_v53 = vld [vmem:[%s4208_s24 + $0x3d0] sm:$0xff] }
 0x136   : > { %v735_v55 = vunpack.c.l.s8.bf16 %v471_v53  ;;  %v741_v60 = vunpack.c.h.s8.bf16 %v471_v53  ;;  %v3343_v53 = vld [vmem:[%s4208_s24 + $0x4b0] sm:$0xff] }
 0x137   : > { %998 = vmatpush1.bf16.msra.mxu1 %v675_v56  ;;  %v641_v56 = vunpack.c.l.s8.bf16 %v425_v54 }
 0x138   : > { %1080 = vmatpush1.bf16.msra.mxu0 %v581_v57  ;;  %999 = vmatprep.subr.bf16.mxu1 %v682_v34  ;;  %v742_v57 = vunpack.c.h.s8.bf16 %v472_v45  ;;  %v648_v34 = vunpack.c.h.s8.bf16 %v426_v46  ;;  %v3344_v45 = vld [vmem:[%s4208_s24 + $0x4b8] sm:$0xff] }
 0x139   : > { %1081 = vmatprep.subr.bf16.mxu0 %v588_v58  ;;  %v478_v58 = vld [vmem:[%s4208_s24 + $0x408] sm:$0xff] }
 0x13b   : > { %1000 = vmatpush1.bf16.msra.mxu1 %v681_v61  ;;  %v647_v61 = vunpack.c.h.s8.bf16 %v425_v54 }
 0x13c   : > { %1082 = vmatpush1.bf16.msra.mxu0 %v587_v62  ;;  %1010 = vmatprep.subr.bf16.mxu1 %v688_v63  ;;  %v748_v62 = vunpack.c.l.s8.bf16 %v478_v58  ;;  %v654_v63 = vunpack.c.l.s8.bf16 %v432_v59 }
 0x13d   : > { %1092 = vmatprep.subr.bf16.mxu0 %v594_v0  ;;  %v477_v0 = vld [vmem:[%s4208_s24 + $0x400] sm:$0xff] }
 0x13e   : > { %1002 = vmatmul.mubr.bf16.vlgmr.msra.gmra.mrb[4].mxu1 %v4289_v50  ;;  %v747_v2 = vunpack.c.l.s8.bf16 %v477_v0  ;;  %v753_v8 = vunpack.c.h.s8.bf16 %v477_v0 }
 0x13f   : > { %1084 = vmatmul.mubr.bf16.vlgmr.msra.gmra.mrb[4].mxu0 %v4285_v49  ;;  %1011 = vmatpush1.bf16.msra.mxu1 %v687_v3  ;;  %v605_v49 = vunpack.c.l.s8.bf16 %v407_v14  ;;  %v653_v3 = vunpack.c.l.s8.bf16 %v431_v1 }
 0x140   : > { %1093 = vmatpush1.bf16.msra.mxu0 %v593_v4  ;;  %1012 = vmatprep.subr.bf16.mxu1 %v694_v5  ;;  %v754_v4 = vunpack.c.h.s8.bf16 %v478_v58  ;;  %v660_v5 = vunpack.c.h.s8.bf16 %v432_v59  ;;  %v1446_v59 = vunpack.c.h.s8.bf16 %v3343_v53 }
 0x141   : > { %1094 = vmatprep.subr.bf16.mxu0 %v600_v6  ;;  %1042 = vmatprep.mubr.bf16.mxu1 %v4297_v33  ;;  %v484_v6 = vld [vmem:[%s4208_s24 + $0x438] sm:$0xff] }
 0x142   : > { %1124 = vmatprep.mubr.bf16.mxu0 %v4255_v40  ;;  %v712_v40 = vunpack.c.l.s8.bf16 %v460_v18  ;;  %v444_v18 = vld [vmem:[%s4208_s24 + $0x2f8] sm:$0xff] }
 0x143   : > { %1013 = vmatpush1.bf16.msra.mxu1 %v693_v9  ;;  %v659_v9 = vunpack.c.h.s8.bf16 %v431_v1 }
 0x144   : > { %1095 = vmatpush1.bf16.msra.mxu0 %v599_v10  ;;  %1014 = vmatprep.subr.bf16.mxu1 %v700_v11  ;;  %v760_v10 = vunpack.c.l.s8.bf16 %v484_v6  ;;  %v666_v11 = vunpack.c.l.s8.bf16 %v438_v7 }
 0x145   : > { %1096 = vmatprep.subr.bf16.mxu0 %v606_v12  ;;  %v483_v12 = vld [vmem:[%s4208_s24 + $0x430] sm:$0xff] }
 0x146   : > { %v759_v14 = vunpack.c.l.s8.bf16 %v483_v12  ;;  %v765_v19 = vunpack.c.h.s8.bf16 %v483_v12 }
 0x147   : > { %1015 = vmatpush1.bf16.msra.mxu1 %v699_v15  ;;  %v665_v15 = vunpack.c.l.s8.bf16 %v437_v13 }
 0x148   : > { %1097 = vmatpush1.bf16.msra.mxu0 %v605_v49  ;;  %1016 = vmatprep.subr.bf16.mxu1 %v706_v16  ;;  %v766_v49 = vunpack.c.h.s8.bf16 %v484_v6  ;;  %v672_v16 = vunpack.c.h.s8.bf16 %v438_v7 }
 0x149   : > { %1098 = vmatprep.subr.bf16.mxu0 %v612_v17  ;;  %v490_v17 = vld [vmem:[%s4208_s24 + $0x468] sm:$0xff] }
 0x14b   : > { %1017 = vmatpush1.bf16.msra.mxu1 %v705_v20  ;;  %v671_v20 = vunpack.c.h.s8.bf16 %v437_v13 }
 0x14c   : > { %1099 = vmatpush1.bf16.msra.mxu0 %v611_v21  ;;  %1018 = vmatprep.subr.bf16.mxu1 %v712_v40  ;;  %v772_v21 = vunpack.c.l.s8.bf16 %v490_v17  ;;  %v678_v40 = vunpack.c.l.s8.bf16 %v444_v18 }
 0x14d   : > { %1100 = vmatprep.subr.bf16.mxu0 %v618_v22  ;;  %v489_v22 = vld [vmem:[%s4208_s24 + $0x460] sm:$0xff] }
 0x14e   : > { %v771_v24 = vunpack.c.l.s8.bf16 %v489_v22  ;;  %v777_v31 = vunpack.c.h.s8.bf16 %v489_v22  ;;  %v473_v22 = vld [vmem:[%s4208_s24 + $0x3e0] sm:$0xff] }
 0x14f   : > { %1019 = vmatpush1.bf16.msra.mxu1 %v711_v26  ;;  %v677_v26 = vunpack.c.l.s8.bf16 %v443_v23 }
 0x150   : > { %1101 = vmatpush1.bf16.msra.mxu0 %v617_v27  ;;  %1020 = vmatprep.subr.bf16.mxu1 %v718_v28  ;;  %v778_v27 = vunpack.c.h.s8.bf16 %v490_v17  ;;  %v684_v28 = vunpack.c.h.s8.bf16 %v444_v18  ;;  %v474_v18 = vld [vmem:[%s4208_s24 + $0x3e8] sm:$0xff] }
 0x151   : > { %1102 = vmatprep.subr.bf16.mxu0 %v624_v29  ;;  %v450_v29 = vld [vmem:[%s4208_s24 + $0x328] sm:$0xff] }
 0x153   : > { %1021 = vmatpush1.bf16.msra.mxu1 %v717_v51  ;;  %v683_v51 = vunpack.c.h.s8.bf16 %v443_v23 }
 0x154   : > { %1103 = vmatpush1.bf16.msra.mxu0 %v623_v32  ;;  %1022 = vmatprep.subr.bf16.mxu1 %v724_v35  ;;  %v690_v32 = vunpack.c.l.s8.bf16 %v450_v29  ;;  %v449_v35 = vld [vmem:[%s4208_s24 + $0x320] sm:$0xff] }
 0x155   : > { %1104 = vmatprep.subr.bf16.mxu0 %v630_v36  ;;  %v1429_v36 = vunpack.c.l.s8.bf16 %v3338_v30  ;;  %v689_v38 = vunpack.c.l.s8.bf16 %v449_v35  ;;  %v695_v46 = vunpack.c.h.s8.bf16 %v449_v35 }
 0x157   : > { %1023 = vmatpush1.bf16.msra.mxu1 %v723_v41  ;;  %v1428_v41 = vunpack.c.l.s8.bf16 %v3337_v37 }
 0x158   : > { %1105 = vmatpush1.bf16.msra.mxu0 %v629_v42  ;;  %1024 = vmatprep.subr.bf16.mxu1 %v730_v43  ;;  %v696_v42 = vunpack.c.h.s8.bf16 %v450_v29  ;;  %v1435_v43 = vunpack.c.h.s8.bf16 %v3338_v30  ;;  %v480_v30 = vld [vmem:[%s4208_s24 + $0x418] sm:$0xff] }
 0x159   : > { %1106 = vmatprep.subr.bf16.mxu0 %v636_v44  ;;  %v456_v44 = vld [vmem:[%s4208_s24 + $0x358] sm:$0xff]  ;;  %v750_v35 = vunpack.c.l.s8.bf16 %v480_v30 }
 0x15b   : > { %1025 = vmatpush1.bf16.msra.mxu1 %v729_v47  ;;  %v1434_v47 = vunpack.c.h.s8.bf16 %v3337_v37 }
 0x15c   : > { %1107 = vmatpush1.bf16.msra.mxu0 %v635_v48  ;;  %1026 = vmatprep.subr.bf16.mxu1 %v736_v39  ;;  %v702_v48 = vunpack.c.l.s8.bf16 %v456_v44  ;;  %v455_v39 = vld [vmem:[%s4208_s24 + $0x350] sm:$0xff] }
 0x15d   : > { %1108 = vmatprep.subr.bf16.mxu0 %v642_v52  ;;  %v1441_v52 = vunpack.c.l.s8.bf16 %v3344_v45  ;;  %v701_v54 = vunpack.c.l.s8.bf16 %v455_v39  ;;  %v707_v58 = vunpack.c.h.s8.bf16 %v455_v39 }
 0x15f   : > { %1027 = vmatpush1.bf16.msra.mxu1 %v735_v55  ;;  %v1440_v55 = vunpack.c.l.s8.bf16 %v3343_v53 }
 0x160   : > { %1109 = vmatpush1.bf16.msra.mxu0 %v641_v56  ;;  %1028 = vmatprep.subr.bf16.mxu1 %v742_v57  ;;  %v1447_v56 = vunpack.c.h.s8.bf16 %v3344_v45  ;;  %v462_v57 = vld [vmem:[%s4208_s24 + $0x388] sm:$0xff] }
 0x161   : > { %1110 = vmatprep.subr.bf16.mxu0 %v648_v34  ;;  %v3350_v34 = vld [vmem:[%s4208_s24 + $0x4e8] sm:$0xff]  ;;  %v720_v1 = vunpack.c.h.s8.bf16 %v462_v57 }
 0x162   : > { %v486_v45 = vld [vmem:[%s4208_s24 + $0x448] sm:$0xff] }
 0x163   : > { %1029 = vmatpush1.bf16.msra.mxu1 %v741_v60  ;;  %v461_v60 = vld [vmem:[%s4208_s24 + $0x380] sm:$0xff]  ;;  %v762_v39 = vunpack.c.l.s8.bf16 %v486_v45 }
 0x164   : > { %1111 = vmatpush1.bf16.msra.mxu0 %v647_v61  ;;  %1030 = vmatprep.subr.bf16.mxu1 %v748_v62  ;;  %v1453_v61 = vunpack.c.l.s8.bf16 %v3350_v34  ;;  %v3349_v62 = vld [vmem:[%s4208_s24 + $0x4e0] sm:$0xff] }
 0x165   : > { %1112 = vmatprep.subr.bf16.mxu0 %v654_v63  ;;  %v713_v63 = vunpack.c.l.s8.bf16 %v461_v60  ;;  %v1452_v0 = vunpack.c.l.s8.bf16 %v3349_v62  ;;  %v1458_v6 = vunpack.c.h.s8.bf16 %v3349_v62 }
 0x167   : > { %1031 = vmatpush1.bf16.msra.mxu1 %v747_v2  ;;  %v1459_v2 = vunpack.c.h.s8.bf16 %v3350_v34  ;;  %v492_v34 = vld [vmem:[%s4208_s24 + $0x478] sm:$0xff] }
 0x168   : > { %1113 = vmatpush1.bf16.msra.mxu0 %v653_v3  ;;  %1032 = vmatprep.subr.bf16.mxu1 %v754_v4  ;;  %v468_v3 = vld [vmem:[%s4208_s24 + $0x3b8] sm:$0xff] }
 0x169   : > { %1114 = vmatprep.subr.bf16.mxu0 %v660_v5  ;;  %v3356_v4 = vld [vmem:[%s4208_s24 + $0x518] sm:$0xff]  ;;  %v719_v5 = vunpack.c.h.s8.bf16 %v461_v60  ;;  %v726_v7 = vunpack.c.l.s8.bf16 %v468_v3  ;;  %v774_v60 = vunpack.c.l.s8.bf16 %v492_v34 }
 0x16a   : > { %v1471_v17 = vunpack.c.h.s8.bf16 %v3356_v4 }
 0x16b   : > { %1033 = vmatpush1.bf16.msra.mxu1 %v753_v8  ;;  %v467_v8 = vld [vmem:[%s4208_s24 + $0x3b0] sm:$0xff] }
 0x16c   : > { %1115 = vmatpush1.bf16.msra.mxu0 %v659_v9  ;;  %1034 = vmatprep.subr.bf16.mxu1 %v760_v10  ;;  %v1465_v9 = vunpack.c.l.s8.bf16 %v3356_v4  ;;  %v3355_v10 = vld [vmem:[%s4208_s24 + $0x510] sm:$0xff]  ;;  %v3340_v4 = vld [vmem:[%s4208_s24 + $0x498] sm:$0xff] }
 0x16d   : > { %1116 = vmatprep.subr.bf16.mxu0 %v666_v11 }
 0x16f   : > { %1035 = vmatpush1.bf16.msra.mxu1 %v759_v14  ;;  %v725_v14 = vunpack.c.l.s8.bf16 %v467_v8 }
 0x170   : > { %1117 = vmatpush1.bf16.msra.mxu0 %v665_v15  ;;  %1036 = vmatprep.subr.bf16.mxu1 %v766_v49  ;;  %v1464_v15 = vunpack.c.l.s8.bf16 %v3355_v10 }
 0x171   : > { %1118 = vmatprep.subr.bf16.mxu0 %v672_v16  ;;  %v732_v16 = vunpack.c.h.s8.bf16 %v468_v3 }
 0x173   : > { %1037 = vmatpush1.bf16.msra.mxu1 %v765_v19  ;;  %v3362_v19 = vld [vmem:[%s4208_s24 + $0x548] sm:$0xff] }
 0x174   : > { %1119 = vmatpush1.bf16.msra.mxu0 %v671_v20  ;;  %1038 = vmatprep.subr.bf16.mxu1 %v772_v21  ;;  %v731_v20 = vunpack.c.h.s8.bf16 %v467_v8  ;;  %v1470_v21 = vunpack.c.h.s8.bf16 %v3355_v10  ;;  %v1477_v23 = vunpack.c.l.s8.bf16 %v3362_v19  ;;  %v1483_v29 = vunpack.c.h.s8.bf16 %v3362_v19 }
 0x175   : > { %1120 = vmatprep.subr.bf16.mxu0 %v678_v40  ;;  %v738_v40 = vunpack.c.l.s8.bf16 %v474_v18  ;;  %v1431_v8 = vunpack.c.l.s8.bf16 %v3340_v4 }
 0x177   : > { %1039 = vmatpush1.bf16.msra.mxu1 %v771_v24  ;;  %v3361_v24 = vld [vmem:[%s4208_s24 + $0x540] sm:$0xff] }
 0x178   : > { %1121 = vmatpush1.bf16.msra.mxu0 %v677_v26  ;;  %1040 = vmatprep.subr.bf16.mxu1 %v778_v27  ;;  %v737_v26 = vunpack.c.l.s8.bf16 %v473_v22  ;;  %v1476_v27 = vunpack.c.l.s8.bf16 %v3361_v24 }
 0x179   : > { %1122 = vmatprep.subr.bf16.mxu0 %v684_v28  ;;  %v744_v28 = vunpack.c.h.s8.bf16 %v474_v18 }
 0x17b   : > { %1041 = vmatpush1.bf16.msra.mxu1 %v777_v31  ;;  %v3368_v31 = vld [vmem:[%s4208_s24 + $0x578] sm:$0xff] }
 0x17c   : > { %1123 = vmatpush1.bf16.msra.mxu0 %v683_v51  ;;  %1740 = vmatprep.subr.bf16.mxu1 %v1429_v36  ;;  %v743_v51 = vunpack.c.h.s8.bf16 %v473_v22  ;;  %v479_v36 = vld [vmem:[%s4208_s24 + $0x410] sm:$0xff]  ;;  %v1489_v37 = vunpack.c.l.s8.bf16 %v3368_v31 }
 0x17d   : > { %1133 = vmatprep.subr.bf16.mxu0 %v690_v32  ;;  %v1482_v32 = vunpack.c.h.s8.bf16 %v3361_v24 }
 0x17e   : > { %1043 = vmatmul.mubr.bf16.vlgmr.msra.gmra.mrb[4].mxu1 %v4335_v25 }
 0x17f   : > { %1125 = vmatmul.mubr.bf16.vlgmr.msra.gmra.mrb[4].mxu0 %v4289_v50  ;;  %1741 = vmatpush1.bf16.msra.mxu1 %v1428_v41  ;;  %v708_v50 = vunpack.c.h.s8.bf16 %v456_v44  ;;  %v749_v41 = vunpack.c.l.s8.bf16 %v479_v36  ;;  %v1495_v44 = vunpack.c.h.s8.bf16 %v3368_v31  ;;  %v4468_v31 = vld [vmem:[%s4221_s28] sm:$0x3f] }
 0x180   : > { %1134 = vmatpush1.bf16.msra.mxu0 %v689_v38  ;;  %1742 = vmatprep.subr.bf16.mxu1 %v1435_v43  ;;  %v3367_v38 = vld [vmem:[%s4208_s24 + $0x570] sm:$0xff]  ;;  %v756_v43 = vunpack.c.h.s8.bf16 %v480_v30  ;;  %v3358_v30 = vld [vmem:[%s4208_s24 + $0x528] sm:$0xff] }
 0x181   : > { %1135 = vmatprep.subr.bf16.mxu0 %v696_v42  ;;  %1165 = vmatprep.mubr.bf16.mxu0 %v4297_v33  ;;  %v714_v33 = vunpack.c.l.s8.bf16 %v462_v57  ;;  %v1488_v42 = vunpack.c.l.s8.bf16 %v3367_v38 }
 0x183   : > { %1743 = vmatpush1.bf16.msra.mxu1 %v1434_v47  ;;  %v755_v47 = vunpack.c.h.s8.bf16 %v479_v36  ;;  %v3357_v36 = vld [vmem:[%s4208_s24 + $0x520] sm:$0xff] }
 0x184   : > { %1136 = vmatpush1.bf16.msra.mxu0 %v695_v46  ;;  %1744 = vmatprep.subr.bf16.mxu1 %v1441_v52  ;;  %v3374_v46 = vld [vmem:[%s4208_s24 + $0x5a8] sm:$0xff]  ;;  %v485_v52 = vld [vmem:[%s4208_s24 + $0x440] sm:$0xff] }
 0x185   : > { %1137 = vmatprep.subr.bf16.mxu0 %v702_v48  ;;  %v1494_v48 = vunpack.c.h.s8.bf16 %v3367_v38  ;;  %v1501_v53 = vunpack.c.l.s8.bf16 %v3374_v46  ;;  %v1507_v57 = vunpack.c.h.s8.bf16 %v3374_v46 }
 0x187   : > { %1745 = vmatpush1.bf16.msra.mxu1 %v1440_v55  ;;  %v761_v55 = vunpack.c.l.s8.bf16 %v485_v52 }
 0x188   : > { %1138 = vmatpush1.bf16.msra.mxu0 %v701_v54  ;;  %1746 = vmatprep.subr.bf16.mxu1 %v1447_v56  ;;  %v3373_v54 = vld [vmem:[%s4208_s24 + $0x5a0] sm:$0xff]  ;;  %v768_v56 = vunpack.c.h.s8.bf16 %v486_v45 }
 0x189   : > { %1139 = vmatprep.subr.bf16.mxu0 %v708_v50  ;;  %v1500_v50 = vunpack.c.l.s8.bf16 %v3373_v54 }
 0x18b   : > { %1747 = vmatpush1.bf16.msra.mxu1 %v1446_v59  ;;  %v767_v59 = vunpack.c.h.s8.bf16 %v485_v52  ;;  %v1473_v52 = vunpack.c.h.s8.bf16 %v3358_v30 }
 0x18c   : > { %1140 = vmatpush1.bf16.msra.mxu0 %v707_v58  ;;  %1748 = vmatprep.subr.bf16.mxu1 %v1453_v61  ;;  %v3380_v58 = vld [vmem:[%s4208_s24 + $0x5d8] sm:$0xff]  ;;  %v491_v61 = vld [vmem:[%s4208_s24 + $0x470] sm:$0xff] }
 0x18d   : > { %1141 = vmatprep.subr.bf16.mxu0 %v714_v33  ;;  %v1506_v33 = vunpack.c.h.s8.bf16 %v3373_v54  ;;  %v1513_v62 = vunpack.c.l.s8.bf16 %v3380_v58  ;;  %v1519_v3 = vunpack.c.h.s8.bf16 %v3380_v58 }
 0x18f   : > { %1749 = vmatpush1.bf16.msra.mxu1 %v1452_v0  ;;  %v773_v0 = vunpack.c.l.s8.bf16 %v491_v61 }
 0x190   : > { %1142 = vmatpush1.bf16.msra.mxu0 %v713_v63  ;;  %1750 = vmatprep.subr.bf16.mxu1 %v1459_v2  ;;  %v3379_v63 = vld [vmem:[%s4208_s24 + $0x5d0] sm:$0xff]  ;;  %v780_v2 = vunpack.c.h.s8.bf16 %v492_v34 }
 0x191   : > { %1143 = vmatprep.subr.bf16.mxu0 %v720_v1  ;;  %v4424_v11 = vpop.f32.mrb[0].mxu1  ;;  %v1512_v1 = vunpack.c.l.s8.bf16 %v3379_v63 }
 0x192   : > { %v4426_v12 = vpop.f32.mrb[1].mxu1 }
 0x193   : > { %v843_v13 = vpop.f32.mrb[2].mxu1  ;;  %1751 = vmatpush1.bf16.msra.mxu1 %v1458_v6  ;;  %v779_v6 = vunpack.c.h.s8.bf16 %v491_v61  ;;  %v3370_v61 = vld [vmem:[%s4208_s24 + $0x588] sm:$0xff] }
 0x194   : > { %1144 = vmatpush1.bf16.msra.mxu0 %v719_v5  ;;  %v844_v49 = vpop.f32.mrb[3].mxu1  ;;  %1752 = vmatprep.subr.bf16.mxu1 %v1465_v9  ;;  %v4446_v5 = vld [vmem:[%s4208_s24 + $0x608] sm:$0xff]  ;;  %v3339_v9 = vld [vmem:[%s4208_s24 + $0x490] sm:$0xff] }
 0x195   : > { %1145 = vmatprep.subr.bf16.mxu0 %v726_v7  ;;  %v1518_v7 = vunpack.c.h.s8.bf16 %v3379_v63  ;;  %v1525_v10 = vunpack.c.l.s8.bf16 %v4446_v5  ;;  %v1430_v13 = vunpack.c.l.s8.bf16 %v3339_v9  ;;  %v1436_v49 = vunpack.c.h.s8.bf16 %v3339_v9 }
 0x197   : > { %1753 = vmatpush1.bf16.msra.mxu1 %v1464_v15  ;;  %v3346_v15 = vld [vmem:[%s4208_s24 + $0x4c8] sm:$0xff] }
 0x198   : > { %1146 = vmatpush1.bf16.msra.mxu0 %v725_v14  ;;  %1754 = vmatprep.subr.bf16.mxu1 %v1471_v17  ;;  %v1437_v14 = vunpack.c.h.s8.bf16 %v3340_v4  ;;  %v3345_v17 = vld [vmem:[%s4208_s24 + $0x4c0] sm:$0xff]  ;;  %v1449_v19 = vunpack.c.h.s8.bf16 %v3346_v15 }
 0x199   : > { %1147 = vmatprep.subr.bf16.mxu0 %v732_v16  ;;  %v1443_v16 = vunpack.c.l.s8.bf16 %v3346_v15  ;;  %v1442_v18 = vunpack.c.l.s8.bf16 %v3345_v17  ;;  %v3369_v4 = vld [vmem:[%s4208_s24 + $0x580] sm:$0xff] }
 0x19a   : > { %v1496_v15 = vunpack.c.h.s8.bf16 %v3369_v4 }
 0x19b   : > { %1755 = vmatpush1.bf16.msra.mxu1 %v1470_v21  ;;  %v3352_v21 = vld [vmem:[%s4208_s24 + $0x4f8] sm:$0xff] }
 0x19c   : > { %1148 = vmatpush1.bf16.msra.mxu0 %v731_v20  ;;  %1756 = vmatprep.subr.bf16.mxu1 %v1477_v23  ;;  %v1176_v20 = vlaneseq  ;;  %v1455_v22 = vunpack.c.l.s8.bf16 %v3352_v21 }
 0x19d   : > { %1149 = vmatprep.subr.bf16.mxu0 %v738_v40  ;;  %v1448_v40 = vunpack.c.h.s8.bf16 %v3345_v17  ;;  %v3375_v17 = vld [vmem:[%s4208_s24 + $0x5b0] sm:$0xff] }
 0x19e   : > { %v4455_v23 = vshrl.u32 %v1176_v20, 7  ;;  %v1502_v20 = vunpack.c.l.s8.bf16 %v3375_v17 }
 0x19f   : > { %1757 = vmatpush1.bf16.msra.mxu1 %v1476_v27  ;;  %v1461_v27 = vunpack.c.h.s8.bf16 %v3352_v21 }
 0x1a0   : > { %1150 = vmatpush1.bf16.msra.mxu0 %v737_v26  ;;  %1758 = vmatprep.subr.bf16.mxu1 %v1483_v29  ;;  %v4458_v26 = vsub.s32 0, %v4455_v23  ;;  %v4464_v29 = vsub.s32 1, %v4455_v23 }
 0x1a1   : > { %1151 = vmatprep.subr.bf16.mxu0 %v744_v28  ;;  %v4461_v28 = vld [vmem:[%s4215_s27] sm:$0x3f] }
 0x1a2   : > { %v1183_v38 = vrot.slane %v4461_v28, %v4464_v29  ;;  %v1221_v45 = vrot.slane %v4468_v31, %v4464_v29 }
 0x1a3   : > { %1759 = vmatpush1.bf16.msra.mxu1 %v1482_v32  ;;  %v1179_v32 = vrot.slane %v4461_v28, %v4458_v26 }
 0x1a4   : > { %1152 = vmatpush1.bf16.msra.mxu0 %v743_v51  ;;  %1760 = vmatprep.subr.bf16.mxu1 %v1489_v37 }
 0x1a5   : > { %1153 = vmatprep.subr.bf16.mxu0 %v750_v35  ;;  %v1467_v35 = vunpack.c.l.s8.bf16 %v3358_v30 }
 0x1a7   : > { %1761 = vmatpush1.bf16.msra.mxu1 %v1488_v42  ;;  %v1217_v42 = vrot.slane %v4468_v31, %v4458_v26 }
 0x1a8   : > { %1154 = vmatpush1.bf16.msra.mxu0 %v749_v41  ;;  %1762 = vmatprep.subr.bf16.mxu1 %v1495_v44 }
 0x1a9   : > { %1155 = vmatprep.subr.bf16.mxu0 %v756_v43 }
 0x1ab   : > { %1763 = vmatpush1.bf16.msra.mxu1 %v1494_v48 }
 0x1ac   : > { %1156 = vmatpush1.bf16.msra.mxu0 %v755_v47  ;;  %1764 = vmatprep.subr.bf16.mxu1 %v1501_v53  ;;  %v1466_v47 = vunpack.c.l.s8.bf16 %v3357_v36 }
 0x1ad   : > { %1157 = vmatprep.subr.bf16.mxu0 %v762_v39 }
 0x1af   : > { %1765 = vmatpush1.bf16.msra.mxu1 %v1500_v50  ;;  %v1472_v50 = vunpack.c.h.s8.bf16 %v3357_v36 }
 0x1b0   : > { %1158 = vmatpush1.bf16.msra.mxu0 %v761_v55  ;;  %1766 = vmatprep.subr.bf16.mxu1 %v1507_v57  ;;  %v3363_v57 = vld [vmem:[%s4208_s24 + $0x550] sm:$0xff] }
 0x1b1   : > { %1159 = vmatprep.subr.bf16.mxu0 %v768_v56 }
 0x1b3   : > { %1767 = vmatpush1.bf16.msra.mxu1 %v1506_v33  ;;  %v3385_v33 = vld [vmem:[%s4208_s24 + $0x600] sm:$0xff] }
 0x1b4   : > { %1160 = vmatpush1.bf16.msra.mxu0 %v767_v59  ;;  %1768 = vmatprep.subr.bf16.mxu1 %v1513_v62  ;;  %v1478_v59 = vunpack.c.l.s8.bf16 %v3363_v57 }
 0x1b5   : > { %1161 = vmatprep.subr.bf16.mxu0 %v774_v60 }
 0x1b7   : > { %1769 = vmatpush1.bf16.msra.mxu1 %v1512_v1  ;;  %v1484_v1 = vunpack.c.h.s8.bf16 %v3363_v57 }
 0x1b8   : > { %1162 = vmatpush1.bf16.msra.mxu0 %v773_v0  ;;  %1770 = vmatprep.subr.bf16.mxu1 %v1519_v3  ;;  %v1524_v0 = vunpack.c.l.s8.bf16 %v3385_v33  ;;  %v1491_v3 = vunpack.c.l.s8.bf16 %v3370_v61 }
 0x1b9   : > { %1163 = vmatprep.subr.bf16.mxu0 %v780_v2  ;;  %v1531_v2 = vunpack.c.h.s8.bf16 %v4446_v5  ;;  %v1497_v5 = vunpack.c.h.s8.bf16 %v3370_v61 }
 0x1bb   : > { %1771 = vmatpush1.bf16.msra.mxu1 %v1518_v7  ;;  %v1530_v7 = vunpack.c.h.s8.bf16 %v3385_v33 }
 0x1bc   : > { %1164 = vmatpush1.bf16.msra.mxu0 %v779_v6  ;;  %1781 = vmatprep.subr.bf16.mxu1 %v1525_v10  ;;  %v3392_v6 = vld [vmem:[%s4208_s24 + $0x638] sm:$0xff]  ;;  %v3391_v10 = vld [vmem:[%s4208_s24 + $0x630] sm:$0xff] }
 0x1bd   : > { %1863 = vmatprep.subr.bf16.mxu0 %v1431_v8  ;;  %v1490_v8 = vunpack.c.l.s8.bf16 %v3369_v4  ;;  %v1537_v9 = vunpack.c.l.s8.bf16 %v3392_v6 }
 0x1bf   : > { %1166 = vmatmul.mubr.bf16.vlgmr.msra.gmra.mrb[4].mxu0 %v4335_v25  ;;  %v3351_v25 = vld [vmem:[%s4208_s24 + $0x4f0] sm:$0xff] }
 0x1c0   : > { %1864 = vmatpush1.bf16.msra.mxu0 %v1430_v13  ;;  %v1454_v24 = vunpack.c.l.s8.bf16 %v3351_v25  ;;  %v1460_v51 = vunpack.c.h.s8.bf16 %v3351_v25  ;;  %v3376_v13 = vld [vmem:[%s4208_s24 + $0x5b8] sm:$0xff]  ;;  %v3382_v25 = vld [vmem:[%s4208_s24 + $0x5e8] sm:$0xff] }
 0x1c1   : > { %1865 = vmatprep.subr.bf16.mxu0 %v1437_v14  ;;  %v1536_v14 = vunpack.c.l.s8.bf16 %v3391_v10 }
 0x1c4   : > { %1866 = vmatpush1.bf16.msra.mxu0 %v1436_v49  ;;  %v1543_v49 = vunpack.c.h.s8.bf16 %v3392_v6 }
 0x1c5   : > { %1867 = vmatprep.subr.bf16.mxu0 %v1443_v16  ;;  %v1503_v16 = vunpack.c.l.s8.bf16 %v3376_v13 }
 0x1c8   : > { %1868 = vmatpush1.bf16.msra.mxu0 %v1442_v18  ;;  %v3398_v18 = vld [vmem:[%s4208_s24 + $0x668] sm:$0xff] }
 0x1c9   : > { %1869 = vmatprep.subr.bf16.mxu0 %v1449_v19  ;;  %v1542_v19 = vunpack.c.h.s8.bf16 %v3391_v10  ;;  %v1549_v21 = vunpack.c.l.s8.bf16 %v3398_v18  ;;  %v1555_v30 = vunpack.c.h.s8.bf16 %v3398_v18 }
 0x1cc   : > { %1870 = vmatpush1.bf16.msra.mxu0 %v1448_v40  ;;  %v3397_v40 = vld [vmem:[%s4208_s24 + $0x660] sm:$0xff] }
 0x1cd   : > { %1871 = vmatprep.subr.bf16.mxu0 %v1455_v22  ;;  %v1509_v22 = vunpack.c.h.s8.bf16 %v3376_v13  ;;  %v1554_v36 = vunpack.c.h.s8.bf16 %v3397_v40 }
 0x1d0   : > { %1872 = vmatpush1.bf16.msra.mxu0 %v1454_v24  ;;  %v1548_v24 = vunpack.c.l.s8.bf16 %v3397_v40 }
 0x1d1   : > { %1873 = vmatprep.subr.bf16.mxu0 %v1461_v27  ;;  %v1508_v27 = vunpack.c.h.s8.bf16 %v3375_v17 }
 0x1d2   : > { %v921_v37 = vpop.f32.mrb[0].mxu0 }
 0x1d3   : > { %v3670_v41 = vadd.f32 %v921_v37, %v4424_v11  ;;  %v923_v43 = vpop.f32.mrb[1].mxu0  ;;  %v3364_v11 = vld [vmem:[%s4208_s24 + $0x558] sm:$0xff] }
 0x1d4   : > { %v3671_v44 = vadd.f32 %v923_v43, %v4426_v12  ;;  %v925_v46 = vpop.f32.mrb[2].mxu0  ;;  %1874 = vmatpush1.bf16.msra.mxu0 %v1460_v51  ;;  %v1479_v56 = vunpack.c.l.s8.bf16 %v3364_v11  ;;  %v1485_v60 = vunpack.c.h.s8.bf16 %v3364_v11  ;;  %v1515_v51 = vunpack.c.l.s8.bf16 %v3382_v25  ;;  %v3388_v43 = vld [vmem:[%s4208_s24 + $0x618] sm:$0xff] }
 0x1d5   : > { %v1206_v48 = vmul.f32 %v3670_v41, %v1179_v32  ;;  %v926_v39 = vpop.f32.mrb[3].mxu0  ;;  %1875 = vmatprep.subr.bf16.mxu0 %v1467_v35  ;;  %v3381_v32 = vld [vmem:[%s4208_s24 + $0x5e0] sm:$0xff]  ;;  %v3404_v35 = vld [vmem:[%s4208_s24 + $0x698] sm:$0xff]  ;;  %v3403_v41 = vld [vmem:[%s4208_s24 + $0x690] sm:$0xff] }
 0x1d6   : > { %v1207_v53 = vmul.f32 %v3671_v44, %v1183_v38  ;;  %v1514_v37 = vunpack.c.l.s8.bf16 %v3381_v32  ;;  %v1561_v38 = vunpack.c.l.s8.bf16 %v3404_v35  ;;  %v1560_v44 = vunpack.c.l.s8.bf16 %v3403_v41  ;;  %v3410_v39 = vld [vmem:[%s4208_s24 + $0x6c8] sm:$0xff] }
 0x1d7   : > { %v1244_v54 = vadd.f32 %v1217_v42, %v1206_v48  ;;  %v1521_v42 = vunpack.c.h.s8.bf16 %v3382_v25  ;;  %v1567_v46 = vunpack.c.h.s8.bf16 %v3404_v35  ;;  %v3387_v48 = vld [vmem:[%s4208_s24 + $0x610] sm:$0xff]  ;;  %v1573_v11 = vunpack.c.l.s8.bf16 %v3410_v39 }
 0x1d8   : > { %v1245_v55 = vadd.f32 %v1221_v45, %v1207_v53  ;;  %1876 = vmatpush1.bf16.msra.mxu0 %v1466_v47  ;;  %v1520_v45 = vunpack.c.h.s8.bf16 %v3381_v32  ;;  %v1527_v47 = vunpack.c.l.s8.bf16 %v3388_v43  ;;  %v1526_v53 = vunpack.c.l.s8.bf16 %v3387_v48 }
 0x1d9   : > { %v1250_v12 = vmax.f32 %v1244_v54, 0.0  ;;  %1877 = vmatprep.subr.bf16.mxu0 %v1473_v52  ;;  %v1566_v52 = vunpack.c.h.s8.bf16 %v3403_v41  ;;  %v3409_v54 = vld [vmem:[%s4208_s24 + $0x6c0] sm:$0xff]  ;;  %v1579_v57 = vunpack.c.h.s8.bf16 %v3410_v39 }
 0x1da   : > { %v1251_v34 = vmax.f32 %v1245_v55, 0.0  ;;  %v1533_v55 = vunpack.c.h.s8.bf16 %v3388_v43  ;;  %v1578_v33 = vunpack.c.h.s8.bf16 %v3409_v54 }
 0x1db   : > { %v4485_v62 = vpack.c.bf16 %v1250_v12, %v1250_v12 }
 0x1dc   : > { %v3658_v58 = vpack.c.bf16 %v1251_v34, %v1250_v12  ;;  %1878 = vmatpush1.bf16.msra.mxu0 %v1472_v50  ;;  %v4487_v63 = vpack.c.bf16 %v1251_v34, %v1251_v34  ;;  %v3394_v50 = vld [vmem:[%s4208_s24 + $0x648] sm:$0xff]  ;;  %v1572_v12 = vunpack.c.l.s8.bf16 %v3409_v54 }
 0x1dd   : > { %1879 = vmatprep.subr.bf16.mxu0 %v1479_v56  ;;  %v1532_v56 = vunpack.c.h.s8.bf16 %v3387_v48  ;;  %v1539_v34 = vunpack.c.l.s8.bf16 %v3394_v50  ;;  %v3417_v48 = vld [vmem:[%s4208_s24 + $0x700] sm:$0xff] }
 0x1de   : > { %1280 = vst [vmem:[#allocation2] sm:$0xff] %v3658_v58  ;;  %1772 = vmatprep.mubr.bf16.mxu1 %v4487_v63  ;;  %1895 = vmatprep.mubr.bf16.mxu0 %v4487_v63  ;;  %v3393_v58 = vld [vmem:[%s4208_s24 + $0x640] sm:$0xff]  ;;  %v1586_v39 = vunpack.c.l.s8.bf16 %v3417_v48 }
 0x1df   : > { %1773 = vmatmul.mubr.bf16.vlgmr.msra.gmra.mrb[8].mxu1 %v4485_v62  ;;  %v1544_v4 = vunpack.c.h.s8.bf16 %v3393_v58 }
 0x1e0   : > { %1880 = vmatpush1.bf16.msra.mxu0 %v1478_v59  ;;  %1782 = vmatpush1.bf16.msra.mxu1 %v1524_v0  ;;  %v3416_v59 = vld [vmem:[%s4208_s24 + $0x6f8] sm:$0xff]  ;;  %v3415_v0 = vld [vmem:[%s4208_s24 + $0x6f0] sm:$0xff] }
 0x1e1   : > { %1881 = vmatprep.subr.bf16.mxu0 %v1485_v60  ;;  %1783 = vmatprep.subr.bf16.mxu1 %v1531_v2  ;;  %v1538_v60 = vunpack.c.l.s8.bf16 %v3393_v58  ;;  %v1585_v61 = vunpack.c.l.s8.bf16 %v3416_v59  ;;  %v3400_v2 = vld [vmem:[%s4208_s24 + $0x678] sm:$0xff]  ;;  %v1591_v6 = vunpack.c.h.s8.bf16 %v3416_v59  ;;  %v1590_v10 = vunpack.c.h.s8.bf16 %v3415_v0  ;;  %v3429_v58 = vld [vmem:[%s4208_s24 + $0x760] sm:$0xff] }
 0x1e2   : > { %v1610_v59 = vunpack.c.l.s8.bf16 %v3429_v58 }
 0x1e4   : > { %1882 = vmatpush1.bf16.msra.mxu0 %v1484_v1  ;;  %1784 = vmatpush1.bf16.msra.mxu1 %v1530_v7  ;;  %v1545_v1 = vunpack.c.h.s8.bf16 %v3394_v50  ;;  %v1551_v7 = vunpack.c.l.s8.bf16 %v3400_v2 }
 0x1e5   : > { %1883 = vmatprep.subr.bf16.mxu0 %v1491_v3  ;;  %1785 = vmatprep.subr.bf16.mxu1 %v1537_v9  ;;  %v1584_v3 = vunpack.c.l.s8.bf16 %v3415_v0  ;;  %v3422_v9 = vld [vmem:[%s4208_s24 + $0x728] sm:$0xff] }
 0x1e6   : > { %v1597_v13 = vunpack.c.l.s8.bf16 %v3422_v9  ;;  %v1603_v18 = vunpack.c.h.s8.bf16 %v3422_v9 }
 0x1e8   : > { %1884 = vmatpush1.bf16.msra.mxu0 %v1490_v8  ;;  %1786 = vmatpush1.bf16.msra.mxu1 %v1536_v14  ;;  %v3399_v8 = vld [vmem:[%s4208_s24 + $0x670] sm:$0xff]  ;;  %v3421_v14 = vld [vmem:[%s4208_s24 + $0x720] sm:$0xff] }
 0x1e9   : > { %1885 = vmatprep.subr.bf16.mxu0 %v1497_v5  ;;  %1787 = vmatprep.subr.bf16.mxu1 %v1543_v49  ;;  %v1550_v5 = vunpack.c.l.s8.bf16 %v3399_v8  ;;  %v3406_v49 = vld [vmem:[%s4208_s24 + $0x6a8] sm:$0xff]  ;;  %v1556_v17 = vunpack.c.h.s8.bf16 %v3399_v8  ;;  %v1602_v40 = vunpack.c.h.s8.bf16 %v3421_v14 }
 0x1ec   : > { %1886 = vmatpush1.bf16.msra.mxu0 %v1496_v15  ;;  %1788 = vmatpush1.bf16.msra.mxu1 %v1542_v19  ;;  %v1557_v15 = vunpack.c.h.s8.bf16 %v3400_v2  ;;  %v1563_v19 = vunpack.c.l.s8.bf16 %v3406_v49  ;;  %v4538_v2 = vsub.s32 3, %v4455_v23 }
 0x1ed   : > { %1887 = vmatprep.subr.bf16.mxu0 %v1503_v16  ;;  %1789 = vmatprep.subr.bf16.mxu1 %v1549_v21  ;;  %v1596_v16 = vunpack.c.l.s8.bf16 %v3421_v14  ;;  %v3428_v21 = vld [vmem:[%s4208_s24 + $0x758] sm:$0xff] }
 0x1ee   : > { %v1609_v25 = vunpack.c.l.s8.bf16 %v3428_v21  ;;  %v1615_v35 = vunpack.c.h.s8.bf16 %v3428_v21  ;;  %v1229_v8 = vrot.slane %v4468_v31, %v4538_v2 }
 0x1f0   : > { %1888 = vmatpush1.bf16.msra.mxu0 %v1502_v20  ;;  %1790 = vmatpush1.bf16.msra.mxu1 %v1548_v24  ;;  %v3405_v20 = vld [vmem:[%s4208_s24 + $0x6a0] sm:$0xff]  ;;  %v3427_v24 = vld [vmem:[%s4208_s24 + $0x750] sm:$0xff] }
 0x1f1   : > { %1889 = vmatprep.subr.bf16.mxu0 %v1509_v22  ;;  %1791 = vmatprep.subr.bf16.mxu1 %v1555_v30  ;;  %v1562_v22 = vunpack.c.l.s8.bf16 %v3405_v20  ;;  %v3412_v30 = vld [vmem:[%s4208_s24 + $0x6d8] sm:$0xff]  ;;  %v1568_v32 = vunpack.c.h.s8.bf16 %v3405_v20  ;;  %v1614_v41 = vunpack.c.h.s8.bf16 %v3427_v24 }
 0x1f4   : > { %1890 = vmatpush1.bf16.msra.mxu0 %v1508_v27  ;;  %1792 = vmatpush1.bf16.msra.mxu1 %v1554_v36  ;;  %v1569_v27 = vunpack.c.h.s8.bf16 %v3406_v49  ;;  %v1575_v36 = vunpack.c.l.s8.bf16 %v3412_v30 }
 0x1f5   : > { %1891 = vmatprep.subr.bf16.mxu0 %v1515_v51  ;;  %1793 = vmatprep.subr.bf16.mxu1 %v1561_v38  ;;  %v1608_v51 = vunpack.c.l.s8.bf16 %v3427_v24  ;;  %v4524_v38 = vld [vmem:[%s4208_s24 + $0x788] sm:$0xff] }
 0x1f6   : > { %v1621_v43 = vunpack.c.l.s8.bf16 %v4524_v38  ;;  %v1627_v24 = vunpack.c.h.s8.bf16 %v4524_v38 }
 0x1f8   : > { %1892 = vmatpush1.bf16.msra.mxu0 %v1514_v37  ;;  %1794 = vmatpush1.bf16.msra.mxu1 %v1560_v44  ;;  %v3411_v37 = vld [vmem:[%s4208_s24 + $0x6d0] sm:$0xff]  ;;  %v1581_v44 = vunpack.c.h.s8.bf16 %v3412_v30  ;;  %v3440_v30 = vld [vmem:[%s4208_s24 + $0x7b8] sm:$0xff] }
 0x1f9   : > { %1893 = vmatprep.subr.bf16.mxu0 %v1521_v42  ;;  %1795 = vmatprep.subr.bf16.mxu1 %v1567_v46  ;;  %v1574_v42 = vunpack.c.l.s8.bf16 %v3411_v37  ;;  %v1580_v46 = vunpack.c.h.s8.bf16 %v3411_v37  ;;  %v3439_v37 = vld [vmem:[%s4208_s24 + $0x7b0] sm:$0xff] }
 0x1fc   : > { %1894 = vmatpush1.bf16.msra.mxu0 %v1520_v45  ;;  %1796 = vmatpush1.bf16.msra.mxu1 %v1566_v52  ;;  %v3418_v45 = vld [vmem:[%s4208_s24 + $0x708] sm:$0xff] }
 0x1fd   : > { %1904 = vmatprep.subr.bf16.mxu0 %v1527_v47  ;;  %1797 = vmatprep.subr.bf16.mxu1 %v1573_v11  ;;  %v1587_v47 = vunpack.c.l.s8.bf16 %v3418_v45  ;;  %v1593_v52 = vunpack.c.h.s8.bf16 %v3418_v45  ;;  %v1592_v11 = vunpack.c.h.s8.bf16 %v3417_v48  ;;  %v1638_v48 = vunpack.c.h.s8.bf16 %v3439_v37 }
 0x1ff   : > { %1896 = vmatmul.mubr.bf16.vlgmr.msra.gmra.mrb[8].mxu0 %v4485_v62 }
 0x200   : > { %1905 = vmatpush1.bf16.msra.mxu0 %v1526_v53  ;;  %1798 = vmatpush1.bf16.msra.mxu1 %v1572_v12  ;;  %v3424_v53 = vld [vmem:[%s4208_s24 + $0x738] sm:$0xff] }
 0x201   : > { %1906 = vmatprep.subr.bf16.mxu0 %v1533_v55  ;;  %1799 = vmatprep.subr.bf16.mxu1 %v1579_v57  ;;  %v1599_v54 = vunpack.c.l.s8.bf16 %v3424_v53  ;;  %v3423_v55 = vld [vmem:[%s4208_s24 + $0x730] sm:$0xff]  ;;  %v1605_v12 = vunpack.c.h.s8.bf16 %v3424_v53  ;;  %v3445_v53 = vld [vmem:[%s4208_s24 + $0x7e0] sm:$0xff] }
 0x202   : > { %v1598_v50 = vunpack.c.l.s8.bf16 %v3423_v55  ;;  %v1604_v57 = vunpack.c.h.s8.bf16 %v3423_v55  ;;  %v1644_v55 = vunpack.c.l.s8.bf16 %v3445_v53 }
 0x204   : > { %1907 = vmatpush1.bf16.msra.mxu0 %v1532_v56  ;;  %1800 = vmatpush1.bf16.msra.mxu1 %v1578_v33  ;;  %v3430_v56 = vld [vmem:[%s4208_s24 + $0x768] sm:$0xff] }
 0x205   : > { %1908 = vmatprep.subr.bf16.mxu0 %v1539_v34  ;;  %1801 = vmatprep.subr.bf16.mxu1 %v1585_v61  ;;  %v1611_v34 = vunpack.c.l.s8.bf16 %v3430_v56  ;;  %v1617_v33 = vunpack.c.h.s8.bf16 %v3430_v56  ;;  %v1616_v61 = vunpack.c.h.s8.bf16 %v3429_v58  ;;  %v1650_v58 = vunpack.c.h.s8.bf16 %v3445_v53 }
 0x208   : > { %1909 = vmatpush1.bf16.msra.mxu0 %v1538_v60  ;;  %1802 = vmatpush1.bf16.msra.mxu1 %v1584_v3  ;;  %v3436_v60 = vld [vmem:[%s4208_s24 + $0x798] sm:$0xff] }
 0x209   : > { %1910 = vmatprep.subr.bf16.mxu0 %v1545_v1  ;;  %1803 = vmatprep.subr.bf16.mxu1 %v1591_v6  ;;  %v1623_v0 = vunpack.c.l.s8.bf16 %v3436_v60  ;;  %v4535_v1 = vsub.s32 2, %v4455_v23 }
 0x20b   : > { %v1187_v3 = vrot.slane %v4461_v28, %v4535_v1  ;;  %v1225_v6 = vrot.slane %v4468_v31, %v4535_v1 }
 0x20c   : > { %1911 = vmatpush1.bf16.msra.mxu0 %v1544_v4  ;;  %1804 = vmatpush1.bf16.msra.mxu1 %v1590_v10  ;;  %v1191_v4 = vrot.slane %v4461_v28, %v4538_v2 }
 0x20d   : > { %1912 = vmatprep.subr.bf16.mxu0 %v1551_v7  ;;  %1805 = vmatprep.subr.bf16.mxu1 %v1597_v13 }
 0x210   : > { %1913 = vmatpush1.bf16.msra.mxu0 %v1550_v5  ;;  %1806 = vmatpush1.bf16.msra.mxu1 %v1596_v16 }
 0x211   : > { %1914 = vmatprep.subr.bf16.mxu0 %v1557_v15  ;;  %1807 = vmatprep.subr.bf16.mxu1 %v1603_v18  ;;  %v3433_v18 = vld [vmem:[%s4208_s24 + $0x780] sm:$0xff] }
 0x214   : > { %1915 = vmatpush1.bf16.msra.mxu0 %v1556_v17  ;;  %1808 = vmatpush1.bf16.msra.mxu1 %v1602_v40 }
 0x215   : > { %1916 = vmatprep.subr.bf16.mxu0 %v1563_v19  ;;  %1809 = vmatprep.subr.bf16.mxu1 %v1609_v25  ;;  %v3435_v19 = vld [vmem:[%s4208_s24 + $0x790] sm:$0xff] }
 0x216   : > { %v1622_v25 = vunpack.c.l.s8.bf16 %v3435_v19 }
 0x218   : > { %1917 = vmatpush1.bf16.msra.mxu0 %v1562_v22  ;;  %1810 = vmatpush1.bf16.msra.mxu1 %v1608_v51  ;;  %v1620_v22 = vunpack.c.l.s8.bf16 %v3433_v18  ;;  %v3442_v51 = vld [vmem:[%s4208_s24 + $0x7c8] sm:$0xff] }
 0x219   : > { %1918 = vmatprep.subr.bf16.mxu0 %v1569_v27  ;;  %1811 = vmatprep.subr.bf16.mxu1 %v1615_v35  ;;  %v1629_v27 = vunpack.c.h.s8.bf16 %v3436_v60  ;;  %v1628_v35 = vunpack.c.h.s8.bf16 %v3435_v19  ;;  %v1635_v38 = vunpack.c.l.s8.bf16 %v3442_v51  ;;  %v1641_v45 = vunpack.c.h.s8.bf16 %v3442_v51  ;;  %v3451_v60 = vld [vmem:[%s4208_s24 + $0x810] sm:$0xff] }
 0x21c   : > { %1919 = vmatpush1.bf16.msra.mxu0 %v1568_v32  ;;  %1812 = vmatpush1.bf16.msra.mxu1 %v1614_v41  ;;  %v1626_v32 = vunpack.c.h.s8.bf16 %v3433_v18  ;;  %v3441_v41 = vld [vmem:[%s4208_s24 + $0x7c0] sm:$0xff] }
 0x21d   : > { %1920 = vmatprep.subr.bf16.mxu0 %v1575_v36  ;;  %1822 = vmatprep.subr.bf16.mxu1 %v1621_v43  ;;  %v1633_v36 = vunpack.c.l.s8.bf16 %v3440_v30  ;;  %v1634_v43 = vunpack.c.l.s8.bf16 %v3441_v41 }
 0x220   : > { %1921 = vmatpush1.bf16.msra.mxu0 %v1574_v42  ;;  %v1632_v42 = vunpack.c.l.s8.bf16 %v3439_v37 }
 0x221   : > { %1922 = vmatprep.subr.bf16.mxu0 %v1581_v44  ;;  %v1639_v44 = vunpack.c.h.s8.bf16 %v3440_v30  ;;  %v3463_v30 = vld [vmem:[%s4208_s24 + $0x870] sm:$0xff] }
 0x224   : > { %1923 = vmatpush1.bf16.msra.mxu0 %v1580_v46  ;;  %v3446_v46 = vld [vmem:[%s4208_s24 + $0x7e8] sm:$0xff] }
 0x225   : > { %1924 = vmatprep.subr.bf16.mxu0 %v1587_v47  ;;  %v3448_v47 = vld [vmem:[%s4208_s24 + $0x7f8] sm:$0xff] }
 0x226   : > { %v1653_v56 = vunpack.c.h.s8.bf16 %v3448_v47 }
 0x228   : > { %1925 = vmatpush1.bf16.msra.mxu0 %v1586_v39  ;;  %v1640_v39 = vunpack.c.h.s8.bf16 %v3441_v41  ;;  %v3470_v41 = vld [vmem:[%s4208_s24 + $0x8a8] sm:$0xff] }
 0x229   : > { %1926 = vmatprep.subr.bf16.mxu0 %v1593_v52  ;;  %v1645_v52 = vunpack.c.l.s8.bf16 %v3446_v46 }
 0x22c   : > { %1927 = vmatpush1.bf16.msra.mxu0 %v1592_v11  ;;  %v1647_v11 = vunpack.c.l.s8.bf16 %v3448_v47 }
 0x22d   : > { %1928 = vmatprep.subr.bf16.mxu0 %v1599_v54  ;;  %v3447_v54 = vld [vmem:[%s4208_s24 + $0x7f0] sm:$0xff] }
 0x230   : > { %1929 = vmatpush1.bf16.msra.mxu0 %v1598_v50  ;;  %v1646_v50 = vunpack.c.l.s8.bf16 %v3447_v54 }
 0x231   : > { %1930 = vmatprep.subr.bf16.mxu0 %v1605_v12  ;;  %v1651_v12 = vunpack.c.h.s8.bf16 %v3446_v46  ;;  %v3469_v46 = vld [vmem:[%s4208_s24 + $0x8a0] sm:$0xff] }
 0x232   : > { %v1692_v53 = vunpack.c.l.s8.bf16 %v3469_v46 }
 0x234   : > { %1931 = vmatpush1.bf16.msra.mxu0 %v1604_v57  ;;  %v3452_v57 = vld [vmem:[%s4208_s24 + $0x818] sm:$0xff] }
 0x235   : > { %1932 = vmatprep.subr.bf16.mxu0 %v1611_v34  ;;  %v3454_v34 = vld [vmem:[%s4208_s24 + $0x828] sm:$0xff] }
 0x238   : > { %1933 = vmatpush1.bf16.msra.mxu0 %v1610_v59  ;;  %v1652_v59 = vunpack.c.h.s8.bf16 %v3447_v54  ;;  %v1699_v54 = vunpack.c.h.s8.bf16 %v3470_v41 }
 0x239   : > { %1934 = vmatprep.subr.bf16.mxu0 %v1617_v33  ;;  %v1657_v33 = vunpack.c.l.s8.bf16 %v3452_v57 }
 0x23c   : > { %1935 = vmatpush1.bf16.msra.mxu0 %v1616_v61  ;;  %v1659_v61 = vunpack.c.l.s8.bf16 %v3454_v34 }
 0x23d   : > { %1945 = vmatprep.subr.bf16.mxu0 %v1623_v0  ;;  %v3453_v0 = vld [vmem:[%s4208_s24 + $0x820] sm:$0xff] }
 0x251   : > { %v1044_v7 = vpop.f32.mrb[4].mxu1 }
 0x252   : > { %v1208_v9 = vmul.f32 %v1187_v3, %v1044_v7  ;;  %v1046_v10 = vpop.f32.mrb[5].mxu1  ;;  %v1656_v3 = vunpack.c.l.s8.bf16 %v3451_v60  ;;  %v1665_v7 = vunpack.c.h.s8.bf16 %v3454_v34 }
 0x253   : > { %v1209_v5 = vmul.f32 %v1191_v4, %v1046_v10  ;;  %v1048_v13 = vpop.f32.mrb[6].mxu1  ;;  %v1658_v4 = vunpack.c.l.s8.bf16 %v3453_v0  ;;  %v1662_v10 = vunpack.c.h.s8.bf16 %v3451_v60 }
 0x254   : > { %v1246_v14 = vadd.f32 %v1225_v6, %v1208_v9  ;;  %v1049_v15 = vpop.f32.mrb[7].mxu1  ;;  %v1663_v6 = vunpack.c.h.s8.bf16 %v3452_v57  ;;  %v3460_v9 = vld [vmem:[%s4208_s24 + $0x858] sm:$0xff] }
 0x255   : > { %v1247_v49 = vadd.f32 %v1229_v8, %v1209_v5  ;;  %v3458_v8 = vld [vmem:[%s4208_s24 + $0x848] sm:$0xff]  ;;  %v1664_v5 = vunpack.c.h.s8.bf16 %v3453_v0  ;;  %v1671_v15 = vunpack.c.l.s8.bf16 %v3460_v9  ;;  %v1677_v19 = vunpack.c.h.s8.bf16 %v3460_v9 }
 0x256   : > { %v1252_v16 = vmax.f32 %v1246_v14, 0.0  ;;  %v1669_v13 = vunpack.c.l.s8.bf16 %v3458_v8  ;;  %v3457_v14 = vld [vmem:[%s4208_s24 + $0x840] sm:$0xff]  ;;  %v1675_v18 = vunpack.c.h.s8.bf16 %v3458_v8 }
 0x257   : > { %v1253_v17 = vmax.f32 %v1247_v49, 0.0  ;;  %v3459_v49 = vld [vmem:[%s4208_s24 + $0x850] sm:$0xff] }
 0x258   : > { %v4550_v21 = vpack.c.bf16 %v1252_v16, %v1252_v16 }
 0x259   : > { %v3659_v20 = vpack.c.bf16 %v1253_v17, %v1252_v16  ;;  %v4552_v40 = vpack.c.bf16 %v1253_v17, %v1253_v17  ;;  %v1668_v16 = vunpack.c.l.s8.bf16 %v3457_v14  ;;  %v1670_v17 = vunpack.c.l.s8.bf16 %v3459_v49 }
 0x25b   : > { %1281 = vst [vmem:[#allocation2 + $0x8] sm:$0xff] %v3659_v20  ;;  %1813 = vmatprep.mubr.bf16.mxu1 %v4552_v40  ;;  %1936 = vmatprep.mubr.bf16.mxu0 %v4552_v40  ;;  %v3464_v20 = vld [vmem:[%s4208_s24 + $0x878] sm:$0xff] }
 0x25c   : > { %1814 = vmatmul.mubr.bf16.vlgmr.msra.gmra.mrb[8].mxu1 %v4550_v21  ;;  %1937 = vmatmul.mubr.bf16.vlgmr.msra.gmra.mrb[8].mxu0 %v4550_v21  ;;  %v1687_v37 = vunpack.c.h.s8.bf16 %v3464_v20 }
 0x25d   : > { %1823 = vmatpush1.bf16.msra.mxu1 %v1620_v22  ;;  %1946 = vmatpush1.bf16.msra.mxu0 %v1622_v25  ;;  %v3466_v22 = vld [vmem:[%s4208_s24 + $0x888] sm:$0xff]  ;;  %v1674_v25 = vunpack.c.h.s8.bf16 %v3457_v14 }
 0x25e   : > { %1824 = vmatprep.subr.bf16.mxu1 %v1627_v24  ;;  %1947 = vmatprep.subr.bf16.mxu0 %v1629_v27  ;;  %v1676_v24 = vunpack.c.h.s8.bf16 %v3459_v49  ;;  %v1681_v27 = vunpack.c.l.s8.bf16 %v3464_v20  ;;  %v1683_v51 = vunpack.c.l.s8.bf16 %v3466_v22  ;;  %v3342_v49 = vld [vmem:[%s4208_s24 + $0x4a8] sm:$0xff]  ;;  %v3341_v20 = vld [vmem:[%s4208_s24 + $0x4a0] sm:$0xff] }
 0x261   : > { %1825 = vmatpush1.bf16.msra.mxu1 %v1626_v32  ;;  %1948 = vmatpush1.bf16.msra.mxu0 %v1628_v35  ;;  %v3465_v32 = vld [vmem:[%s4208_s24 + $0x880] sm:$0xff]  ;;  %v1680_v35 = vunpack.c.l.s8.bf16 %v3463_v30 }
 0x262   : > { %1826 = vmatprep.subr.bf16.mxu1 %v1633_v36  ;;  %1949 = vmatprep.subr.bf16.mxu0 %v1635_v38  ;;  %v1682_v36 = vunpack.c.l.s8.bf16 %v3465_v32  ;;  %v1689_v38 = vunpack.c.h.s8.bf16 %v3466_v22 }
 0x265   : > { %1827 = vmatpush1.bf16.msra.mxu1 %v1632_v42  ;;  %1950 = vmatpush1.bf16.msra.mxu0 %v1634_v43  ;;  %v3472_v42 = vld [vmem:[%s4208_s24 + $0x8b8] sm:$0xff]  ;;  %v1686_v43 = vunpack.c.h.s8.bf16 %v3463_v30  ;;  %v1439_v30 = vunpack.c.h.s8.bf16 %v3342_v49 }
 0x266   : > { %1828 = vmatprep.subr.bf16.mxu1 %v1639_v44  ;;  %1951 = vmatprep.subr.bf16.mxu0 %v1641_v45  ;;  %v1688_v44 = vunpack.c.h.s8.bf16 %v3465_v32  ;;  %v1693_v45 = vunpack.c.l.s8.bf16 %v3470_v41  ;;  %v1695_v47 = vunpack.c.l.s8.bf16 %v3472_v42  ;;  %v1438_v32 = vunpack.c.h.s8.bf16 %v3341_v20  ;;  %v3354_v41 = vld [vmem:[%s4208_s24 + $0x508] sm:$0xff] }
 0x269   : > { %1829 = vmatpush1.bf16.msra.mxu1 %v1638_v48  ;;  %1952 = vmatpush1.bf16.msra.mxu0 %v1640_v39  ;;  %v3471_v48 = vld [vmem:[%s4208_s24 + $0x8b0] sm:$0xff]  ;;  %v4584_v39 = vsub.s32 4, %v4455_v23 }
 0x26a   : > { %1830 = vmatprep.subr.bf16.mxu1 %v1645_v52  ;;  %1953 = vmatprep.subr.bf16.mxu0 %v1647_v11  ;;  %v4587_v52 = vsub.s32 5, %v4455_v23  ;;  %v1694_v11 = vunpack.c.l.s8.bf16 %v3471_v48  ;;  %v1698_v23 = vunpack.c.h.s8.bf16 %v3469_v46  ;;  %v1700_v34 = vunpack.c.h.s8.bf16 %v3471_v48  ;;  %v3360_v46 = vld [vmem:[%s4208_s24 + $0x538] sm:$0xff] }
 0x26b   : > { %v1469_v48 = vunpack.c.l.s8.bf16 %v3360_v46 }
 0x26c   : > { %v1199_v57 = vrot.slane %v4461_v28, %v4587_v52 }
 0x26d   : > { %1831 = vmatpush1.bf16.msra.mxu1 %v1644_v55  ;;  %1954 = vmatpush1.bf16.msra.mxu0 %v1646_v50  ;;  %v1701_v55 = vunpack.c.h.s8.bf16 %v3472_v42  ;;  %v3476_v50 = vld [vmem:[%s4208_s24 + $0x8d8] sm:$0xff] }
 0x26e   : > { %1832 = vmatprep.subr.bf16.mxu1 %v1651_v12  ;;  %1955 = vmatprep.subr.bf16.mxu0 %v1653_v56  ;;  %v3478_v12 = vld [vmem:[%s4208_s24 + $0x8e8] sm:$0xff]  ;;  %v1195_v56 = vrot.slane %v4461_v28, %v4584_v39 }
 0x26f   : > { %v1707_v60 = vunpack.c.l.s8.bf16 %v3478_v12  ;;  %v1713_v14 = vunpack.c.h.s8.bf16 %v3478_v12 }
 0x271   : > { %1833 = vmatpush1.bf16.msra.mxu1 %v1650_v58  ;;  %1956 = vmatpush1.bf16.msra.mxu0 %v1652_v59  ;;  %v1233_v58 = vrot.slane %v4468_v31, %v4584_v39  ;;  %v1705_v59 = vunpack.c.l.s8.bf16 %v3476_v50 }
 0x272   : > { %1834 = vmatprep.subr.bf16.mxu1 %v1657_v33  ;;  %1957 = vmatprep.subr.bf16.mxu0 %v1659_v61  ;;  %v3475_v33 = vld [vmem:[%s4208_s24 + $0x8d0] sm:$0xff]  ;;  %v3477_v61 = vld [vmem:[%s4208_s24 + $0x8e0] sm:$0xff] }
 0x273   : > { %v1704_v8 = vunpack.c.l.s8.bf16 %v3475_v33  ;;  %v1706_v9 = vunpack.c.l.s8.bf16 %v3477_v61 }
 0x275   : > { %1835 = vmatpush1.bf16.msra.mxu1 %v1656_v3  ;;  %1958 = vmatpush1.bf16.msra.mxu0 %v1658_v4  ;;  %v1237_v3 = vrot.slane %v4468_v31, %v4587_v52 }
 0x276   : > { %1836 = vmatprep.subr.bf16.mxu1 %v1663_v6  ;;  %1959 = vmatprep.subr.bf16.mxu0 %v1665_v7 }
 0x279   : > { %1837 = vmatpush1.bf16.msra.mxu1 %v1662_v10  ;;  %1960 = vmatpush1.bf16.msra.mxu0 %v1664_v5 }
 0x27a   : > { %1838 = vmatprep.subr.bf16.mxu1 %v1669_v13  ;;  %1961 = vmatprep.subr.bf16.mxu0 %v1671_v15  ;;  %v1711_v13 = vunpack.c.h.s8.bf16 %v3476_v50 }
 0x27d   : > { %1839 = vmatpush1.bf16.msra.mxu1 %v1668_v16  ;;  %1962 = vmatpush1.bf16.msra.mxu0 %v1670_v17  ;;  %v1710_v17 = vunpack.c.h.s8.bf16 %v3475_v33  ;;  %v3371_v33 = vld [vmem:[%s4208_s24 + $0x590] sm:$0xff] }
 0x27e   : > { %1840 = vmatprep.subr.bf16.mxu1 %v1675_v18  ;;  %1963 = vmatprep.subr.bf16.mxu0 %v1677_v19  ;;  %v1712_v18 = vunpack.c.h.s8.bf16 %v3477_v61  ;;  %v1433_v19 = vunpack.c.l.s8.bf16 %v3342_v49 }
 0x281   : > { %1841 = vmatpush1.bf16.msra.mxu1 %v1674_v25  ;;  %1964 = vmatpush1.bf16.msra.mxu0 %v1676_v24 }
 0x282   : > { %1842 = vmatprep.subr.bf16.mxu1 %v1681_v27  ;;  %1965 = vmatprep.subr.bf16.mxu0 %v1683_v51  ;;  %v1432_v27 = vunpack.c.l.s8.bf16 %v3341_v20  ;;  %v3348_v51 = vld [vmem:[%s4208_s24 + $0x4d8] sm:$0xff] }
 0x285   : > { %1843 = vmatpush1.bf16.msra.mxu1 %v1680_v35  ;;  %1966 = vmatpush1.bf16.msra.mxu0 %v1682_v36  ;;  %v1445_v35 = vunpack.c.l.s8.bf16 %v3348_v51  ;;  %v3347_v36 = vld [vmem:[%s4208_s24 + $0x4d0] sm:$0xff] }
 0x286   : > { %1844 = vmatprep.subr.bf16.mxu1 %v1687_v37  ;;  %1967 = vmatprep.subr.bf16.mxu0 %v1689_v38  ;;  %v1444_v37 = vunpack.c.l.s8.bf16 %v3347_v36  ;;  %v1451_v38 = vunpack.c.h.s8.bf16 %v3348_v51  ;;  %v1450_v42 = vunpack.c.h.s8.bf16 %v3347_v36 }
 0x289   : > { %1845 = vmatpush1.bf16.msra.mxu1 %v1686_v43  ;;  %1968 = vmatpush1.bf16.msra.mxu0 %v1688_v44  ;;  %v1457_v43 = vunpack.c.l.s8.bf16 %v3354_v41  ;;  %v3353_v44 = vld [vmem:[%s4208_s24 + $0x500] sm:$0xff] }
 0x28a   : > { %1846 = vmatprep.subr.bf16.mxu1 %v1693_v45  ;;  %1969 = vmatprep.subr.bf16.mxu0 %v1695_v47  ;;  %v1456_v45 = vunpack.c.l.s8.bf16 %v3353_v44  ;;  %v1462_v47 = vunpack.c.h.s8.bf16 %v3353_v44 }
 0x28d   : > { %1847 = vmatpush1.bf16.msra.mxu1 %v1692_v53  ;;  %1970 = vmatpush1.bf16.msra.mxu0 %v1694_v11  ;;  %v3359_v53 = vld [vmem:[%s4208_s24 + $0x530] sm:$0xff] }
 0x28e   : > { %1848 = vmatprep.subr.bf16.mxu1 %v1699_v54  ;;  %1971 = vmatprep.subr.bf16.mxu0 %v1701_v55  ;;  %v1468_v11 = vunpack.c.l.s8.bf16 %v3359_v53  ;;  %v1475_v54 = vunpack.c.h.s8.bf16 %v3360_v46  ;;  %v3366_v55 = vld [vmem:[%s4208_s24 + $0x568] sm:$0xff]  ;;  %v1474_v50 = vunpack.c.h.s8.bf16 %v3359_v53 }
 0x28f   : > { %v1481_v12 = vunpack.c.l.s8.bf16 %v3366_v55 }
 0x291   : > { %1849 = vmatpush1.bf16.msra.mxu1 %v1698_v23  ;;  %1972 = vmatpush1.bf16.msra.mxu0 %v1700_v34  ;;  %v1487_v23 = vunpack.c.h.s8.bf16 %v3366_v55  ;;  %v3372_v34 = vld [vmem:[%s4208_s24 + $0x598] sm:$0xff] }
 0x292   : > { %v1167_v0 = vpop.f32.mrb[4].mxu0  ;;  %1850 = vmatprep.subr.bf16.mxu1 %v1705_v59  ;;  %1973 = vmatprep.subr.bf16.mxu0 %v1707_v60  ;;  %v1493_v59 = vunpack.c.l.s8.bf16 %v3372_v34  ;;  %v1492_v60 = vunpack.c.l.s8.bf16 %v3371_v33  ;;  %v1499_v61 = vunpack.c.h.s8.bf16 %v3372_v34 }
 0x293   : > { %v1210_v4 = vmul.f32 %v1195_v56, %v1167_v0  ;;  %v1169_v28 = vpop.f32.mrb[5].mxu0  ;;  %v3365_v56 = vld [vmem:[%s4208_s24 + $0x560] sm:$0xff]  ;;  %v3378_v0 = vld [vmem:[%s4208_s24 + $0x5c8] sm:$0xff] }
 0x294   : > { %v1211_v6 = vmul.f32 %v1199_v57, %v1169_v28  ;;  %v1171_v7 = vpop.f32.mrb[6].mxu0  ;;  %v1480_v57 = vunpack.c.l.s8.bf16 %v3365_v56  ;;  %v3377_v28 = vld [vmem:[%s4208_s24 + $0x5c0] sm:$0xff] }
 0x295   : > { %v1248_v10 = vadd.f32 %v1233_v58, %v1210_v4  ;;  %v1172_v5 = vpop.f32.mrb[7].mxu0  ;;  %1851 = vmatpush1.bf16.msra.mxu1 %v1704_v8  ;;  %1974 = vmatpush1.bf16.msra.mxu0 %v1706_v9  ;;  %v1486_v58 = vunpack.c.h.s8.bf16 %v3365_v56  ;;  %v1505_v4 = vunpack.c.l.s8.bf16 %v3378_v0  ;;  %v1511_v7 = vunpack.c.h.s8.bf16 %v3378_v0  ;;  %v3384_v8 = vld [vmem:[%s4208_s24 + $0x5f8] sm:$0xff] }
 0x296   : > { %v1249_v15 = vadd.f32 %v1237_v3, %v1211_v6  ;;  %1852 = vmatprep.subr.bf16.mxu1 %v1711_v13  ;;  %1975 = vmatprep.subr.bf16.mxu0 %v1713_v14  ;;  %v1498_v3 = vunpack.c.h.s8.bf16 %v3371_v33  ;;  %v1504_v6 = vunpack.c.l.s8.bf16 %v3377_v28  ;;  %v1510_v9 = vunpack.c.h.s8.bf16 %v3377_v28  ;;  %v3383_v5 = vld [vmem:[%s4208_s24 + $0x5f0] sm:$0xff] }
 0x297   : > { %v1254_v16 = vmax.f32 %v1248_v10, 0.0  ;;  %v1517_v10 = vunpack.c.l.s8.bf16 %v3384_v8  ;;  %v1516_v13 = vunpack.c.l.s8.bf16 %v3383_v5  ;;  %v1523_v14 = vunpack.c.h.s8.bf16 %v3384_v8 }
 0x298   : > { %v1255_v31 = vmax.f32 %v1249_v15, 0.0  ;;  %v3390_v15 = vld [vmem:[%s4208_s24 + $0x628] sm:$0xff]  ;;  %v1522_v49 = vunpack.c.h.s8.bf16 %v3383_v5 }
 0x299   : > { %1853 = vmatpush1.bf16.msra.mxu1 %v1710_v17  ;;  %1976 = vmatpush1.bf16.msra.mxu0 %v1712_v18  ;;  %v4603_v25 = vpack.c.bf16 %v1254_v16, %v1254_v16  ;;  %v1535_v18 = vunpack.c.h.s8.bf16 %v3390_v15 }
 0x29a   : > { %v3660_v22 = vpack.c.bf16 %v1255_v31, %v1254_v16  ;;  %v4605_v24 = vpack.c.bf16 %v1255_v31, %v1255_v31  ;;  %1986 = vmatprep.subr.bf16.mxu1 %v1433_v19  ;;  %v1529_v16 = vunpack.c.l.s8.bf16 %v3390_v15  ;;  %v3389_v31 = vld [vmem:[%s4208_s24 + $0x620] sm:$0xff]  ;;  %v3396_v19 = vld [vmem:[%s4208_s24 + $0x658] sm:$0xff] }
 0x29b   : > { %v1528_v17 = vunpack.c.l.s8.bf16 %v3389_v31  ;;  %v1534_v20 = vunpack.c.h.s8.bf16 %v3389_v31  ;;  %v1547_v51 = vunpack.c.h.s8.bf16 %v3396_v19 }
 0x29c   : > { %1282 = vst [vmem:[#allocation2 + $0x10] sm:$0xff] %v3660_v22  ;;  %1854 = vmatprep.mubr.bf16.mxu1 %v4605_v24  ;;  %1977 = vmatprep.mubr.bf16.mxu0 %v4605_v24  ;;  %v1541_v22 = vunpack.c.l.s8.bf16 %v3396_v19 }
 0x29d   : > { %1855 = vmatmul.mubr.bf16.vlgmr.msra.gmra.mrb[8].mxu1 %v4603_v25  ;;  %1978 = vmatmul.mubr.bf16.vlgmr.msra.gmra.mrb[8].mxu0 %v4603_v25 }
 0x29e   : > { %1987 = vmatpush1.bf16.msra.mxu1 %v1432_v27  ;;  %2018 = vmatprep.mubr.bf16.mxu1 %v4487_v63  ;;  %v1463_v63 = vunpack.c.h.s8.bf16 %v3354_v41  ;;  %v3395_v27 = vld [vmem:[%s4208_s24 + $0x650] sm:$0xff] }
 0x29f   : > { %1988 = vmatprep.subr.bf16.mxu1 %v1439_v30  ;;  %v1540_v30 = vunpack.c.l.s8.bf16 %v3395_v27 }
 0x2a2   : > { %1989 = vmatpush1.bf16.msra.mxu1 %v1438_v32  ;;  %v3402_v32 = vld [vmem:[%s4208_s24 + $0x688] sm:$0xff] }
 0x2a3   : > { %1990 = vmatprep.subr.bf16.mxu1 %v1445_v35  ;;  %v1546_v35 = vunpack.c.h.s8.bf16 %v3395_v27  ;;  %v1553_v36 = vunpack.c.l.s8.bf16 %v3402_v32  ;;  %v3456_v27 = vld [vmem:[%s4208_s24 + $0x838] sm:$0xff] }
 0x2a6   : > { %1991 = vmatpush1.bf16.msra.mxu1 %v1444_v37 }
 0x2a7   : > { %1992 = vmatprep.subr.bf16.mxu1 %v1451_v38  ;;  %v3408_v38 = vld [vmem:[%s4208_s24 + $0x6b8] sm:$0xff] }
 0x2aa   : > { %1993 = vmatpush1.bf16.msra.mxu1 %v1450_v42  ;;  %v1565_v42 = vunpack.c.l.s8.bf16 %v3408_v38 }
 0x2ab   : > { %1994 = vmatprep.subr.bf16.mxu1 %v1457_v43  ;;  %v3407_v43 = vld [vmem:[%s4208_s24 + $0x6b0] sm:$0xff] }
 0x2ac   : > { %v1564_v44 = vunpack.c.l.s8.bf16 %v3407_v43  ;;  %v1570_v46 = vunpack.c.h.s8.bf16 %v3407_v43  ;;  %v3468_v43 = vld [vmem:[%s4208_s24 + $0x898] sm:$0xff] }
 0x2ae   : > { %1995 = vmatpush1.bf16.msra.mxu1 %v1456_v45  ;;  %v1571_v45 = vunpack.c.h.s8.bf16 %v3408_v38  ;;  %v3461_v38 = vld [vmem:[%s4208_s24 + $0x860] sm:$0xff] }
 0x2af   : > { %1996 = vmatprep.subr.bf16.mxu1 %v1463_v63  ;;  %v3414_v63 = vld [vmem:[%s4208_s24 + $0x6e8] sm:$0xff] }
 0x2b2   : > { %1997 = vmatpush1.bf16.msra.mxu1 %v1462_v47  ;;  %v1577_v47 = vunpack.c.l.s8.bf16 %v3414_v63 }
 0x2b3   : > { %1998 = vmatprep.subr.bf16.mxu1 %v1469_v48  ;;  %v3413_v48 = vld [vmem:[%s4208_s24 + $0x6e0] sm:$0xff] }
 0x2b4   : > { %v1576_v53 = vunpack.c.l.s8.bf16 %v3413_v48  ;;  %v1582_v55 = vunpack.c.h.s8.bf16 %v3413_v48  ;;  %v3474_v48 = vld [vmem:[%s4208_s24 + $0x8c8] sm:$0xff] }
 0x2b6   : > { %1999 = vmatpush1.bf16.msra.mxu1 %v1468_v11  ;;  %v1583_v11 = vunpack.c.h.s8.bf16 %v3414_v63  ;;  %v3467_v63 = vld [vmem:[%s4208_s24 + $0x890] sm:$0xff] }
 0x2b7   : > { %2000 = vmatprep.subr.bf16.mxu1 %v1475_v54  ;;  %v3420_v54 = vld [vmem:[%s4208_s24 + $0x718] sm:$0xff] }
 0x2ba   : > { %2001 = vmatpush1.bf16.msra.mxu1 %v1474_v50  ;;  %v1589_v50 = vunpack.c.l.s8.bf16 %v3420_v54 }
 0x2bb   : > { %2002 = vmatprep.subr.bf16.mxu1 %v1481_v12  ;;  %v3419_v12 = vld [vmem:[%s4208_s24 + $0x710] sm:$0xff] }
 0x2bc   : > { %v1588_v56 = vunpack.c.l.s8.bf16 %v3419_v12  ;;  %v1594_v34 = vunpack.c.h.s8.bf16 %v3419_v12  ;;  %v3480_v12 = vld [vmem:[%s4208_s24 + $0x8f8] sm:$0xff] }
 0x2be   : > { %2003 = vmatpush1.bf16.msra.mxu1 %v1480_v57  ;;  %v1595_v57 = vunpack.c.h.s8.bf16 %v3420_v54  ;;  %v3473_v54 = vld [vmem:[%s4208_s24 + $0x8c0] sm:$0xff] }
 0x2bf   : > { %2004 = vmatprep.subr.bf16.mxu1 %v1487_v23  ;;  %v3426_v23 = vld [vmem:[%s4208_s24 + $0x748] sm:$0xff] }
 0x2c2   : > { %2005 = vmatpush1.bf16.msra.mxu1 %v1486_v58  ;;  %v1601_v58 = vunpack.c.l.s8.bf16 %v3426_v23 }
 0x2c3   : > { %2006 = vmatprep.subr.bf16.mxu1 %v1493_v59  ;;  %v3425_v59 = vld [vmem:[%s4208_s24 + $0x740] sm:$0xff] }
 0x2c4   : > { %v1600_v33 = vunpack.c.l.s8.bf16 %v3425_v59  ;;  %v1606_v0 = vunpack.c.h.s8.bf16 %v3425_v59 }
 0x2c6   : > { %2007 = vmatpush1.bf16.msra.mxu1 %v1492_v60  ;;  %v1607_v60 = vunpack.c.h.s8.bf16 %v3426_v23  ;;  %v3479_v23 = vld [vmem:[%s4208_s24 + $0x8f0] sm:$0xff] }
 0x2c7   : > { %2008 = vmatprep.subr.bf16.mxu1 %v1499_v61  ;;  %v3432_v61 = vld [vmem:[%s4208_s24 + $0x778] sm:$0xff]  ;;  %v1714_v59 = vunpack.c.h.s8.bf16 %v3479_v23 }
 0x2ca   : > { %2009 = vmatpush1.bf16.msra.mxu1 %v1498_v3  ;;  %v1613_v3 = vunpack.c.l.s8.bf16 %v3432_v61 }
 0x2cb   : > { %2010 = vmatprep.subr.bf16.mxu1 %v1505_v4  ;;  %v3431_v4 = vld [vmem:[%s4208_s24 + $0x770] sm:$0xff] }
 0x2cc   : > { %v1612_v28 = vunpack.c.l.s8.bf16 %v3431_v4  ;;  %v1618_v8 = vunpack.c.h.s8.bf16 %v3431_v4 }
 0x2ce   : > { %2011 = vmatpush1.bf16.msra.mxu1 %v1504_v6  ;;  %v1619_v6 = vunpack.c.h.s8.bf16 %v3432_v61 }
 0x2cf   : > { %2012 = vmatprep.subr.bf16.mxu1 %v1511_v7  ;;  %v3438_v7 = vld [vmem:[%s4208_s24 + $0x7a8] sm:$0xff] }
 0x2d2   : > { %2013 = vmatpush1.bf16.msra.mxu1 %v1510_v9  ;;  %v1625_v9 = vunpack.c.l.s8.bf16 %v3438_v7 }
 0x2d3   : > { %2014 = vmatprep.subr.bf16.mxu1 %v1517_v10  ;;  %v3437_v10 = vld [vmem:[%s4208_s24 + $0x7a0] sm:$0xff] }
 0x2d4   : > { %v1624_v5 = vunpack.c.l.s8.bf16 %v3437_v10  ;;  %v1630_v15 = vunpack.c.h.s8.bf16 %v3437_v10 }
 0x2d6   : > { %2015 = vmatpush1.bf16.msra.mxu1 %v1516_v13  ;;  %v1631_v13 = vunpack.c.h.s8.bf16 %v3438_v7 }
 0x2d7   : > { %2016 = vmatprep.subr.bf16.mxu1 %v1523_v14  ;;  %v3444_v14 = vld [vmem:[%s4208_s24 + $0x7d8] sm:$0xff] }
 0x2da   : > { %2017 = vmatpush1.bf16.msra.mxu1 %v1522_v49  ;;  %v1637_v49 = vunpack.c.l.s8.bf16 %v3444_v14 }
 0x2db   : > { %2027 = vmatprep.subr.bf16.mxu1 %v1529_v16  ;;  %v3443_v16 = vld [vmem:[%s4208_s24 + $0x7d0] sm:$0xff] }
 0x2dc   : > { %v1636_v31 = vunpack.c.l.s8.bf16 %v3443_v16  ;;  %v1642_v19 = vunpack.c.h.s8.bf16 %v3443_v16 }
 0x2dd   : > { %2019 = vmatmul.mubr.bf16.vlgmr.msra.gmra.mrb[12].mxu1 %v4485_v62  ;;  %v3401_v62 = vld [vmem:[%s4208_s24 + $0x680] sm:$0xff] }
 0x2de   : > { %2028 = vmatpush1.bf16.msra.mxu1 %v1528_v17  ;;  %2059 = vmatprep.mubr.bf16.mxu1 %v4552_v40  ;;  %v1552_v37 = vunpack.c.l.s8.bf16 %v3401_v62  ;;  %v1559_v40 = vunpack.c.h.s8.bf16 %v3402_v32  ;;  %v1558_v41 = vunpack.c.h.s8.bf16 %v3401_v62  ;;  %v1643_v17 = vunpack.c.h.s8.bf16 %v3444_v14  ;;  %v3455_v32 = vld [vmem:[%s4208_s24 + $0x830] sm:$0xff]  ;;  %v3462_v62 = vld [vmem:[%s4208_s24 + $0x868] sm:$0xff] }
 0x2df   : > { %2029 = vmatprep.subr.bf16.mxu1 %v1535_v18  ;;  %v3450_v18 = vld [vmem:[%s4208_s24 + $0x808] sm:$0xff] }
 0x2e2   : > { %2030 = vmatpush1.bf16.msra.mxu1 %v1534_v20  ;;  %v1649_v20 = vunpack.c.l.s8.bf16 %v3450_v18 }
 0x2e3   : > { %2031 = vmatprep.subr.bf16.mxu1 %v1541_v22 }
 0x2e6   : > { %2032 = vmatpush1.bf16.msra.mxu1 %v1540_v30 }
 0x2e7   : > { %2033 = vmatprep.subr.bf16.mxu1 %v1547_v51  ;;  %v1661_v51 = vunpack.c.l.s8.bf16 %v3456_v27 }
 0x2ea   : > { %2034 = vmatpush1.bf16.msra.mxu1 %v1546_v35  ;;  %v1660_v35 = vunpack.c.l.s8.bf16 %v3455_v32 }
 0x2eb   : > { %2035 = vmatprep.subr.bf16.mxu1 %v1553_v36  ;;  %v1667_v36 = vunpack.c.h.s8.bf16 %v3456_v27 }
 0x2ee   : > { %2036 = vmatpush1.bf16.msra.mxu1 %v1552_v37  ;;  %v1666_v37 = vunpack.c.h.s8.bf16 %v3455_v32 }
 0x2ef   : > { %2037 = vmatprep.subr.bf16.mxu1 %v1559_v40  ;;  %v1673_v40 = vunpack.c.l.s8.bf16 %v3462_v62 }
 0x2f2   : > { %2038 = vmatpush1.bf16.msra.mxu1 %v1558_v41  ;;  %v1672_v41 = vunpack.c.l.s8.bf16 %v3461_v38 }
 0x2f3   : > { %2039 = vmatprep.subr.bf16.mxu1 %v1565_v42  ;;  %v1679_v42 = vunpack.c.h.s8.bf16 %v3462_v62 }
 0x2f6   : > { %2040 = vmatpush1.bf16.msra.mxu1 %v1564_v44  ;;  %v1678_v44 = vunpack.c.h.s8.bf16 %v3461_v38 }
 0x2f7   : > { %2041 = vmatprep.subr.bf16.mxu1 %v1571_v45  ;;  %v1685_v45 = vunpack.c.l.s8.bf16 %v3468_v43 }
 0x2fa   : > { %2042 = vmatpush1.bf16.msra.mxu1 %v1570_v46  ;;  %v1684_v46 = vunpack.c.l.s8.bf16 %v3467_v63 }
 0x2fb   : > { %2043 = vmatprep.subr.bf16.mxu1 %v1577_v47  ;;  %v1691_v47 = vunpack.c.h.s8.bf16 %v3468_v43 }
 0x2fe   : > { %2044 = vmatpush1.bf16.msra.mxu1 %v1576_v53  ;;  %v1690_v53 = vunpack.c.h.s8.bf16 %v3467_v63 }
 0x2ff   : > { %2045 = vmatprep.subr.bf16.mxu1 %v1583_v11  ;;  %v1697_v11 = vunpack.c.l.s8.bf16 %v3474_v48 }
 0x302   : > { %2046 = vmatpush1.bf16.msra.mxu1 %v1582_v55  ;;  %v1696_v55 = vunpack.c.l.s8.bf16 %v3473_v54 }
 0x303   : > { %2047 = vmatprep.subr.bf16.mxu1 %v1589_v50  ;;  %v1703_v50 = vunpack.c.h.s8.bf16 %v3474_v48 }
 0x306   : > { %2048 = vmatpush1.bf16.msra.mxu1 %v1588_v56  ;;  %v1702_v56 = vunpack.c.h.s8.bf16 %v3473_v54 }
 0x307   : > { %2049 = vmatprep.subr.bf16.mxu1 %v1595_v57  ;;  %v1709_v57 = vunpack.c.l.s8.bf16 %v3480_v12 }
 0x30a   : > { %2050 = vmatpush1.bf16.msra.mxu1 %v1594_v34  ;;  %v1708_v34 = vunpack.c.l.s8.bf16 %v3479_v23 }
 0x30b   : > { %2051 = vmatprep.subr.bf16.mxu1 %v1601_v58  ;;  %v1715_v58 = vunpack.c.h.s8.bf16 %v3480_v12 }
 0x30e   : > { %2052 = vmatpush1.bf16.msra.mxu1 %v1600_v33  ;;  %v3487_v33 = vld [vmem:[%s4215_s27 + $0x6] sm:$0x3f] }
 0x30f   : > { %2053 = vmatprep.subr.bf16.mxu1 %v1607_v60  ;;  %v3488_v60 = vld [vmem:[%s4221_s28 + $0x6] sm:$0x3f]  ;;  %v2115_v61 = vrot.slane %v3487_v33, %v4458_v26  ;;  %v2127_v4 = vrot.slane %v3487_v33, %v4538_v2  ;;  %v2135_v27 = vrot.slane %v3487_v33, %v4587_v52 }
 0x310   : > { %v2174_v32 = vrot.slane %v3488_v60, %v4587_v52 }
 0x312   : > { %2054 = vmatpush1.bf16.msra.mxu1 %v1606_v0  ;;  %v2123_v0 = vrot.slane %v3487_v33, %v4535_v1 }
 0x313   : > { %2055 = vmatprep.subr.bf16.mxu1 %v1613_v3  ;;  %v2119_v3 = vrot.slane %v3487_v33, %v4464_v29 }
 0x316   : > { %2056 = vmatpush1.bf16.msra.mxu1 %v1612_v28  ;;  %v2154_v28 = vrot.slane %v3488_v60, %v4458_v26 }
 0x317   : > { %2057 = vmatprep.subr.bf16.mxu1 %v1619_v6  ;;  %v2162_v6 = vrot.slane %v3488_v60, %v4535_v1 }
 0x31a   : > { %2058 = vmatpush1.bf16.msra.mxu1 %v1618_v8 }
 0x31b   : > { %2068 = vmatprep.subr.bf16.mxu1 %v1625_v9  ;;  %v2158_v9 = vrot.slane %v3488_v60, %v4464_v29 }
 0x31d   : > { %2060 = vmatmul.mubr.bf16.vlgmr.msra.gmra.mrb[12].mxu1 %v4550_v21  ;;  %v3449_v21 = vld [vmem:[%s4208_s24 + $0x800] sm:$0xff] }
 0x31e   : > { %2069 = vmatpush1.bf16.msra.mxu1 %v1624_v5  ;;  %2100 = vmatprep.mubr.bf16.mxu1 %v4605_v24  ;;  %v1648_v22 = vunpack.c.l.s8.bf16 %v3449_v21  ;;  %v1655_v24 = vunpack.c.h.s8.bf16 %v3450_v18  ;;  %v1654_v30 = vunpack.c.h.s8.bf16 %v3449_v21 }
 0x31f   : > { %2070 = vmatprep.subr.bf16.mxu1 %v1631_v13 }
 0x322   : > { %2071 = vmatpush1.bf16.msra.mxu1 %v1630_v15 }
 0x323   : > { %2072 = vmatprep.subr.bf16.mxu1 %v1637_v49 }
 0x326   : > { %2073 = vmatpush1.bf16.msra.mxu1 %v1636_v31 }
 0x327   : > { %2074 = vmatprep.subr.bf16.mxu1 %v1643_v17 }
 0x32a   : > { %2075 = vmatpush1.bf16.msra.mxu1 %v1642_v19 }
 0x32b   : > { %2076 = vmatprep.subr.bf16.mxu1 %v1649_v20 }
 0x32e   : > { %2077 = vmatpush1.bf16.msra.mxu1 %v1648_v22 }
 0x32f   : > { %2078 = vmatprep.subr.bf16.mxu1 %v1655_v24  ;;  %v2131_v24 = vrot.slane %v3487_v33, %v4584_v39 }
 0x332   : > { %2079 = vmatpush1.bf16.msra.mxu1 %v1654_v30  ;;  %v2170_v30 = vrot.slane %v3488_v60, %v4584_v39 }
 0x333   : > { %2080 = vmatprep.subr.bf16.mxu1 %v1661_v51 }
 0x336   : > { %2081 = vmatpush1.bf16.msra.mxu1 %v1660_v35 }
 0x337   : > { %2082 = vmatprep.subr.bf16.mxu1 %v1667_v36 }
 0x33a   : > { %2083 = vmatpush1.bf16.msra.mxu1 %v1666_v37 }
 0x33b   : > { %2084 = vmatprep.subr.bf16.mxu1 %v1673_v40 }
 0x33e   : > { %2085 = vmatpush1.bf16.msra.mxu1 %v1672_v41 }
 0x33f   : > { %2086 = vmatprep.subr.bf16.mxu1 %v1679_v42 }
 0x342   : > { %2087 = vmatpush1.bf16.msra.mxu1 %v1678_v44 }
 0x343   : > { %2088 = vmatprep.subr.bf16.mxu1 %v1685_v45 }
 0x346   : > { %2089 = vmatpush1.bf16.msra.mxu1 %v1684_v46 }
 0x347   : > { %2090 = vmatprep.subr.bf16.mxu1 %v1691_v47 }
 0x34a   : > { %2091 = vmatpush1.bf16.msra.mxu1 %v1690_v53 }
 0x34b   : > { %2092 = vmatprep.subr.bf16.mxu1 %v1697_v11 }
 0x34e   : > { %2093 = vmatpush1.bf16.msra.mxu1 %v1696_v55 }
 0x34f   : > { %2094 = vmatprep.subr.bf16.mxu1 %v1703_v50 }
 0x352   : > { %2095 = vmatpush1.bf16.msra.mxu1 %v1702_v56 }
 0x353   : > { %2096 = vmatprep.subr.bf16.mxu1 %v1709_v57 }
 0x356   : > { %2097 = vmatpush1.bf16.msra.mxu1 %v1708_v34 }
 0x357   : > { %2098 = vmatprep.subr.bf16.mxu1 %v1715_v58 }
 0x35a   : > { %2099 = vmatpush1.bf16.msra.mxu1 %v1714_v59 }
 0x35d   : > { %2101 = vmatmul.mubr.bf16.vlgmr.msra.gmra.mrb[12].mxu1 %v4603_v25  ;;  %v2166_v25 = vrot.slane %v3488_v60, %v4538_v2 }
 0x370   : > { %v1856_v7 = vpop.f32.mrb[8].mxu1  ;;  %v1979_v8 = vpop.f32.mrb[8].mxu0 }
 0x371   : > { %v2142_v10 = vmul.f32 %v2115_v61, %v1856_v7  ;;  %v2144_v5 = vmul.f32 %v2123_v0, %v1979_v8  ;;  %v1858_v13 = vpop.f32.mrb[9].mxu1  ;;  %v1981_v14 = vpop.f32.mrb[9].mxu0 }
 0x372   : > { %v2143_v15 = vmul.f32 %v2119_v3, %v1858_v13  ;;  %v2145_v49 = vmul.f32 %v2127_v4, %v1981_v14  ;;  %v1860_v16 = vpop.f32.mrb[10].mxu1  ;;  %v1983_v31 = vpop.f32.mrb[10].mxu0 }
 0x373   : > { %v2181_v17 = vadd.f32 %v2154_v28, %v2142_v10  ;;  %v2183_v18 = vadd.f32 %v2162_v6, %v2144_v5  ;;  %v1861_v19 = vpop.f32.mrb[11].mxu1  ;;  %v1984_v20 = vpop.f32.mrb[11].mxu0 }
 0x374   : > { %v2182_v21 = vadd.f32 %v2158_v9, %v2143_v15  ;;  %v2184_v22 = vadd.f32 %v2166_v25, %v2145_v49 }
 0x375   : > { %v2192_v42 = vmax.f32 (!%p2187_p1), %v2181_v17, 0.0  ;;  %v2194_v44 = vmax.f32 (!%p2187_p1), %v2183_v18, 0.0 }
 0x376   : > { %v2193_v43 = vmax.f32 (!%p2187_p1), %v2182_v21, 0.0  ;;  %v2195_v45 = vmax.f32 (!%p2187_p1), %v2184_v22, 0.0 }
 0x378   : > { %v3661_v47 = vpack.c.bf16 (!%p2187_p1), %v2193_v43, %v2192_v42  ;;  %v3662_v48 = vpack.c.bf16 (!%p2187_p1), %v2195_v45, %v2194_v44 }
 0x37a   : > { %2222 = vst [vmem:[#allocation2] sm:$0xff] (!%p2187_p1), %v3661_v47  ;;  %2223 = vst [vmem:[#allocation2 + $0x8] sm:$0xff] (!%p2187_p1), %v3662_v48 }
 0x42e   : > { %2191 = sbr.rel (%p2187_p1) target bundleno = 1083 (0x43b), region = 60 }
 0x430   : > { %v2102_v51 = vpop.f32.mrb[12].mxu1 }
 0x431   : > { %v2146_v35 = vmul.f32 %v2131_v24, %v2102_v51  ;;  %v2104_v36 = vpop.f32.mrb[13].mxu1 }
 0x432   : > { %v2147_v62 = vmul.f32 %v2135_v27, %v2104_v36  ;;  %v2106_v37 = vpop.f32.mrb[14].mxu1 }
 0x433   : > { %v2185_v40 = vadd.f32 %v2170_v30, %v2146_v35  ;;  %v2107_v38 = vpop.f32.mrb[15].mxu1 }
 0x434   : > { %v2186_v41 = vadd.f32 %v2174_v32, %v2147_v62 }
 0x435   : > { %v2196_v63 = vmax.f32 %v2185_v40, 0.0 }
 0x436   : > { %v2197_v46 = vmax.f32 %v2186_v41, 0.0 }
 0x438   : > { %v3663_v53 = vpack.c.bf16 %v2197_v46, %v2196_v63 }
 0x43a   : > { %2224 = vst [vmem:[#allocation2 + $0x10] sm:$0xff] %v3663_v53 }
 0x43b PF: > { %p3493_p7 = scmp.ne.s32.totalorder %s4053_s25, 2 }
 0x43c   : > { %v3664_v11 = vpack.c.bf16 (!%p3493_p7), %v2182_v21, %v2181_v17  ;;  %v3665_v54 = vpack.c.bf16 (!%p3493_p7), %v2184_v22, %v2183_v18  ;;  %v3666_v55 = vpack.c.bf16 (!%p3493_p7), %v2186_v41, %v2185_v40 }
 0x43d   : > { %2227 = sbr.rel (%p3493_p7) target bundleno = 1092 (0x444), region = 64 }
 0x43e   : > { %2252 = vst [vmem:[#allocation2] sm:$0xff] (!%p3493_p7), %v3664_v11  ;;  %2253 = vst [vmem:[#allocation2 + $0x8] sm:$0xff] (!%p3493_p7), %v3665_v54 }
 0x43f   : > { %2254 = vst [vmem:[#allocation2 + $0x10] sm:$0xff] (!%p3493_p7), %v3666_v55 }
 0x444 PF: > { %v3498_v50 = vld [vmem:[%s4208_s24 + $0x908] sm:$0xff]  ;;  %v3497_v12 = vld [vmem:[%s4208_s24 + $0x900] sm:$0xff]  ;;  %v3504_v34 = vld [vmem:[%s4208_s24 + $0x938] sm:$0xff]  ;;  %p3159_p9 = scmp.eq.s32.totalorder %s4053_s25, 5 }
 0x445   : > { %v2401_v56 = vunpack.c.l.s8.bf16 %v3498_v50  ;;  %v2407_v57 = vunpack.c.h.s8.bf16 %v3498_v50  ;;  %v2400_v23 = vunpack.c.l.s8.bf16 %v3497_v12  ;;  %v2406_v58 = vunpack.c.h.s8.bf16 %v3497_v12  ;;  %v3503_v33 = vld [vmem:[%s4208_s24 + $0x930] sm:$0xff]  ;;  %v3500_v60 = vld [vmem:[%s4208_s24 + $0x918] sm:$0xff]  ;;  %v4689_v0 = vld [vmem:[#allocation2] sm:$0xff] }
 0x446   : > { %v2413_v59 = vunpack.c.l.s8.bf16 %v3504_v34  ;;  %v3499_v61 = vld [vmem:[%s4208_s24 + $0x910] sm:$0xff]  ;;  %v2412_v3 = vunpack.c.l.s8.bf16 %v3503_v33  ;;  %v2419_v4 = vunpack.c.h.s8.bf16 %v3504_v34  ;;  %v2403_v28 = vunpack.c.l.s8.bf16 %v3500_v60  ;;  %v3510_v7 = vld [vmem:[%s4208_s24 + $0x968] sm:$0xff]  ;;  %v3509_v14 = vld [vmem:[%s4208_s24 + $0x960] sm:$0xff]  ;;  %p3160_p2 = por %p3159_p9, %p2187_p1 }
 0x447   : > { %2712 = vmatprep.subr.bf16.mxu0 %v2401_v56  ;;  %v2402_v6 = vunpack.c.l.s8.bf16 %v3499_v61  ;;  %v2409_v8 = vunpack.c.h.s8.bf16 %v3500_v60  ;;  %v4694_v9 = vcombine.high %v4689_v0, %v4689_v0  ;;  %v3506_v25 = vld [vmem:[%s4208_s24 + $0x948] sm:$0xff]  ;;  %v2418_v10 = vunpack.c.h.s8.bf16 %v3503_v33  ;;  %v3505_v49 = vld [vmem:[%s4208_s24 + $0x940] sm:$0xff]  ;;  %v3516_v19 = vld [vmem:[%s4208_s24 + $0x998] sm:$0xff] }
 0x448   : > { %2713 = vmatpush1.bf16.msra.mxu0 %v2400_v23  ;;  %2835 = vmatprep.subr.bf16.mxu1 %v2403_v28  ;;  %v2408_v5 = vunpack.c.h.s8.bf16 %v3499_v61  ;;  %v2425_v13 = vunpack.c.l.s8.bf16 %v3510_v7  ;;  %v2415_v15 = vunpack.c.l.s8.bf16 %v3506_v25  ;;  %v2424_v16 = vunpack.c.l.s8.bf16 %v3509_v14  ;;  %v3512_v20 = vld [vmem:[%s4208_s24 + $0x978] sm:$0xff]  ;;  %v3515_v27 = vld [vmem:[%s4208_s24 + $0x990] sm:$0xff]  ;;  %v3522_v37 = vld [vmem:[%s4208_s24 + $0x9c8] sm:$0xff] }
 0x449   : > { %2714 = vmatprep.subr.bf16.mxu0 %v2407_v57  ;;  %2836 = vmatpush1.bf16.msra.mxu1 %v2402_v6  ;;  %v2414_v31 = vunpack.c.l.s8.bf16 %v3505_v49  ;;  %v2431_v17 = vunpack.c.h.s8.bf16 %v3510_v7  ;;  %v2421_v18 = vunpack.c.h.s8.bf16 %v3506_v25  ;;  %v2430_v21 = vunpack.c.h.s8.bf16 %v3509_v14  ;;  %v3511_v51 = vld [vmem:[%s4208_s24 + $0x970] sm:$0xff]  ;;  %v3518_v40 = vld [vmem:[%s4208_s24 + $0x9a8] sm:$0xff]  ;;  %v3521_v43 = vld [vmem:[%s4208_s24 + $0x9c0] sm:$0xff] }
 0x44a   : > { %2744 = vmatprep.mubr.bf16.mxu0 %v4694_v9  ;;  %2837 = vmatprep.subr.bf16.mxu1 %v2409_v8  ;;  %v2420_v22 = vunpack.c.h.s8.bf16 %v3505_v49  ;;  %v2437_v24 = vunpack.c.l.s8.bf16 %v3516_v19  ;;  %v2427_v30 = vunpack.c.l.s8.bf16 %v3512_v20  ;;  %v2436_v32 = vunpack.c.l.s8.bf16 %v3515_v27  ;;  %v3517_v45 = vld [vmem:[%s4208_s24 + $0x9a0] sm:$0xff]  ;;  %v3528_v53 = vld [vmem:[%s4208_s24 + $0x9f8] sm:$0xff]  ;;  %v3527_v12 = vld [vmem:[%s4208_s24 + $0x9f0] sm:$0xff] }
 0x44b   : > { %2867 = vmatprep.mubr.bf16.mxu1 %v4694_v9  ;;  %v2426_v35 = vunpack.c.l.s8.bf16 %v3511_v51  ;;  %v2443_v36 = vunpack.c.h.s8.bf16 %v3516_v19  ;;  %v2433_v62 = vunpack.c.h.s8.bf16 %v3512_v20  ;;  %v2442_v38 = vunpack.c.h.s8.bf16 %v3515_v27  ;;  %v3524_v11 = vld [vmem:[%s4208_s24 + $0x9d8] sm:$0xff]  ;;  %v3523_v57 = vld [vmem:[%s4208_s24 + $0x9d0] sm:$0xff]  ;;  %v3534_v33 = vld [vmem:[%s4208_s24 + $0xa28] sm:$0xff] }
 0x44c   : > { %2715 = vmatpush1.bf16.msra.mxu0 %v2406_v58  ;;  %v2432_v41 = vunpack.c.h.s8.bf16 %v3511_v51  ;;  %v2449_v42 = vunpack.c.l.s8.bf16 %v3522_v37  ;;  %v2439_v44 = vunpack.c.l.s8.bf16 %v3518_v40  ;;  %v2448_v63 = vunpack.c.l.s8.bf16 %v3521_v43  ;;  %v3530_v60 = vld [vmem:[%s4208_s24 + $0xa08] sm:$0xff]  ;;  %v3533_v28 = vld [vmem:[%s4208_s24 + $0xa20] sm:$0xff]  ;;  %v3536_v14 = vld [vmem:[%s4208_s24 + $0xa38] sm:$0xff] }
 0x44d   : > { %2716 = vmatprep.subr.bf16.mxu0 %v2413_v59  ;;  %2838 = vmatpush1.bf16.msra.mxu1 %v2408_v5  ;;  %v2438_v46 = vunpack.c.l.s8.bf16 %v3517_v45  ;;  %v2455_v47 = vunpack.c.h.s8.bf16 %v3522_v37  ;;  %v2445_v48 = vunpack.c.h.s8.bf16 %v3518_v40  ;;  %v2454_v54 = vunpack.c.h.s8.bf16 %v3521_v43  ;;  %v3529_v7 = vld [vmem:[%s4208_s24 + $0xa00] sm:$0xff]  ;;  %v3542_v27 = vld [vmem:[%s4208_s24 + $0xa68] sm:$0xff]  ;;  %v4729_v40 = vld [vmem:[#allocation2 + $0x8] sm:$0xff] }
 0x44e   : > { %2839 = vmatprep.subr.bf16.mxu1 %v2415_v15  ;;  %v2444_v55 = vunpack.c.h.s8.bf16 %v3517_v45  ;;  %v2461_v50 = vunpack.c.l.s8.bf16 %v3528_v53  ;;  %v2451_v56 = vunpack.c.l.s8.bf16 %v3524_v11  ;;  %v2460_v23 = vunpack.c.l.s8.bf16 %v3527_v12  ;;  %v3548_v45 = vld [vmem:[%s4208_s24 + $0xa98] sm:$0xff] }
 0x44f   : > { %v2450_v34 = vunpack.c.l.s8.bf16 %v3523_v57  ;;  %v2467_v58 = vunpack.c.h.s8.bf16 %v3528_v53  ;;  %v2457_v59 = vunpack.c.h.s8.bf16 %v3524_v11  ;;  %v2466_v61 = vunpack.c.h.s8.bf16 %v3527_v12  ;;  %v3547_v11 = vld [vmem:[%s4208_s24 + $0xa90] sm:$0xff] }
 0x450   : > { %2717 = vmatpush1.bf16.msra.mxu0 %v2412_v3  ;;  %v2456_v3 = vunpack.c.h.s8.bf16 %v3523_v57  ;;  %v2463_v6 = vunpack.c.l.s8.bf16 %v3530_v60  ;;  %v2472_v8 = vunpack.c.l.s8.bf16 %v3533_v28  ;;  %v2462_v25 = vunpack.c.l.s8.bf16 %v3529_v7  ;;  %v3554_v57 = vld [vmem:[%s4208_s24 + $0xac8] sm:$0xff] }
 0x451   : > { %2718 = vmatprep.subr.bf16.mxu0 %v2419_v4  ;;  %2840 = vmatpush1.bf16.msra.mxu1 %v2414_v31  ;;  %v2473_v4 = vunpack.c.l.s8.bf16 %v3534_v33  ;;  %v2469_v5 = vunpack.c.h.s8.bf16 %v3530_v60  ;;  %v2478_v15 = vunpack.c.h.s8.bf16 %v3533_v28  ;;  %v2468_v49 = vunpack.c.h.s8.bf16 %v3529_v7  ;;  %v3539_v31 = vld [vmem:[%s4208_s24 + $0xa50] sm:$0xff]  ;;  %v3553_v60 = vld [vmem:[%s4208_s24 + $0xac0] sm:$0xff]  ;;  %v3560_v7 = vld [vmem:[%s4208_s24 + $0xaf8] sm:$0xff] }
 0x452   : > { %2841 = vmatprep.subr.bf16.mxu1 %v2421_v18  ;;  %v3535_v18 = vld [vmem:[%s4208_s24 + $0xa30] sm:$0xff]  ;;  %v2484_v19 = vunpack.c.l.s8.bf16 %v3539_v31  ;;  %v4727_v37 = vcombine.low %v4689_v0, %v4689_v0  ;;  %v2493_v43 = vunpack.c.h.s8.bf16 %v3542_v27  ;;  %v2499_v53 = vunpack.c.l.s8.bf16 %v3548_v45 }
 0x453   : > { %v2474_v20 = vunpack.c.l.s8.bf16 %v3535_v18  ;;  %v2480_v51 = vunpack.c.h.s8.bf16 %v3535_v18  ;;  %v2505_v12 = vunpack.c.h.s8.bf16 %v3548_v45  ;;  %v2517_v28 = vunpack.c.h.s8.bf16 %v3554_v57  ;;  %v3566_v18 = vld [vmem:[%s4208_s24 + $0xb28] sm:$0xff]  ;;  %v3571_v45 = vld [vmem:[%s4208_s24 + $0xb50] sm:$0xff] }
 0x454   : > { %2719 = vmatpush1.bf16.msra.mxu0 %v2418_v10  ;;  %v2479_v10 = vunpack.c.h.s8.bf16 %v3534_v33  ;;  %v2511_v33 = vunpack.c.l.s8.bf16 %v3554_v57  ;;  %v3577_v57 = vld [vmem:[%s4208_s24 + $0xb80] sm:$0xff] }
 0x455   : > { %2720 = vmatprep.subr.bf16.mxu0 %v2425_v13  ;;  %2842 = vmatpush1.bf16.msra.mxu1 %v2420_v22  ;;  %v3540_v13 = vld [vmem:[%s4208_s24 + $0xa58] sm:$0xff]  ;;  %v2481_v22 = vunpack.c.h.s8.bf16 %v3536_v14 }
 0x456   : > { %2843 = vmatprep.subr.bf16.mxu1 %v2427_v30  ;;  %v2490_v30 = vunpack.c.h.s8.bf16 %v3539_v31  ;;  %v2529_v31 = vunpack.c.h.s8.bf16 %v3560_v7 }
 0x458   : > { %2721 = vmatpush1.bf16.msra.mxu0 %v2424_v16  ;;  %v2485_v16 = vunpack.c.l.s8.bf16 %v3540_v13 }
 0x459   : > { %2722 = vmatprep.subr.bf16.mxu0 %v2431_v17  ;;  %2844 = vmatpush1.bf16.msra.mxu1 %v2426_v35  ;;  %v2475_v17 = vunpack.c.l.s8.bf16 %v3536_v14  ;;  %v3545_v35 = vld [vmem:[%s4208_s24 + $0xa80] sm:$0xff]  ;;  %v3559_v14 = vld [vmem:[%s4208_s24 + $0xaf0] sm:$0xff] }
 0x45a   : > { %2845 = vmatprep.subr.bf16.mxu1 %v2433_v62  ;;  %v3541_v62 = vld [vmem:[%s4208_s24 + $0xa60] sm:$0xff]  ;;  %v2502_v0 = vunpack.c.h.s8.bf16 %v3545_v35 }
 0x45c   : > { %2723 = vmatpush1.bf16.msra.mxu0 %v2430_v21  ;;  %v2491_v21 = vunpack.c.h.s8.bf16 %v3540_v13  ;;  %v2523_v13 = vunpack.c.l.s8.bf16 %v3560_v7  ;;  %v3583_v7 = vld [vmem:[%s4208_s24 + $0xbb0] sm:$0xff] }
 0x45d   : > { %2724 = vmatprep.subr.bf16.mxu0 %v2437_v24  ;;  %2846 = vmatpush1.bf16.msra.mxu1 %v2432_v41  ;;  %v3546_v24 = vld [vmem:[%s4208_s24 + $0xa88] sm:$0xff]  ;;  %v2486_v41 = vunpack.c.l.s8.bf16 %v3541_v62 }
 0x45e   : > { %2847 = vmatprep.subr.bf16.mxu1 %v2439_v44  ;;  %v3552_v44 = vld [vmem:[%s4208_s24 + $0xab8] sm:$0xff] }
 0x460   : > { %2725 = vmatpush1.bf16.msra.mxu0 %v2436_v32  ;;  %v2497_v32 = vunpack.c.l.s8.bf16 %v3546_v24 }
 0x461   : > { %2726 = vmatprep.subr.bf16.mxu0 %v2443_v36  ;;  %2848 = vmatpush1.bf16.msra.mxu1 %v2438_v46  ;;  %v2487_v36 = vunpack.c.l.s8.bf16 %v3542_v27  ;;  %v2492_v46 = vunpack.c.h.s8.bf16 %v3541_v62  ;;  %v3565_v27 = vld [vmem:[%s4208_s24 + $0xb20] sm:$0xff]  ;;  %v3572_v62 = vld [vmem:[%s4208_s24 + $0xb58] sm:$0xff] }
 0x462   : > { %2849 = vmatprep.subr.bf16.mxu1 %v2445_v48  ;;  %v3551_v48 = vld [vmem:[%s4208_s24 + $0xab0] sm:$0xff] }
 0x464   : > { %2727 = vmatpush1.bf16.msra.mxu0 %v2442_v38  ;;  %v2496_v38 = vunpack.c.l.s8.bf16 %v3545_v35  ;;  %v2541_v35 = vunpack.c.h.s8.bf16 %v3566_v18 }
 0x465   : > { %2728 = vmatprep.subr.bf16.mxu0 %v2449_v42  ;;  %2850 = vmatpush1.bf16.msra.mxu1 %v2444_v55  ;;  %v2503_v42 = vunpack.c.h.s8.bf16 %v3546_v24  ;;  %v2498_v55 = vunpack.c.l.s8.bf16 %v3547_v11  ;;  %v2535_v24 = vunpack.c.l.s8.bf16 %v3566_v18  ;;  %v3589_v18 = vld [vmem:[%s4208_s24 + $0xbe0] sm:$0xff] }
 0x466   : > { %2851 = vmatprep.subr.bf16.mxu1 %v2451_v56  ;;  %v3558_v56 = vld [vmem:[%s4208_s24 + $0xae8] sm:$0xff] }
 0x468   : > { %2729 = vmatpush1.bf16.msra.mxu0 %v2448_v63  ;;  %v4735_v63 = vcombine.high %v4729_v40, %v4729_v40 }
 0x469   : > { %2730 = vmatprep.subr.bf16.mxu0 %v2455_v47  ;;  %2852 = vmatpush1.bf16.msra.mxu1 %v2450_v34  ;;  %v2509_v47 = vunpack.c.l.s8.bf16 %v3552_v44  ;;  %v2504_v34 = vunpack.c.h.s8.bf16 %v3547_v11  ;;  %v3578_v11 = vld [vmem:[%s4208_s24 + $0xb88] sm:$0xff] }
 0x46a   : > { %2853 = vmatprep.subr.bf16.mxu1 %v2457_v59  ;;  %v3557_v59 = vld [vmem:[%s4208_s24 + $0xae0] sm:$0xff] }
 0x46c   : > { %2731 = vmatpush1.bf16.msra.mxu0 %v2454_v54  ;;  %v2508_v54 = vunpack.c.l.s8.bf16 %v3551_v48 }
 0x46d   : > { %2732 = vmatprep.subr.bf16.mxu0 %v2461_v50  ;;  %2854 = vmatpush1.bf16.msra.mxu1 %v2456_v3  ;;  %v2515_v50 = vunpack.c.h.s8.bf16 %v3552_v44  ;;  %v2510_v3 = vunpack.c.l.s8.bf16 %v3553_v60  ;;  %v2547_v44 = vunpack.c.l.s8.bf16 %v3572_v62 }
 0x46e   : > { %2855 = vmatprep.subr.bf16.mxu1 %v2463_v6  ;;  %v3564_v6 = vld [vmem:[%s4208_s24 + $0xb18] sm:$0xff] }
 0x470   : > { %2733 = vmatpush1.bf16.msra.mxu0 %v2460_v23  ;;  %v2514_v23 = vunpack.c.h.s8.bf16 %v3551_v48  ;;  %v2553_v48 = vunpack.c.h.s8.bf16 %v3572_v62  ;;  %v3599_v62 = vld [vmem:[%s4208_s24 + $0xc30] sm:$0xff] }
 0x471   : > { %2734 = vmatprep.subr.bf16.mxu0 %v2467_v58  ;;  %2856 = vmatpush1.bf16.msra.mxu1 %v2462_v25  ;;  %v2521_v58 = vunpack.c.l.s8.bf16 %v3558_v56  ;;  %v2516_v25 = vunpack.c.h.s8.bf16 %v3553_v60  ;;  %v3584_v60 = vld [vmem:[%s4208_s24 + $0xbb8] sm:$0xff] }
 0x472   : > { %2857 = vmatprep.subr.bf16.mxu1 %v2469_v5  ;;  %v3563_v5 = vld [vmem:[%s4208_s24 + $0xb10] sm:$0xff] }
 0x474   : > { %2735 = vmatpush1.bf16.msra.mxu0 %v2466_v61  ;;  %v2520_v61 = vunpack.c.l.s8.bf16 %v3557_v59 }
 0x475   : > { %2736 = vmatprep.subr.bf16.mxu0 %v2473_v4  ;;  %2858 = vmatpush1.bf16.msra.mxu1 %v2468_v49  ;;  %v2527_v4 = vunpack.c.h.s8.bf16 %v3558_v56  ;;  %v2522_v49 = vunpack.c.l.s8.bf16 %v3559_v14  ;;  %v2559_v56 = vunpack.c.l.s8.bf16 %v3578_v11 }
 0x476   : > { %2859 = vmatprep.subr.bf16.mxu1 %v2475_v17  ;;  %v3570_v17 = vld [vmem:[%s4208_s24 + $0xb48] sm:$0xff] }
 0x478   : > { %2737 = vmatpush1.bf16.msra.mxu0 %v2472_v8  ;;  %v2526_v8 = vunpack.c.h.s8.bf16 %v3557_v59  ;;  %v2565_v59 = vunpack.c.h.s8.bf16 %v3578_v11  ;;  %v3605_v11 = vld [vmem:[%s4208_s24 + $0xc60] sm:$0xff] }
 0x479   : > { %2738 = vmatprep.subr.bf16.mxu0 %v2479_v10  ;;  %2860 = vmatpush1.bf16.msra.mxu1 %v2474_v20  ;;  %v2533_v10 = vunpack.c.l.s8.bf16 %v3564_v6  ;;  %v2528_v20 = vunpack.c.h.s8.bf16 %v3559_v14  ;;  %v3590_v14 = vld [vmem:[%s4208_s24 + $0xbe8] sm:$0xff] }
 0x47a   : > { %2861 = vmatprep.subr.bf16.mxu1 %v2481_v22  ;;  %v3569_v22 = vld [vmem:[%s4208_s24 + $0xb40] sm:$0xff] }
 0x47c   : > { %2739 = vmatpush1.bf16.msra.mxu0 %v2478_v15  ;;  %v2532_v15 = vunpack.c.l.s8.bf16 %v3563_v5 }
 0x47d   : > { %2740 = vmatprep.subr.bf16.mxu0 %v2485_v16  ;;  %2862 = vmatpush1.bf16.msra.mxu1 %v2480_v51  ;;  %v2539_v16 = vunpack.c.h.s8.bf16 %v3564_v6  ;;  %v2534_v51 = vunpack.c.l.s8.bf16 %v3565_v27  ;;  %v2571_v6 = vunpack.c.l.s8.bf16 %v3584_v60 }
 0x47e   : > { %2863 = vmatprep.subr.bf16.mxu1 %v2487_v36  ;;  %v3576_v36 = vld [vmem:[%s4208_s24 + $0xb78] sm:$0xff] }
 0x480   : > { %2741 = vmatpush1.bf16.msra.mxu0 %v2484_v19  ;;  %v2538_v19 = vunpack.c.h.s8.bf16 %v3563_v5  ;;  %v2577_v5 = vunpack.c.h.s8.bf16 %v3584_v60  ;;  %v3611_v60 = vld [vmem:[%s4208_s24 + $0xc90] sm:$0xff] }
 0x481   : > { %2742 = vmatprep.subr.bf16.mxu0 %v2491_v21  ;;  %2864 = vmatpush1.bf16.msra.mxu1 %v2486_v41  ;;  %v2545_v21 = vunpack.c.l.s8.bf16 %v3570_v17  ;;  %v2540_v41 = vunpack.c.h.s8.bf16 %v3565_v27  ;;  %v2589_v27 = vunpack.c.h.s8.bf16 %v3590_v14 }
 0x482   : > { %2865 = vmatprep.subr.bf16.mxu1 %v2493_v43  ;;  %v3575_v43 = vld [vmem:[%s4208_s24 + $0xb70] sm:$0xff] }
 0x484   : > { %2743 = vmatpush1.bf16.msra.mxu0 %v2490_v30  ;;  %v2544_v30 = vunpack.c.l.s8.bf16 %v3569_v22 }
 0x485   : > { %2753 = vmatprep.subr.bf16.mxu0 %v2497_v32  ;;  %2866 = vmatpush1.bf16.msra.mxu1 %v2492_v46  ;;  %v2551_v32 = vunpack.c.h.s8.bf16 %v3570_v17  ;;  %v2546_v46 = vunpack.c.l.s8.bf16 %v3571_v45  ;;  %v2583_v17 = vunpack.c.l.s8.bf16 %v3590_v14  ;;  %v3617_v14 = vld [vmem:[%s4208_s24 + $0xcc0] sm:$0xff] }
 0x486   : > { %2876 = vmatprep.subr.bf16.mxu1 %v2499_v53  ;;  %v3582_v53 = vld [vmem:[%s4208_s24 + $0xba8] sm:$0xff] }
 0x487   : > { %2745 = vmatmul.mubr.bf16.vlgmr.msra.gmra.mrb[12].mxu0 %v4727_v37 }
 0x488   : > { %2754 = vmatpush1.bf16.msra.mxu0 %v2496_v38  ;;  %2785 = vmatprep.mubr.bf16.mxu0 %v4735_v63  ;;  %v2550_v38 = vunpack.c.h.s8.bf16 %v3569_v22  ;;  %v2582_v22 = vunpack.c.l.s8.bf16 %v3589_v18 }
 0x489   : > { %2755 = vmatprep.subr.bf16.mxu0 %v2503_v42  ;;  %2868 = vmatmul.mubr.bf16.vlgmr.msra.gmra.mrb[16].mxu1 %v4727_v37  ;;  %v2557_v42 = vunpack.c.l.s8.bf16 %v3576_v36 }
 0x48a   : > { %2877 = vmatpush1.bf16.msra.mxu1 %v2498_v55  ;;  %2908 = vmatprep.mubr.bf16.mxu1 %v4735_v63  ;;  %v2552_v55 = vunpack.c.h.s8.bf16 %v3571_v45 }
 0x48b   : > { %2878 = vmatprep.subr.bf16.mxu1 %v2505_v12  ;;  %v3581_v12 = vld [vmem:[%s4208_s24 + $0xba0] sm:$0xff] }
 0x48c   : > { %2756 = vmatpush1.bf16.msra.mxu0 %v2502_v0  ;;  %v2556_v0 = vunpack.c.l.s8.bf16 %v3575_v43 }
 0x48d   : > { %2757 = vmatprep.subr.bf16.mxu0 %v2509_v47  ;;  %v2563_v47 = vunpack.c.h.s8.bf16 %v3576_v36 }
 0x48e   : > { %2879 = vmatpush1.bf16.msra.mxu1 %v2504_v34  ;;  %v2558_v34 = vunpack.c.l.s8.bf16 %v3577_v57 }
 0x48f   : > { %2880 = vmatprep.subr.bf16.mxu1 %v2511_v33  ;;  %v3588_v33 = vld [vmem:[%s4208_s24 + $0xbd8] sm:$0xff] }
 0x490   : > { %2758 = vmatpush1.bf16.msra.mxu0 %v2508_v54  ;;  %v2562_v54 = vunpack.c.h.s8.bf16 %v3575_v43 }
 0x491   : > { %2759 = vmatprep.subr.bf16.mxu0 %v2515_v50  ;;  %v2569_v50 = vunpack.c.l.s8.bf16 %v3582_v53 }
 0x492   : > { %2881 = vmatpush1.bf16.msra.mxu1 %v2510_v3  ;;  %v2564_v3 = vunpack.c.h.s8.bf16 %v3577_v57 }
 0x493   : > { %2882 = vmatprep.subr.bf16.mxu1 %v2517_v28  ;;  %v3587_v28 = vld [vmem:[%s4208_s24 + $0xbd0] sm:$0xff] }
 0x494   : > { %2760 = vmatpush1.bf16.msra.mxu0 %v2514_v23  ;;  %v2568_v23 = vunpack.c.l.s8.bf16 %v3581_v12 }
 0x495   : > { %2761 = vmatprep.subr.bf16.mxu0 %v2521_v58  ;;  %v2575_v58 = vunpack.c.h.s8.bf16 %v3582_v53 }
 0x496   : > { %2883 = vmatpush1.bf16.msra.mxu1 %v2516_v25  ;;  %v2570_v25 = vunpack.c.l.s8.bf16 %v3583_v7 }
 0x497   : > { %2884 = vmatprep.subr.bf16.mxu1 %v2523_v13  ;;  %v3594_v13 = vld [vmem:[%s4208_s24 + $0xc08] sm:$0xff] }
 0x498   : > { %2762 = vmatpush1.bf16.msra.mxu0 %v2520_v61  ;;  %v2574_v61 = vunpack.c.h.s8.bf16 %v3581_v12 }
 0x499   : > { %2763 = vmatprep.subr.bf16.mxu0 %v2527_v4  ;;  %v2581_v4 = vunpack.c.l.s8.bf16 %v3588_v33 }
 0x49a   : > { %2885 = vmatpush1.bf16.msra.mxu1 %v2522_v49  ;;  %v2576_v49 = vunpack.c.h.s8.bf16 %v3583_v7 }
 0x49b   : > { %2886 = vmatprep.subr.bf16.mxu1 %v2529_v31  ;;  %v3593_v31 = vld [vmem:[%s4208_s24 + $0xc00] sm:$0xff] }
 0x49c   : > { %2764 = vmatpush1.bf16.msra.mxu0 %v2526_v8  ;;  %v2580_v8 = vunpack.c.l.s8.bf16 %v3587_v28 }
 0x49d   : > { %2765 = vmatprep.subr.bf16.mxu0 %v2533_v10  ;;  %v2587_v10 = vunpack.c.h.s8.bf16 %v3588_v33 }
 0x49e   : > { %2887 = vmatpush1.bf16.msra.mxu1 %v2528_v20  ;;  %v4775_v20 = vld [vmem:[#allocation2 + $0x10] sm:$0xff] }
 0x49f   : > { %2888 = vmatprep.subr.bf16.mxu1 %v2535_v24  ;;  %v2599_v24 = vunpack.c.h.s8.bf16 %v3594_v13 }
 0x4a0   : > { %2766 = vmatpush1.bf16.msra.mxu0 %v2532_v15  ;;  %v2586_v15 = vunpack.c.h.s8.bf16 %v3587_v28 }
 0x4a1   : > { %2767 = vmatprep.subr.bf16.mxu0 %v2539_v16  ;;  %v2593_v16 = vunpack.c.l.s8.bf16 %v3594_v13 }
 0x4a2   : > { %2889 = vmatpush1.bf16.msra.mxu1 %v2534_v51  ;;  %v3596_v51 = vld [vmem:[%s4208_s24 + $0xc18] sm:$0xff] }
 0x4a3   : > { %2890 = vmatprep.subr.bf16.mxu1 %v2541_v35  ;;  %v2588_v35 = vunpack.c.h.s8.bf16 %v3589_v18  ;;  %v2601_v45 = vunpack.c.h.s8.bf16 %v3596_v51 }
 0x4a4   : > { %2768 = vmatpush1.bf16.msra.mxu0 %v2538_v19  ;;  %v4773_v19 = vcombine.low %v4729_v40, %v4729_v40  ;;  %v2598_v40 = vunpack.c.h.s8.bf16 %v3593_v31 }
 0x4a5   : > { %2769 = vmatprep.subr.bf16.mxu0 %v2545_v21  ;;  %v2592_v21 = vunpack.c.l.s8.bf16 %v3593_v31 }
 0x4a6   : > { %2891 = vmatpush1.bf16.msra.mxu1 %v2540_v41  ;;  %v3595_v41 = vld [vmem:[%s4208_s24 + $0xc10] sm:$0xff] }
 0x4a7   : > { %2892 = vmatprep.subr.bf16.mxu1 %v2547_v44  ;;  %v2594_v43 = vunpack.c.l.s8.bf16 %v3595_v41 }
 0x4a8   : > { %2770 = vmatpush1.bf16.msra.mxu0 %v2544_v30  ;;  %v3600_v30 = vld [vmem:[%s4208_s24 + $0xc38] sm:$0xff] }
 0x4a9   : > { %2771 = vmatprep.subr.bf16.mxu0 %v2551_v32  ;;  %v4781_v32 = vcombine.high %v4775_v20, %v4775_v20  ;;  %v2605_v36 = vunpack.c.l.s8.bf16 %v3600_v30  ;;  %v2611_v44 = vunpack.c.h.s8.bf16 %v3600_v30 }
 0x4aa   : > { %2893 = vmatpush1.bf16.msra.mxu1 %v2546_v46  ;;  %v3602_v46 = vld [vmem:[%s4208_s24 + $0xc48] sm:$0xff] }
 0x4ab   : > { %2894 = vmatprep.subr.bf16.mxu1 %v2553_v48  ;;  %v2600_v48 = vunpack.c.h.s8.bf16 %v3595_v41  ;;  %v2613_v57 = vunpack.c.h.s8.bf16 %v3602_v46 }
 0x4ac   : > { %2772 = vmatpush1.bf16.msra.mxu0 %v2550_v38  ;;  %v2595_v38 = vunpack.c.l.s8.bf16 %v3596_v51  ;;  %v3623_v51 = vld [vmem:[%s4208_s24 + $0xcf0] sm:$0xff] }
 0x4ad   : > { %2773 = vmatprep.subr.bf16.mxu0 %v2557_v42  ;;  %v2604_v42 = vunpack.c.l.s8.bf16 %v3599_v62 }
 0x4ae   : > { %2895 = vmatpush1.bf16.msra.mxu1 %v2552_v55  ;;  %v3601_v55 = vld [vmem:[%s4208_s24 + $0xc40] sm:$0xff] }
 0x4af   : > { %2896 = vmatprep.subr.bf16.mxu1 %v2559_v56  ;;  %v2606_v12 = vunpack.c.l.s8.bf16 %v3601_v55 }
 0x4b0   : > { %2774 = vmatpush1.bf16.msra.mxu0 %v2556_v0  ;;  %v3606_v0 = vld [vmem:[%s4208_s24 + $0xc68] sm:$0xff] }
 0x4b1   : > { %2775 = vmatprep.subr.bf16.mxu0 %v2563_v47  ;;  %v2610_v47 = vunpack.c.h.s8.bf16 %v3599_v62  ;;  %v2617_v53 = vunpack.c.l.s8.bf16 %v3606_v0  ;;  %v2623_v56 = vunpack.c.h.s8.bf16 %v3606_v0 }
 0x4b2   : > { %2897 = vmatpush1.bf16.msra.mxu1 %v2558_v34  ;;  %v3608_v34 = vld [vmem:[%s4208_s24 + $0xc78] sm:$0xff] }
 0x4b3   : > { %2898 = vmatprep.subr.bf16.mxu1 %v2565_v59  ;;  %v2612_v59 = vunpack.c.h.s8.bf16 %v3601_v55  ;;  %v2625_v7 = vunpack.c.h.s8.bf16 %v3608_v34 }
 0x4b4   : > { %2776 = vmatpush1.bf16.msra.mxu0 %v2562_v54  ;;  %v2607_v54 = vunpack.c.l.s8.bf16 %v3602_v46  ;;  %v3629_v46 = vld [vmem:[%s4208_s24 + $0xd20] sm:$0xff] }
 0x4b5   : > { %2777 = vmatprep.subr.bf16.mxu0 %v2569_v50  ;;  %v2616_v50 = vunpack.c.l.s8.bf16 %v3605_v11 }
 0x4b6   : > { %2899 = vmatpush1.bf16.msra.mxu1 %v2564_v3  ;;  %v3607_v3 = vld [vmem:[%s4208_s24 + $0xc70] sm:$0xff] }
 0x4b7   : > { %2900 = vmatprep.subr.bf16.mxu1 %v2571_v6  ;;  %v2618_v28 = vunpack.c.l.s8.bf16 %v3607_v3 }
 0x4b8   : > { %2778 = vmatpush1.bf16.msra.mxu0 %v2568_v23  ;;  %v3612_v23 = vld [vmem:[%s4208_s24 + $0xc98] sm:$0xff] }
 0x4b9   : > { %2779 = vmatprep.subr.bf16.mxu0 %v2575_v58  ;;  %v2622_v58 = vunpack.c.h.s8.bf16 %v3605_v11  ;;  %v2629_v33 = vunpack.c.l.s8.bf16 %v3612_v23  ;;  %v2635_v6 = vunpack.c.h.s8.bf16 %v3612_v23 }
 0x4ba   : > { %2901 = vmatpush1.bf16.msra.mxu1 %v2570_v25  ;;  %v3614_v25 = vld [vmem:[%s4208_s24 + $0xca8] sm:$0xff] }
 0x4bb   : > { %2902 = vmatprep.subr.bf16.mxu1 %v2577_v5  ;;  %v2624_v5 = vunpack.c.h.s8.bf16 %v3607_v3  ;;  %v2637_v18 = vunpack.c.h.s8.bf16 %v3614_v25 }
 0x4bc   : > { %2780 = vmatpush1.bf16.msra.mxu0 %v2574_v61  ;;  %v2619_v61 = vunpack.c.l.s8.bf16 %v3608_v34  ;;  %v3635_v34 = vld [vmem:[%s4208_s24 + $0xd50] sm:$0xff] }
 0x4bd   : > { %2781 = vmatprep.subr.bf16.mxu0 %v2581_v4  ;;  %v2628_v4 = vunpack.c.l.s8.bf16 %v3611_v60 }
 0x4be   : > { %2903 = vmatpush1.bf16.msra.mxu1 %v2576_v49  ;;  %v3613_v49 = vld [vmem:[%s4208_s24 + $0xca0] sm:$0xff] }
 0x4bf   : > { %2904 = vmatprep.subr.bf16.mxu1 %v2583_v17  ;;  %v2630_v31 = vunpack.c.l.s8.bf16 %v3613_v49 }
 0x4c0   : > { %2782 = vmatpush1.bf16.msra.mxu0 %v2580_v8  ;;  %v3618_v8 = vld [vmem:[%s4208_s24 + $0xcc8] sm:$0xff] }
 0x4c1   : > { %2783 = vmatprep.subr.bf16.mxu0 %v2587_v10  ;;  %v2634_v10 = vunpack.c.h.s8.bf16 %v3611_v60  ;;  %v2641_v13 = vunpack.c.l.s8.bf16 %v3618_v8  ;;  %v2647_v17 = vunpack.c.h.s8.bf16 %v3618_v8 }
 0x4c2   : > { %2905 = vmatpush1.bf16.msra.mxu1 %v2582_v22  ;;  %v3620_v22 = vld [vmem:[%s4208_s24 + $0xcd8] sm:$0xff] }
 0x4c3   : > { %2906 = vmatprep.subr.bf16.mxu1 %v2589_v27  ;;  %v2636_v27 = vunpack.c.h.s8.bf16 %v3613_v49  ;;  %v2649_v41 = vunpack.c.h.s8.bf16 %v3620_v22 }
 0x4c4   : > { %2784 = vmatpush1.bf16.msra.mxu0 %v2586_v15  ;;  %v2631_v15 = vunpack.c.l.s8.bf16 %v3614_v25  ;;  %v3501_v25 = vld [vmem:[%s4208_s24 + $0x920] sm:$0xff] }
 0x4c5   : > { %2794 = vmatprep.subr.bf16.mxu0 %v2593_v16  ;;  %v2640_v16 = vunpack.c.l.s8.bf16 %v3617_v14 }
 0x4c6   : > { %2907 = vmatpush1.bf16.msra.mxu1 %v2588_v35  ;;  %v3619_v35 = vld [vmem:[%s4208_s24 + $0xcd0] sm:$0xff] }
 0x4c7   : > { %2786 = vmatmul.mubr.bf16.vlgmr.msra.gmra.mrb[12].mxu0 %v4773_v19  ;;  %2917 = vmatprep.subr.bf16.mxu1 %v2595_v38  ;;  %v2642_v62 = vunpack.c.l.s8.bf16 %v3619_v35 }
 0x4c8   : > { %2795 = vmatpush1.bf16.msra.mxu0 %v2592_v21  ;;  %2826 = vmatprep.mubr.bf16.mxu0 %v4781_v32  ;;  %v3624_v21 = vld [vmem:[%s4208_s24 + $0xcf8] sm:$0xff] }
 0x4c9   : > { %2796 = vmatprep.subr.bf16.mxu0 %v2599_v24  ;;  %2909 = vmatmul.mubr.bf16.vlgmr.msra.gmra.mrb[16].mxu1 %v4773_v19  ;;  %v2646_v24 = vunpack.c.h.s8.bf16 %v3617_v14  ;;  %v2653_v30 = vunpack.c.l.s8.bf16 %v3624_v21  ;;  %v2659_v38 = vunpack.c.h.s8.bf16 %v3624_v21  ;;  %v2404_v14 = vunpack.c.l.s8.bf16 %v3501_v25  ;;  %v3507_v21 = vld [vmem:[%s4208_s24 + $0x950] sm:$0xff] }
 0x4ca   : > { %2918 = vmatpush1.bf16.msra.mxu1 %v2594_v43  ;;  %2949 = vmatprep.mubr.bf16.mxu1 %v4781_v32  ;;  %v3626_v43 = vld [vmem:[%s4208_s24 + $0xd08] sm:$0xff] }
 0x4cb   : > { %2919 = vmatprep.subr.bf16.mxu1 %v2601_v45  ;;  %v2648_v45 = vunpack.c.h.s8.bf16 %v3619_v35  ;;  %v2661_v55 = vunpack.c.h.s8.bf16 %v3626_v43 }
 0x4cc   : > { %2797 = vmatpush1.bf16.msra.mxu0 %v2598_v40  ;;  %v2643_v40 = vunpack.c.l.s8.bf16 %v3620_v22  ;;  %v2416_v22 = vunpack.c.l.s8.bf16 %v3507_v21 }
 0x4cd   : > { %2798 = vmatprep.subr.bf16.mxu0 %v2605_v36  ;;  %v2652_v36 = vunpack.c.l.s8.bf16 %v3623_v51 }
 0x4ce   : > { %2920 = vmatpush1.bf16.msra.mxu1 %v2600_v48  ;;  %v3625_v48 = vld [vmem:[%s4208_s24 + $0xd00] sm:$0xff] }
 0x4cf   : > { %2921 = vmatprep.subr.bf16.mxu1 %v2607_v54  ;;  %v2654_v11 = vunpack.c.l.s8.bf16 %v3625_v48 }
 0x4d0   : > { %2799 = vmatpush1.bf16.msra.mxu0 %v2604_v42  ;;  %v3630_v42 = vld [vmem:[%s4208_s24 + $0xd28] sm:$0xff] }
 0x4d1   : > { %2800 = vmatprep.subr.bf16.mxu0 %v2611_v44  ;;  %v2658_v44 = vunpack.c.h.s8.bf16 %v3623_v51  ;;  %v2665_v0 = vunpack.c.l.s8.bf16 %v3630_v42  ;;  %v2671_v54 = vunpack.c.h.s8.bf16 %v3630_v42 }
 0x4d2   : > { %2922 = vmatpush1.bf16.msra.mxu1 %v2606_v12  ;;  %v3632_v12 = vld [vmem:[%s4208_s24 + $0xd38] sm:$0xff] }
 0x4d3   : > { %2923 = vmatprep.subr.bf16.mxu1 %v2613_v57  ;;  %v2660_v57 = vunpack.c.h.s8.bf16 %v3625_v48  ;;  %v2673_v3 = vunpack.c.h.s8.bf16 %v3632_v12 }
 0x4d4   : > { %2801 = vmatpush1.bf16.msra.mxu0 %v2610_v47  ;;  %v2655_v47 = vunpack.c.l.s8.bf16 %v3626_v43 }
 0x4d5   : > { %2802 = vmatprep.subr.bf16.mxu0 %v2617_v53  ;;  %v2664_v53 = vunpack.c.l.s8.bf16 %v3629_v46 }
 0x4d6   : > { %2924 = vmatpush1.bf16.msra.mxu1 %v2612_v59  ;;  %v3631_v59 = vld [vmem:[%s4208_s24 + $0xd30] sm:$0xff] }
 0x4d7   : > { %2925 = vmatprep.subr.bf16.mxu1 %v2619_v61  ;;  %v2666_v60 = vunpack.c.l.s8.bf16 %v3631_v59 }
 0x4d8   : > { %2803 = vmatpush1.bf16.msra.mxu0 %v2616_v50  ;;  %v3636_v50 = vld [vmem:[%s4208_s24 + $0xd58] sm:$0xff] }
 0x4d9   : > { %2804 = vmatprep.subr.bf16.mxu0 %v2623_v56  ;;  %v2670_v56 = vunpack.c.h.s8.bf16 %v3629_v46  ;;  %v2677_v23 = vunpack.c.l.s8.bf16 %v3636_v50  ;;  %v2683_v61 = vunpack.c.h.s8.bf16 %v3636_v50  ;;  %v3525_v46 = vld [vmem:[%s4208_s24 + $0x9e0] sm:$0xff] }
 0x4da   : > { %2926 = vmatpush1.bf16.msra.mxu1 %v2618_v28  ;;  %v3638_v28 = vld [vmem:[%s4208_s24 + $0xd68] sm:$0xff] }
 0x4db   : > { %2927 = vmatprep.subr.bf16.mxu1 %v2625_v7  ;;  %v2672_v7 = vunpack.c.h.s8.bf16 %v3631_v59 }
 0x4dc   : > { %2805 = vmatpush1.bf16.msra.mxu0 %v2622_v58  ;;  %v2667_v58 = vunpack.c.l.s8.bf16 %v3632_v12 }
 0x4dd   : > { %2806 = vmatprep.subr.bf16.mxu0 %v2629_v33  ;;  %v2676_v33 = vunpack.c.l.s8.bf16 %v3635_v34 }
 0x4de   : > { %2928 = vmatpush1.bf16.msra.mxu1 %v2624_v5  ;;  %v3637_v5 = vld [vmem:[%s4208_s24 + $0xd60] sm:$0xff] }
 0x4df   : > { %2929 = vmatprep.subr.bf16.mxu1 %v2631_v15  ;;  %v2678_v15 = vunpack.c.l.s8.bf16 %v3637_v5 }
 0x4e0   : > { %2807 = vmatpush1.bf16.msra.mxu0 %v2628_v4  ;;  %v3502_v4 = vld [vmem:[%s4208_s24 + $0x928] sm:$0xff] }
 0x4e1   : > { %2808 = vmatprep.subr.bf16.mxu0 %v2635_v6  ;;  %v2682_v6 = vunpack.c.h.s8.bf16 %v3635_v34  ;;  %v2405_v8 = vunpack.c.l.s8.bf16 %v3502_v4  ;;  %v2411_v49 = vunpack.c.h.s8.bf16 %v3502_v4  ;;  %v3537_v34 = vld [vmem:[%s4208_s24 + $0xa40] sm:$0xff] }
 0x4e2   : > { %2930 = vmatpush1.bf16.msra.mxu1 %v2630_v31  ;;  %v3508_v31 = vld [vmem:[%s4208_s24 + $0x958] sm:$0xff] }
 0x4e3   : > { %2931 = vmatprep.subr.bf16.mxu1 %v2637_v18  ;;  %v2684_v18 = vunpack.c.h.s8.bf16 %v3637_v5 }
 0x4e4   : > { %2809 = vmatpush1.bf16.msra.mxu0 %v2634_v10  ;;  %v2679_v10 = vunpack.c.l.s8.bf16 %v3638_v28 }
 0x4e5   : > { %2810 = vmatprep.subr.bf16.mxu0 %v2641_v13  ;;  %v4819_v13 = vcombine.low %v4775_v20, %v4775_v20  ;;  %v2417_v20 = vunpack.c.l.s8.bf16 %v3508_v31 }
 0x4e6   : > { %2932 = vmatpush1.bf16.msra.mxu1 %v2636_v27  ;;  %v3514_v27 = vld [vmem:[%s4208_s24 + $0x988] sm:$0xff] }
 0x4e7   : > { %2933 = vmatprep.subr.bf16.mxu1 %v2643_v40  ;;  %v2429_v51 = vunpack.c.l.s8.bf16 %v3514_v27  ;;  %v3513_v40 = vld [vmem:[%s4208_s24 + $0x980] sm:$0xff] }
 0x4e8   : > { %2811 = vmatpush1.bf16.msra.mxu0 %v2640_v16  ;;  %v2685_v16 = vunpack.c.h.s8.bf16 %v3638_v28  ;;  %v2428_v35 = vunpack.c.l.s8.bf16 %v3513_v40 }
 0x4e9   : > { %2812 = vmatprep.subr.bf16.mxu0 %v2647_v17  ;;  %v2410_v17 = vunpack.c.h.s8.bf16 %v3501_v25  ;;  %v3549_v25 = vld [vmem:[%s4208_s24 + $0xaa0] sm:$0xff] }
 0x4ea   : > { %2934 = vmatpush1.bf16.msra.mxu1 %v2642_v62  ;;  %v2434_v62 = vunpack.c.h.s8.bf16 %v3513_v40 }
 0x4eb   : > { %2935 = vmatprep.subr.bf16.mxu1 %v2649_v41  ;;  %v3519_v41 = vld [vmem:[%s4208_s24 + $0x9b0] sm:$0xff] }
 0x4ec   : > { %2813 = vmatpush1.bf16.msra.mxu0 %v2646_v24  ;;  %v2423_v24 = vunpack.c.h.s8.bf16 %v3508_v31  ;;  %v2440_v42 = vunpack.c.l.s8.bf16 %v3519_v41 }
 0x4ed   : > { %2814 = vmatprep.subr.bf16.mxu0 %v2653_v30  ;;  %v2422_v30 = vunpack.c.h.s8.bf16 %v3507_v21 }
 0x4ee   : > { %2936 = vmatpush1.bf16.msra.mxu1 %v2648_v45  ;;  %v2446_v45 = vunpack.c.h.s8.bf16 %v3519_v41 }
 0x4ef   : > { %2937 = vmatprep.subr.bf16.mxu1 %v2655_v47  ;;  %v2452_v47 = vunpack.c.l.s8.bf16 %v3525_v46 }
 0x4f0   : > { %2815 = vmatpush1.bf16.msra.mxu0 %v2652_v36  ;;  %v3520_v36 = vld [vmem:[%s4208_s24 + $0x9b8] sm:$0xff] }
 0x4f1   : > { %2816 = vmatprep.subr.bf16.mxu0 %v2659_v38  ;;  %v2441_v38 = vunpack.c.l.s8.bf16 %v3520_v36  ;;  %v2447_v43 = vunpack.c.h.s8.bf16 %v3520_v36 }
 0x4f2   : > { %2938 = vmatpush1.bf16.msra.mxu1 %v2654_v11  ;;  %v2458_v11 = vunpack.c.h.s8.bf16 %v3525_v46 }
 0x4f3   : > { %2939 = vmatprep.subr.bf16.mxu1 %v2661_v55  ;;  %v3531_v55 = vld [vmem:[%s4208_s24 + $0xa10] sm:$0xff] }
 0x4f4   : > { %2817 = vmatpush1.bf16.msra.mxu0 %v2658_v44  ;;  %v3526_v44 = vld [vmem:[%s4208_s24 + $0x9e8] sm:$0xff]  ;;  %v2464_v50 = vunpack.c.l.s8.bf16 %v3531_v55 }
 0x4f5   : > { %2818 = vmatprep.subr.bf16.mxu0 %v2665_v0  ;;  %v2453_v0 = vunpack.c.l.s8.bf16 %v3526_v44  ;;  %v2459_v48 = vunpack.c.h.s8.bf16 %v3526_v44 }
 0x4f6   : > { %2940 = vmatpush1.bf16.msra.mxu1 %v2660_v57  ;;  %v2470_v57 = vunpack.c.h.s8.bf16 %v3531_v55 }
 0x4f7   : > { %2941 = vmatprep.subr.bf16.mxu1 %v2667_v58  ;;  %v2476_v58 = vunpack.c.l.s8.bf16 %v3537_v34 }
 0x4f8   : > { %2819 = vmatpush1.bf16.msra.mxu0 %v2664_v53  ;;  %v3532_v53 = vld [vmem:[%s4208_s24 + $0xa18] sm:$0xff] }
 0x4f9   : > { %2820 = vmatprep.subr.bf16.mxu0 %v2671_v54  ;;  %v2465_v54 = vunpack.c.l.s8.bf16 %v3532_v53  ;;  %v2471_v12 = vunpack.c.h.s8.bf16 %v3532_v53 }
 0x4fa   : > { %2942 = vmatpush1.bf16.msra.mxu1 %v2666_v60  ;;  %v2482_v60 = vunpack.c.h.s8.bf16 %v3537_v34 }
 0x4fb   : > { %2943 = vmatprep.subr.bf16.mxu1 %v2673_v3  ;;  %v3543_v3 = vld [vmem:[%s4208_s24 + $0xa70] sm:$0xff] }
 0x4fc   : > { %2821 = vmatpush1.bf16.msra.mxu0 %v2670_v56  ;;  %v3538_v56 = vld [vmem:[%s4208_s24 + $0xa48] sm:$0xff]  ;;  %v2488_v4 = vunpack.c.l.s8.bf16 %v3543_v3 }
 0x4fd   : > { %2822 = vmatprep.subr.bf16.mxu0 %v2677_v23  ;;  %v2477_v23 = vunpack.c.l.s8.bf16 %v3538_v56  ;;  %v2483_v59 = vunpack.c.h.s8.bf16 %v3538_v56 }
 0x4fe   : > { %2944 = vmatpush1.bf16.msra.mxu1 %v2672_v7  ;;  %v2494_v7 = vunpack.c.h.s8.bf16 %v3543_v3 }
 0x4ff   : > { %2945 = vmatprep.subr.bf16.mxu1 %v2679_v10  ;;  %v2500_v10 = vunpack.c.l.s8.bf16 %v3549_v25 }
 0x500   : > { %2823 = vmatpush1.bf16.msra.mxu0 %v2676_v33  ;;  %v3544_v33 = vld [vmem:[%s4208_s24 + $0xa78] sm:$0xff] }
 0x501   : > { %2824 = vmatprep.subr.bf16.mxu0 %v2683_v61  ;;  %v2489_v61 = vunpack.c.l.s8.bf16 %v3544_v33  ;;  %v2495_v28 = vunpack.c.h.s8.bf16 %v3544_v33 }
 0x502   : > { %2946 = vmatpush1.bf16.msra.mxu1 %v2678_v15  ;;  %v2506_v15 = vunpack.c.h.s8.bf16 %v3549_v25 }
 0x503   : > { %2947 = vmatprep.subr.bf16.mxu1 %v2685_v16  ;;  %v3555_v16 = vld [vmem:[%s4208_s24 + $0xad0] sm:$0xff] }
 0x504   : > { %2825 = vmatpush1.bf16.msra.mxu0 %v2682_v6  ;;  %v3550_v6 = vld [vmem:[%s4208_s24 + $0xaa8] sm:$0xff]  ;;  %v2512_v31 = vunpack.c.l.s8.bf16 %v3555_v16 }
 0x505   : > { %2958 = vmatprep.subr.bf16.mxu0 %v2405_v8  ;;  %v2501_v8 = vunpack.c.l.s8.bf16 %v3550_v6  ;;  %v2507_v5 = vunpack.c.h.s8.bf16 %v3550_v6 }
 0x506   : > { %2948 = vmatpush1.bf16.msra.mxu1 %v2684_v18  ;;  %v3562_v18 = vld [vmem:[%s4208_s24 + $0xb08] sm:$0xff] }
 0x507   : > { %2827 = vmatmul.mubr.bf16.vlgmr.msra.gmra.mrb[12].mxu0 %v4819_v13  ;;  %v2525_v21 = vunpack.c.l.s8.bf16 %v3562_v18 }
 0x508   : > { %2959 = vmatpush1.bf16.msra.mxu0 %v2404_v14  ;;  %2990 = vmatprep.mubr.bf16.mxu0 %v4694_v9  ;;  %v2435_v9 = vunpack.c.h.s8.bf16 %v3514_v27  ;;  %v3556_v14 = vld [vmem:[%s4208_s24 + $0xad8] sm:$0xff] }
 0x509   : > { %2960 = vmatprep.subr.bf16.mxu0 %v2411_v49  ;;  %2950 = vmatmul.mubr.bf16.vlgmr.msra.gmra.mrb[16].mxu1 %v4819_v13  ;;  %v2513_v49 = vunpack.c.l.s8.bf16 %v3556_v14 }
 0x50c   : > { %2961 = vmatpush1.bf16.msra.mxu0 %v2410_v17  ;;  %v2519_v17 = vunpack.c.h.s8.bf16 %v3556_v14 }
 0x50d   : > { %2962 = vmatprep.subr.bf16.mxu0 %v2417_v20  ;;  %v2518_v20 = vunpack.c.h.s8.bf16 %v3555_v16  ;;  %v3616_v16 = vld [vmem:[%s4208_s24 + $0xcb8] sm:$0xff] }
 0x510   : > { %2963 = vmatpush1.bf16.msra.mxu0 %v2416_v22 }
 0x511   : > { %2964 = vmatprep.subr.bf16.mxu0 %v2423_v24  ;;  %v3568_v24 = vld [vmem:[%s4208_s24 + $0xb38] sm:$0xff] }
 0x514   : > { %2965 = vmatpush1.bf16.msra.mxu0 %v2422_v30  ;;  %v2537_v30 = vunpack.c.l.s8.bf16 %v3568_v24 }
 0x515   : > { %2966 = vmatprep.subr.bf16.mxu0 %v2429_v51  ;;  %v3567_v51 = vld [vmem:[%s4208_s24 + $0xb30] sm:$0xff] }
 0x516   : > { %v2536_v40 = vunpack.c.l.s8.bf16 %v3567_v51  ;;  %v2542_v36 = vunpack.c.h.s8.bf16 %v3567_v51  ;;  %v3628_v51 = vld [vmem:[%s4208_s24 + $0xd18] sm:$0xff] }
 0x518   : > { %2967 = vmatpush1.bf16.msra.mxu0 %v2428_v35  ;;  %v2543_v35 = vunpack.c.h.s8.bf16 %v3568_v24  ;;  %v3621_v24 = vld [vmem:[%s4208_s24 + $0xce0] sm:$0xff] }
 0x519   : > { %2968 = vmatprep.subr.bf16.mxu0 %v2435_v9  ;;  %v3574_v9 = vld [vmem:[%s4208_s24 + $0xb68] sm:$0xff] }
 0x51c   : > { %2969 = vmatpush1.bf16.msra.mxu0 %v2434_v62  ;;  %v2549_v62 = vunpack.c.l.s8.bf16 %v3574_v9 }
 0x51d   : > { %2970 = vmatprep.subr.bf16.mxu0 %v2441_v38  ;;  %v3573_v38 = vld [vmem:[%s4208_s24 + $0xb60] sm:$0xff] }
 0x51e   : > { %v2548_v41 = vunpack.c.l.s8.bf16 %v3573_v38  ;;  %v2554_v44 = vunpack.c.h.s8.bf16 %v3573_v38  ;;  %v3634_v38 = vld [vmem:[%s4208_s24 + $0xd48] sm:$0xff] }
 0x520   : > { %2971 = vmatpush1.bf16.msra.mxu0 %v2440_v42  ;;  %v2555_v42 = vunpack.c.h.s8.bf16 %v3574_v9  ;;  %v3627_v9 = vld [vmem:[%s4208_s24 + $0xd10] sm:$0xff] }
 0x521   : > { %2972 = vmatprep.subr.bf16.mxu0 %v2447_v43  ;;  %v3580_v43 = vld [vmem:[%s4208_s24 + $0xb98] sm:$0xff] }
 0x524   : > { %2973 = vmatpush1.bf16.msra.mxu0 %v2446_v45  ;;  %v2561_v45 = vunpack.c.l.s8.bf16 %v3580_v43 }
 0x525   : > { %2974 = vmatprep.subr.bf16.mxu0 %v2453_v0  ;;  %v3579_v0 = vld [vmem:[%s4208_s24 + $0xb90] sm:$0xff] }
 0x526   : > { %v2560_v46 = vunpack.c.l.s8.bf16 %v3579_v0  ;;  %v2566_v53 = vunpack.c.h.s8.bf16 %v3579_v0  ;;  %v3640_v0 = vld [vmem:[%s4208_s24 + $0xd78] sm:$0xff] }
 0x528   : > { %2975 = vmatpush1.bf16.msra.mxu0 %v2452_v47  ;;  %v2567_v47 = vunpack.c.h.s8.bf16 %v3580_v43  ;;  %v3633_v43 = vld [vmem:[%s4208_s24 + $0xd40] sm:$0xff] }
 0x529   : > { %2976 = vmatprep.subr.bf16.mxu0 %v2459_v48  ;;  %v3586_v48 = vld [vmem:[%s4208_s24 + $0xbc8] sm:$0xff] }
 0x52c   : > { %2977 = vmatpush1.bf16.msra.mxu0 %v2458_v11  ;;  %v2573_v11 = vunpack.c.l.s8.bf16 %v3586_v48 }
 0x52d   : > { %2978 = vmatprep.subr.bf16.mxu0 %v2465_v54  ;;  %v3585_v54 = vld [vmem:[%s4208_s24 + $0xbc0] sm:$0xff] }
 0x52e   : > { %v2572_v55 = vunpack.c.l.s8.bf16 %v3585_v54  ;;  %v2578_v56 = vunpack.c.h.s8.bf16 %v3585_v54 }
 0x530   : > { %2979 = vmatpush1.bf16.msra.mxu0 %v2464_v50  ;;  %v2579_v50 = vunpack.c.h.s8.bf16 %v3586_v48  ;;  %v3639_v48 = vld [vmem:[%s4208_s24 + $0xd70] sm:$0xff] }
 0x531   : > { %2980 = vmatprep.subr.bf16.mxu0 %v2471_v12  ;;  %v3592_v12 = vld [vmem:[%s4208_s24 + $0xbf8] sm:$0xff]  ;;  %v2686_v54 = vunpack.c.h.s8.bf16 %v3639_v48 }
 0x534   : > { %2981 = vmatpush1.bf16.msra.mxu0 %v2470_v57  ;;  %v2585_v57 = vunpack.c.l.s8.bf16 %v3592_v12 }
 0x535   : > { %2982 = vmatprep.subr.bf16.mxu0 %v2477_v23  ;;  %v3591_v23 = vld [vmem:[%s4208_s24 + $0xbf0] sm:$0xff] }
 0x536   : > { %v2584_v34 = vunpack.c.l.s8.bf16 %v3591_v23  ;;  %v2590_v33 = vunpack.c.h.s8.bf16 %v3591_v23 }
 0x538   : > { %2983 = vmatpush1.bf16.msra.mxu0 %v2476_v58  ;;  %v2591_v58 = vunpack.c.h.s8.bf16 %v3592_v12 }
 0x539   : > { %2984 = vmatprep.subr.bf16.mxu0 %v2483_v59  ;;  %v3598_v59 = vld [vmem:[%s4208_s24 + $0xc28] sm:$0xff] }
 0x53c   : > { %2985 = vmatpush1.bf16.msra.mxu0 %v2482_v60  ;;  %v2597_v60 = vunpack.c.l.s8.bf16 %v3598_v59 }
 0x53d   : > { %2986 = vmatprep.subr.bf16.mxu0 %v2489_v61  ;;  %v3597_v61 = vld [vmem:[%s4208_s24 + $0xc20] sm:$0xff] }
 0x53e   : > { %v2596_v3 = vunpack.c.l.s8.bf16 %v3597_v61  ;;  %v2602_v6 = vunpack.c.h.s8.bf16 %v3597_v61 }
 0x540   : > { %2987 = vmatpush1.bf16.msra.mxu0 %v2488_v4  ;;  %v2603_v4 = vunpack.c.h.s8.bf16 %v3598_v59 }
 0x541   : > { %2988 = vmatprep.subr.bf16.mxu0 %v2495_v28  ;;  %v3604_v28 = vld [vmem:[%s4208_s24 + $0xc58] sm:$0xff] }
 0x544   : > { %2989 = vmatpush1.bf16.msra.mxu0 %v2494_v7  ;;  %v2609_v7 = vunpack.c.l.s8.bf16 %v3604_v28 }
 0x545   : > { %2999 = vmatprep.subr.bf16.mxu0 %v2501_v8  ;;  %v3603_v8 = vld [vmem:[%s4208_s24 + $0xc50] sm:$0xff] }
 0x546   : > { %v2608_v25 = vunpack.c.l.s8.bf16 %v3603_v8  ;;  %v2614_v14 = vunpack.c.h.s8.bf16 %v3603_v8 }
 0x547   : > { %2991 = vmatmul.mubr.bf16.vlgmr.msra.gmra.mrb[16].mxu0 %v4727_v37  ;;  %v3561_v37 = vld [vmem:[%s4208_s24 + $0xb00] sm:$0xff] }
 0x548   : > { %3000 = vmatpush1.bf16.msra.mxu0 %v2500_v10  ;;  %3031 = vmatprep.mubr.bf16.mxu0 %v4735_v63  ;;  %v2524_v22 = vunpack.c.l.s8.bf16 %v3561_v37  ;;  %v2531_v63 = vunpack.c.h.s8.bf16 %v3562_v18  ;;  %v2530_v27 = vunpack.c.h.s8.bf16 %v3561_v37  ;;  %v2615_v10 = vunpack.c.h.s8.bf16 %v3604_v28  ;;  %v3615_v18 = vld [vmem:[%s4208_s24 + $0xcb0] sm:$0xff]  ;;  %v3622_v37 = vld [vmem:[%s4208_s24 + $0xce8] sm:$0xff] }
 0x549   : > { %3001 = vmatprep.subr.bf16.mxu0 %v2507_v5  ;;  %v3610_v5 = vld [vmem:[%s4208_s24 + $0xc88] sm:$0xff] }
 0x54c   : > { %3002 = vmatpush1.bf16.msra.mxu0 %v2506_v15  ;;  %v2621_v15 = vunpack.c.l.s8.bf16 %v3610_v5 }
 0x54d   : > { %3003 = vmatprep.subr.bf16.mxu0 %v2513_v49 }
 0x550   : > { %3004 = vmatpush1.bf16.msra.mxu0 %v2512_v31 }
 0x551   : > { %3005 = vmatprep.subr.bf16.mxu0 %v2519_v17  ;;  %v2633_v17 = vunpack.c.l.s8.bf16 %v3616_v16 }
 0x554   : > { %3006 = vmatpush1.bf16.msra.mxu0 %v2518_v20  ;;  %v2632_v20 = vunpack.c.l.s8.bf16 %v3615_v18 }
 0x555   : > { %3007 = vmatprep.subr.bf16.mxu0 %v2525_v21  ;;  %v2639_v21 = vunpack.c.h.s8.bf16 %v3616_v16 }
 0x558   : > { %3008 = vmatpush1.bf16.msra.mxu0 %v2524_v22  ;;  %v2638_v22 = vunpack.c.h.s8.bf16 %v3615_v18 }
 0x559   : > { %3009 = vmatprep.subr.bf16.mxu0 %v2531_v63  ;;  %v2645_v63 = vunpack.c.l.s8.bf16 %v3622_v37 }
 0x55c   : > { %3010 = vmatpush1.bf16.msra.mxu0 %v2530_v27  ;;  %v2644_v27 = vunpack.c.l.s8.bf16 %v3621_v24 }
 0x55d   : > { %3011 = vmatprep.subr.bf16.mxu0 %v2537_v30  ;;  %v2651_v30 = vunpack.c.h.s8.bf16 %v3622_v37 }
 0x560   : > { %3012 = vmatpush1.bf16.msra.mxu0 %v2536_v40  ;;  %v2650_v40 = vunpack.c.h.s8.bf16 %v3621_v24 }
 0x561   : > { %3013 = vmatprep.subr.bf16.mxu0 %v2543_v35  ;;  %v2657_v35 = vunpack.c.l.s8.bf16 %v3628_v51 }
 0x564   : > { %3014 = vmatpush1.bf16.msra.mxu0 %v2542_v36  ;;  %v2656_v36 = vunpack.c.l.s8.bf16 %v3627_v9 }
 0x565   : > { %3015 = vmatprep.subr.bf16.mxu0 %v2549_v62  ;;  %v2663_v62 = vunpack.c.h.s8.bf16 %v3628_v51 }
 0x568   : > { %3016 = vmatpush1.bf16.msra.mxu0 %v2548_v41  ;;  %v2662_v41 = vunpack.c.h.s8.bf16 %v3627_v9 }
 0x569   : > { %3017 = vmatprep.subr.bf16.mxu0 %v2555_v42  ;;  %v2669_v42 = vunpack.c.l.s8.bf16 %v3634_v38 }
 0x56c   : > { %3018 = vmatpush1.bf16.msra.mxu0 %v2554_v44  ;;  %v2668_v44 = vunpack.c.l.s8.bf16 %v3633_v43 }
 0x56d   : > { %3019 = vmatprep.subr.bf16.mxu0 %v2561_v45  ;;  %v2675_v45 = vunpack.c.h.s8.bf16 %v3634_v38 }
 0x570   : > { %3020 = vmatpush1.bf16.msra.mxu0 %v2560_v46  ;;  %v2674_v46 = vunpack.c.h.s8.bf16 %v3633_v43 }
 0x571   : > { %3021 = vmatprep.subr.bf16.mxu0 %v2567_v47  ;;  %v2681_v47 = vunpack.c.l.s8.bf16 %v3640_v0 }
 0x574   : > { %3022 = vmatpush1.bf16.msra.mxu0 %v2566_v53  ;;  %v2680_v53 = vunpack.c.l.s8.bf16 %v3639_v48 }
 0x575   : > { %3023 = vmatprep.subr.bf16.mxu0 %v2573_v11  ;;  %v2687_v11 = vunpack.c.h.s8.bf16 %v3640_v0 }
 0x578   : > { %3024 = vmatpush1.bf16.msra.mxu0 %v2572_v55  ;;  %v3647_v55 = vld [vmem:[%s4215_s27 + $0xc] sm:$0x3f] }
 0x579   : > { %3025 = vmatprep.subr.bf16.mxu0 %v2579_v50  ;;  %v3648_v50 = vld [vmem:[%s4221_s28 + $0xc] sm:$0x3f]  ;;  %v3087_v12 = vrot.slane %v3647_v55, %v4458_v26  ;;  %v3099_v28 = vrot.slane %v3647_v55, %v4538_v2 }
 0x57c   : > { %3026 = vmatpush1.bf16.msra.mxu0 %v2578_v56  ;;  %v3091_v56 = vrot.slane %v3647_v55, %v4464_v29 }
 0x57d   : > { %3027 = vmatprep.subr.bf16.mxu0 %v2585_v57  ;;  %v3126_v57 = vrot.slane %v3648_v50, %v4458_v26 }
 0x580   : > { %3028 = vmatpush1.bf16.msra.mxu0 %v2584_v34  ;;  %v3130_v34 = vrot.slane %v3648_v50, %v4464_v29 }
 0x581   : > { %3029 = vmatprep.subr.bf16.mxu0 %v2591_v58 }
 0x584   : > { %3030 = vmatpush1.bf16.msra.mxu0 %v2590_v33 }
 0x585   : > { %3040 = vmatprep.subr.bf16.mxu0 %v2597_v60 }
 0x587   : > { %3032 = vmatmul.mubr.bf16.vlgmr.msra.gmra.mrb[16].mxu0 %v4773_v19  ;;  %v3609_v19 = vld [vmem:[%s4208_s24 + $0xc80] sm:$0xff] }
 0x588   : > { %3041 = vmatpush1.bf16.msra.mxu0 %v2596_v3  ;;  %3072 = vmatprep.mubr.bf16.mxu0 %v4781_v32  ;;  %v2620_v49 = vunpack.c.l.s8.bf16 %v3609_v19  ;;  %v2627_v32 = vunpack.c.h.s8.bf16 %v3610_v5  ;;  %v2626_v31 = vunpack.c.h.s8.bf16 %v3609_v19  ;;  %v3103_v19 = vrot.slane %v3647_v55, %v4584_v39 }
 0x589   : > { %3042 = vmatprep.subr.bf16.mxu0 %v2603_v4  ;;  %v3095_v4 = vrot.slane %v3647_v55, %v4535_v1 }
 0x58c   : > { %3043 = vmatpush1.bf16.msra.mxu0 %v2602_v6  ;;  %v3134_v6 = vrot.slane %v3648_v50, %v4535_v1  ;;  %v3142_v1 = vrot.slane %v3648_v50, %v4584_v39 }
 0x58d   : > { %3044 = vmatprep.subr.bf16.mxu0 %v2609_v7  ;;  %v3138_v7 = vrot.slane %v3648_v50, %v4538_v2  ;;  %v3146_v2 = vrot.slane %v3648_v50, %v4587_v52 }
 0x590   : > { %3045 = vmatpush1.bf16.msra.mxu0 %v2608_v25 }
 0x591   : > { %3046 = vmatprep.subr.bf16.mxu0 %v2615_v10 }
 0x594   : > { %3047 = vmatpush1.bf16.msra.mxu0 %v2614_v14 }
 0x595   : > { %3048 = vmatprep.subr.bf16.mxu0 %v2621_v15 }
 0x598   : > { %3049 = vmatpush1.bf16.msra.mxu0 %v2620_v49  ;;  %v3107_v49 = vrot.slane %v3647_v55, %v4587_v52 }
 0x599   : > { %3050 = vmatprep.subr.bf16.mxu0 %v2627_v32 }
 0x59c   : > { %3051 = vmatpush1.bf16.msra.mxu0 %v2626_v31 }
 0x59d   : > { %3052 = vmatprep.subr.bf16.mxu0 %v2633_v17 }
 0x5a0   : > { %3053 = vmatpush1.bf16.msra.mxu0 %v2632_v20 }
 0x5a1   : > { %3054 = vmatprep.subr.bf16.mxu0 %v2639_v21 }
 0x5a4   : > { %3055 = vmatpush1.bf16.msra.mxu0 %v2638_v22 }
 0x5a5   : > { %3056 = vmatprep.subr.bf16.mxu0 %v2645_v63 }
 0x5a8   : > { %3057 = vmatpush1.bf16.msra.mxu0 %v2644_v27 }
 0x5a9   : > { %3058 = vmatprep.subr.bf16.mxu0 %v2651_v30 }
 0x5ac   : > { %3059 = vmatpush1.bf16.msra.mxu0 %v2650_v40 }
 0x5ad   : > { %3060 = vmatprep.subr.bf16.mxu0 %v2657_v35 }
 0x5b0   : > { %3061 = vmatpush1.bf16.msra.mxu0 %v2656_v36 }
 0x5b1   : > { %3062 = vmatprep.subr.bf16.mxu0 %v2663_v62 }
 0x5b4   : > { %3063 = vmatpush1.bf16.msra.mxu0 %v2662_v41 }
 0x5b5   : > { %3064 = vmatprep.subr.bf16.mxu0 %v2669_v42 }
 0x5b8   : > { %3065 = vmatpush1.bf16.msra.mxu0 %v2668_v44 }
 0x5b9   : > { %3066 = vmatprep.subr.bf16.mxu0 %v2675_v45 }
 0x5bc   : > { %3067 = vmatpush1.bf16.msra.mxu0 %v2674_v46 }
 0x5bd   : > { %3068 = vmatprep.subr.bf16.mxu0 %v2681_v47 }
 0x5c0   : > { %3069 = vmatpush1.bf16.msra.mxu0 %v2680_v53 }
 0x5c1   : > { %3070 = vmatprep.subr.bf16.mxu0 %v2687_v11 }
 0x5c4   : > { %3071 = vmatpush1.bf16.msra.mxu0 %v2686_v54 }
 0x5c7   : > { %3073 = vmatmul.mubr.bf16.vlgmr.msra.gmra.mrb[16].mxu0 %v4819_v13 }
 0x5da   : > { %v2828_v23 = vpop.f32.mrb[12].mxu0 }
 0x5db   : > { %v3114_v58 = vmul.f32 %v3087_v12, %v2828_v23  ;;  %v2830_v59 = vpop.f32.mrb[13].mxu0 }
 0x5dc   : > { %v3115_v33 = vmul.f32 %v3091_v56, %v2830_v59  ;;  %v2832_v60 = vpop.f32.mrb[14].mxu0  ;;  %v2951_v26 = vpop.f32.mrb[16].mxu1 }
 0x5dd   : > { %v3153_v61 = vadd.f32 %v3126_v57, %v3114_v58  ;;  %v2833_v13 = vpop.f32.mrb[15].mxu0  ;;  %v3116_v29 = vmul.f32 %v3095_v4, %v2951_v26  ;;  %v2953_v8 = vpop.f32.mrb[17].mxu1 }
 0x5de   : > { %v3154_v3 = vadd.f32 %v3130_v34, %v3115_v33  ;;  %v3117_v25 = vmul.f32 %v3099_v28, %v2953_v8  ;;  %v2955_v10 = vpop.f32.mrb[18].mxu1 }
 0x5df   : > { %v3155_v5 = vadd.f32 %v3134_v6, %v3116_v29  ;;  %v2956_v14 = vpop.f32.mrb[19].mxu1  ;;  %v3164_v22 = vmax.f32 (!%p3160_p2), %v3153_v61, 0.0 }
 0x5e0   : > { %v3156_v15 = vadd.f32 %v3138_v7, %v3117_v25  ;;  %v3165_v63 = vmax.f32 (!%p3160_p2), %v3154_v3, 0.0 }
 0x5e1   : > { %v3166_v24 = vmax.f32 (!%p3160_p2), %v3155_v5, 0.0 }
 0x5e2   : > { %v3167_v27 = vmax.f32 (!%p3160_p2), %v3156_v15, 0.0  ;;  %v3667_v40 = vpack.c.bf16 (!%p3160_p2), %v3165_v63, %v3164_v22 }
 0x5e4   : > { %v3668_v35 = vpack.c.bf16 (!%p3160_p2), %v3167_v27, %v3166_v24  ;;  %3194 = vst [vmem:[#allocation2] sm:$0xff] (!%p3160_p2), %v3667_v40 }
 0x5e6   : > { %3195 = vst [vmem:[#allocation2 + $0x8] sm:$0xff] (!%p3160_p2), %v3668_v35 }
 0x698   : > { %3163 = sbr.rel (%p3160_p2) target bundleno = 1701 (0x6a5), region = 68 }
 0x69a   : > { %v3074_v32 = vpop.f32.mrb[16].mxu0 }
 0x69b   : > { %v3118_v16 = vmul.f32 %v3103_v19, %v3074_v32  ;;  %v3076_v31 = vpop.f32.mrb[17].mxu0 }
 0x69c   : > { %v3119_v17 = vmul.f32 %v3107_v49, %v3076_v31  ;;  %v3078_v18 = vpop.f32.mrb[18].mxu0 }
 0x69d   : > { %v3157_v20 = vadd.f32 %v3142_v1, %v3118_v16  ;;  %v3079_v21 = vpop.f32.mrb[19].mxu0 }
 0x69e   : > { %v3158_v37 = vadd.f32 %v3146_v2, %v3119_v17 }
 0x69f   : > { %v3168_v30 = vmax.f32 %v3157_v20, 0.0 }
 0x6a0   : > { %v3169_v51 = vmax.f32 %v3158_v37, 0.0 }
 0x6a2   : > { %v3669_v39 = vpack.c.bf16 %v3169_v51, %v3168_v30 }
 0x6a4   : > { %3196 = vst [vmem:[#allocation2 + $0x10] sm:$0xff] %v3669_v39 }
 0x6a5 PF: > { %3199 = sbr.rel (%p3493_p7) target bundleno = 1723 (0x6bb), region = 72  ;;  %3200 = vst [vmem:[%s4947_s6] sm:$0xff] (!%p3493_p7), %v3153_v61  ;;  %3201 = vst [vmem:[%s4947_s6 + $0x8] sm:$0xff] (!%p3493_p7), %v3154_v3  ;;  %v3203_v52 = vmul.f32 (!%p3493_p7), 0.5, %v3154_v3  ;;  %v3202_v36 = vld [vmem:[%s4942_s1] sm:$0xff] (!%p3493_p7) }
 0x6a7   : > { %v3204_v9 = vmul.f32 (!%p3493_p7), 1.442695, %v3203_v52 }
 0x6a9   : > { %3823 = vpow2.f32 (!%p3493_p7), %v3204_v9 }
 0x6b3   : > { %v3824_v62 = vpop.eup %3823 }
 0x6b4   : > { %v3206_v38 = vmul.f32 %v3824_v62, %v3202_v36 }
 0x6b6   : > { %v3207_v41 = vadd.f32 %v3206_v38, %v3153_v61 }
 0x6b8   : > { %v3208_v42 = vpack.c.bf16 %v3207_v41, %v3207_v41 }
 0x6ba   : > { %3209 = vst [vmem:[#allocation2] sm:$0xf] %v3208_v42 }
 0x6bb PF: > { %p3653_p3 = scmp.ne.s32.totalorder %s4053_s25, 5 }
 0x6bc   : > { %3213 = vst [vmem:[#allocation9] sm:$0xff] (!%p3653_p3), %v3153_v61 }
 0x6bd   : > { %3212 = sbr.rel (%p3653_p3) target bundleno = 1732 (0x6c4), region = 76 }
 0x6c4 PF: > { %s3998_s18 = smov [#allocation9]  }
 0x6c5   : > { %s3221_s21 = sshll.u32 %s3998_s18, 4  ;;  %s3222_s21 = int_to_ptr.vmem [resolvable:$true] %s3221_s21 }
 0x6c6   : > { %s3921_s24 = scalar_lea.vmem %s3222_s21, 128  ;;  %p3928_p4 = scmp.lt.s32.totalorder %s3222_s21, %s3222_s21 }
 0x6c7   : > { %p3922_p5 = scmp.ne.s32.totalorder %s3222_s21, %s3921_s24  ;;  %p3929_p12 = scmp.lt.s32.totalorder %s3921_s24, %s3921_s24 }
 0x6c9   : > { %p3923_p6 = pnand %p3922_p5, %p3159_p9  ;;  %p3930_p0 = por %p3929_p12, %p3928_p4 }
 0x6cb   : > { %p3924_p13 = pneg %p3923_p6 }
 0x6cd   : > { %p3931_p11 = pnand %p3930_p0, %p3924_p13 }
 0x6cf   : > { %3934 = shalt.err (!%p3931_p11)
}
 0x6d0   : > { %s3935_s17 = scalar_lea.hbm %s4946_s5, 128 }
 0x6d1   : > { %p3936_p10 = scmp.ne.s32.totalorder %s4946_s5, %s3935_s17  ;;  %p3941_p7 = scmp.lt.u32.totalorder %s3935_s17, %s4946_s5 }
 0x6d3   : > { %p3937_p8 = pnand %p3936_p10, %p3159_p9 }
 0x6d5   : > { %p3938_p1 = pneg %p3937_p8 }
 0x6d7   : > { %p3943_p2 = pnand %p3941_p7, %p3938_p1 }
 0x6d9   : > { %3946 = shalt.err (!%p3943_p2)
}
 0x6da   : > { %3755 = dma.vmem_to_hbm [thread:$0]  (%p3159_p9), %s3222_s21, 128, %s4946_s5, [#allocation5]  }
 0x6db   : > { %3972 = dma.done.wait (%p3159_p9), [#allocation5], 128  }
 0x6dc   : > { %3974 = vsyncadd (%p3159_p9), [#allocation5], 4294967168 }
 0x6dd PF: > { %p21_p3 = scmp.ge.s32.totalorder %s4056_s26, 8   ;;  %s4964_s21 = smov %s3981_s22 }
 0x6de   : > { %s4965_s22 = smov %s3985_s23  ;;  %s4966_s23 = smov %s4066_s29 }
 0x6df   : > { %s4967_s24 = smov %s4056_s26  ;;  %23 = sbr.rel (!%p21_p3) target bundleno = 8 (0x8), region = 139 }
 0x6e6   :  { %3240 = vsyncpa [#allocation4], 1 }
 0x6e7   :  { %3242 = vsyncpa [#allocation4 + $0x1], 1 }
 0x6e8   :  { %3243 = vsyncpa [#allocation7], 1 }
 0x6e9   :  { %3245 = vsyncpa [#allocation7 + $0x1], 1 }
 0x6ea   :  { %3246 = vsyncpa [#allocation5], 1 }
 0x6eb   :  { %3248 = vsyncpa [#allocation5 + $0x1], 1 }

</bundles_post_ra>
